<compile_context>
chip_gen: v7x
topology: tpu7x:2x2x1
jax: 0.10.0
libtpu: 0.0.40
codegen_flags: <defaults>
</compile_context>

<pallas_src>
import functools
from collections import namedtuple

import jax
import jax.numpy as jnp
import numpy as np
from jax import lax
from jax.experimental import pallas as pl
from jax.experimental.pallas import tpu as pltpu


# ----------------------------- micro hyper-params ------------------------------
class hp:
    n_mel = 8
    upsample_initial_channel = 32
    upsample_rates = (2, 2)
    upsample_kernel_sizes = (5, 5)
    resblock_kernel_sizes = (3, 7, 11)   # only len() is used by the module


LRELU_SLOPE = 0.1
PRE_K, RES_K, POST_K = 7, 41, 7

# Left offset of the live activation inside the halo'd staging buffer.  A
# multiple of 128 lanes so the main activation store is aligned; must be
# >= (RES_K - 1) // 2 = 20 so every tap's shifted window stays in-bounds.
HALO = 128


def _round_up(v, m):
    return -(-v // m) * m


# --------------------------- static tap bookkeeping -----------------------------
def conv_taps(K, pad):
    """Stride-1 Conv1d taps: out[:, j] += W[:, :, k] @ x[:, j + d],  d = k - pad."""
    return tuple((k - pad, k) for k in range(K))


def convT_phase_taps(u, K, pad):
    """Polyphase decomposition of ConvTranspose1d(stride=u, padding=pad).

    PyTorch:  out[:, j] = sum_{t, k : j = u*t - pad + k} W[:, :, k]^T @ x[:, t]
    For output phase q (positions j = u*m + q) this gives taps (d, k) with
        out[:, u*m + q] += W[:, :, k]^T @ x[:, m + d],   d = (q + pad - k) / u.
    The module uses padding=k//2, output_padding=u-1, so L_out = u * L_in and
    every j in [0, u*L_in) is produced by exactly this tap set.
    """
    phases = []
    for q in range(u):
        taps = []
        for k in range(K):
            num = q + pad - k
            if num % u == 0:
                taps.append((num // u, k))
        taps.sort()
        phases.append(tuple(taps))
    return tuple(phases)


# --------------------------- host-side weight packing ---------------------------
def _pack_conv_weight(w, taps, band):
    """Conv1d weight (C_out, C_in, K) -> (C_out, n_taps*band).  Each tap's C_in
    columns are zero-padded to `band` so the im2col row bands stay 16-aligned
    for the bf16 (16,128) sublane tiling."""
    c_in = w.shape[1]
    return jnp.concatenate(
        [jnp.pad(w[:, :, k], ((0, 0), (0, band - c_in))) for _, k in taps], axis=1)


def _pack_convT_stacked(w, u, K, pad, band):
    """ConvTranspose1d weight (C_in, C_out, K) -> stacked polyphase matrix
    (u*C_out, n_union_taps*band): row block q holds phase q's taps laid out on
    the UNION tap grid (zeros where the phase has no tap), so all u phases come
    out of a single im2col matmul."""
    c_in, c_out, _ = w.shape
    phases = convT_phase_taps(u, K, pad)
    union = tuple(sorted({d for taps in phases for d, _ in taps}))
    blocks = []
    for taps in phases:
        tap_of = dict(taps)                       # d -> k
        cols = []
        for d in union:
            if d in tap_of:
                blk = jnp.pad(jnp.transpose(w[:, :, tap_of[d]]),
                              ((0, 0), (0, band - c_in)))
            else:
                blk = jnp.zeros((c_out, band), jnp.float32)
            cols.append(blk)
        blocks.append(jnp.concatenate(cols, axis=1))
    return jnp.concatenate(blocks, axis=0), union


def _interleave_perm(u, L):
    """Host-precomputed 0/1 permutation P with P[q*L + m, u*m + q] = 1: maps the
    phase-blocked lane layout [phase_0 | ... | phase_{u-1}] to the interleaved
    signal (out[:, u*m + q] = phase_q[:, m]) with one MXU matmul."""
    P = np.zeros((u * L, u * L), np.float32)
    for q in range(u):
        for m in range(L):
            P[q * L + m, u * m + q] = 1.0
    return P


ConvOp = namedtuple("ConvOp", "w_off w_rows b_off band offsets")
Stage = namedtuple("Stage", "up res perm_off u c_out")
Plan = namedtuple("Plan", "pre stages post")


# ---------------------------------- the kernel ----------------------------------
def _generator_kernel(x_ref, w_ref, b_ref, o_ref, act, col, *, plan, T):
    """Whole generator forward for ONE batch element, fully fused in VMEM.

    Layout: channels on sublanes, time on lanes.
      act : (C_max, HALO + 4T + 128) bf16  zero-halo'd activation staging buffer
      col : (rows_max, 4T)           bf16  im2col scratch (also phase staging)
    """
    f32 = jnp.float32

    # Zero the staging buffer once per grid step: its never-written halo columns
    # implement every conv's zero padding, and this clears the previous batch
    # element's data.  (The im2col scratch is never zeroed: every element that
    # gets contracted is freshly written by the fill below.)
    act[...] = jnp.zeros_like(act)

    def put_act(h):
        act[0:h.shape[0], HALO:HALO + h.shape[1]] = h.astype(act.dtype)

    def leaky(v, slope):
        return jnp.where(v > 0, v, slope * v)

    def conv(op, L):
        """Stride-1 conv (or stacked ConvT phases) as ONE bf16 MXU matmul.

        Each tap copy is a full-width ALIGNED store into `col`; the tap shift
        and the boundary zero padding are absorbed on the load side by reading
        a shifted window of the zero-halo'd `act` buffer.
        """
        band = op.band
        for i, d in enumerate(op.offsets):
            col[i * band:(i + 1) * band, 0:L] = act[0:band, HALO + d:HALO + d + L]
        rows = len(op.offsets) * band
        acc = jnp.dot(w_ref[op.w_off:op.w_off + op.w_rows, 0:rows],
                      col[0:rows, 0:L], preferred_element_type=f32)
        return acc + b_ref[op.b_off:op.b_off + op.w_rows, 0:1]     # f32 bias

    # conv_pre (no pre-activation)
    L = T
    put_act(x_ref[0].astype(f32))
    h = conv(plan.pre, L)                                          # (32, T) f32

    for st in plan.stages:
        # leaky_relu(0.1) -> ConvTranspose1d: all u polyphase outputs from one
        # stacked matmul over the union tap set (no MACs on structural zeros).
        put_act(leaky(h, LRELU_SLOPE))
        s = conv(st.up, L)                                         # (u*C, L)
        u, C = st.u, st.c_out
        # Re-interleave onto the lane axis with ONE precomputed 0/1 permutation
        # matmul (phases staged phase-blocked in `col`; the selection is exact,
        # so no extra rounding beyond the unavoidable bf16 cast).
        # TODO(synk): for long sequences fold this into the next conv's im2col
        # fill (strided stores / full polyphase cascade) to drop the O(L^2) term.
        for q in range(u):
            col[0:C, q * L:(q + 1) * L] = s[q * C:(q + 1) * C, :].astype(col.dtype)
        h = jnp.dot(col[0:C, 0:u * L],
                    w_ref[st.perm_off:st.perm_off + u * L, 0:u * L],
                    preferred_element_type=f32)                    # (C, u*L)
        L = u * L
        # resblock: plain Conv1d(C, C, 41, padding=20) -- no inner activation.
        put_act(h)
        h = conv(st.res, L)

    # leaky_relu(0.01) -> conv_post -> tanh, lane-dense (1, 4T) store.
    put_act(leaky(h, 0.01))
    o_ref[0] = jnp.tanh(conv(plan.post, L)).astype(o_ref.dtype)


# ---------------------------------- wrapper -------------------------------------
def generator_pallas(params, x):
    """x: (B, n_mel, T) float32 (PyTorch NCL) -> (B, 1, T * prod(upsample_rates))."""
    B, c_mel, T = x.shape
    L_final = T * int(np.prod(hp.upsample_rates))
    assert c_mel == hp.n_mel and HALO >= RES_K // 2

    # ---- consolidate all weights into ONE bf16 array and all biases into ONE
    # ---- f32 array (single DMA each per grid step instead of ~14 tiny buffers).
    w_entries, w_offsets, b_entries, b_offsets = [], [], [], []
    w_rows = b_rows = 0

    def add_w(mat):
        nonlocal w_rows
        off = w_rows
        w_offsets.append(off)
        w_entries.append(mat)
        w_rows += _round_up(mat.shape[0], 16)      # bf16 (16,128) sublane tiles
        return off

    def add_b(vec):
        nonlocal b_rows
        off = b_rows
        b_offsets.append(off)
        b_entries.append(jnp.reshape(vec, (-1, 1)))
        b_rows += _round_up(vec.shape[0], 8)       # f32 (8,128) sublane tiles
        return off

    # conv_pre
    pre_taps = conv_taps(PRE_K, PRE_K // 2)
    band = _round_up(hp.n_mel, 16)
    w_pre = _pack_conv_weight(params['conv_pre']['w'], pre_taps, band)
    pre = ConvOp(add_w(w_pre), w_pre.shape[0], add_b(params['conv_pre']['b']),
                 band, tuple(d for d, _ in pre_taps))

    stages = []
    res_taps = conv_taps(RES_K, RES_K // 2)
    L = T
    for i, (u, k) in enumerate(zip(hp.upsample_rates, hp.upsample_kernel_sizes)):
        c_in = hp.upsample_initial_channel // 2 ** i
        c_out = hp.upsample_initial_channel // 2 ** (i + 1)

        # leaky(0.1) -> ConvTranspose1d(c_in, c_out, k, u, pad=k//2, out_pad=u-1)
        band_up = _round_up(c_in, 16)
        w_up, union = _pack_convT_stacked(params['ups'][i]['w'], u, k, k // 2, band_up)
        up = ConvOp(add_w(w_up), w_up.shape[0],
                    add_b(jnp.tile(params['ups'][i]['b'], u)), band_up, union)

        # resblock: Conv1d(c_out, c_out, 41, padding=20)
        band_res = _round_up(c_out, 16)
        w_res = _pack_conv_weight(params['resblocks'][i]['w'], res_taps, band_res)
        res = ConvOp(add_w(w_res), w_res.shape[0],
                     add_b(params['resblocks'][i]['b']), band_res,
                     tuple(d for d, _ in res_taps))

        perm_off = add_w(jnp.asarray(_interleave_perm(u, L)))
        stages.append(Stage(up, res, perm_off, u, c_out))
        L *= u

    # leaky(0.01) -> conv_post -> tanh
    post_taps = conv_taps(POST_K, POST_K // 2)
    ch = hp.upsample_initial_channel // 2 ** len(hp.upsample_rates)
    band_post = _round_up(ch, 16)
    w_post = _pack_conv_weight(params['conv_post']['w'], post_taps, band_post)
    post = ConvOp(add_w(w_post), w_post.shape[0], add_b(params['conv_post']['b']),
                  band_post, tuple(d for d, _ in post_taps))

    plan = Plan(pre, tuple(stages), post)

    w_cols = _round_up(max(int(e.shape[1]) for e in w_entries), 128)
    w_all = jnp.zeros((w_rows, w_cols), jnp.float32)
    for off, e in zip(w_offsets, w_entries):
        w_all = w_all.at[off:off + e.shape[0], 0:e.shape[1]].set(e.astype(jnp.float32))
    w_all = w_all.astype(jnp.bfloat16)             # bf16 MXU operands

    b_all = jnp.zeros((b_rows, 1), jnp.float32)
    for off, e in zip(b_offsets, b_entries):
        b_all = b_all.at[off:off + e.shape[0], 0:1].set(e.astype(jnp.float32))

    conv_ops = [pre, post] + [op for st in stages for op in (st.up, st.res)]
    rows_max = max(len(op.offsets) * op.band for op in conv_ops)   # 656
    c_max = max(hp.upsample_initial_channel, hp.n_mel)

    kernel = functools.partial(_generator_kernel, plan=plan, T=T)

    return pl.pallas_call(
        kernel,
        out_shape=jax.ShapeDtypeStruct((B, 1, L_final), jnp.float32),
        grid_spec=pltpu.PrefetchScalarGridSpec(
            num_scalar_prefetch=0,
            grid=(B,),
            in_specs=[
                pl.BlockSpec((1, c_mel, T), lambda b: (b, 0, 0)),
                pl.BlockSpec(w_all.shape, lambda b: (0, 0)),
                pl.BlockSpec(b_all.shape, lambda b: (0, 0)),
            ],
            out_specs=pl.BlockSpec((1, 1, L_final), lambda b: (b, 0, 0)),
            scratch_shapes=[
                pltpu.VMEM((c_max, HALO + L_final + 128), jnp.bfloat16),  # act
                pltpu.VMEM((rows_max, L_final), jnp.bfloat16),            # col
            ],
        ),
        compiler_params=pltpu.CompilerParams(
            dimension_semantics=("parallel",),     # v7x: shard batch across TCs
        ),
    )(x.astype(jnp.float32), w_all, b_all)


# ---------------------- independent pure-JAX / XLA reference --------------------
def generator_ref(params, x):
    P = lax.Precision.HIGHEST

    def conv(h, w, b, pad):
        y = lax.conv_general_dilated(h, w, window_strides=(1,), padding=[(pad, pad)],
                                     dimension_numbers=("NCH", "OIH", "NCH"),
                                     precision=P)
        return y + b[None, :, None]

    def convT(h, w, b, stride, pad, out_pad):
        K = w.shape[-1]
        w_flip = jnp.transpose(jnp.flip(w, axis=-1), (1, 0, 2))   # (C_out, C_in, K)
        y = lax.conv_general_dilated(h, w_flip, window_strides=(1,),
                                     padding=[(K - 1 - pad, K - 1 - pad + out_pad)],
                                     lhs_dilation=(stride,),
                                     dimension_numbers=("NCH", "OIH", "NCH"),
                                     precision=P)
        return y + b[None, :, None]

    h = conv(x, params['conv_pre']['w'], params['conv_pre']['b'], PRE_K // 2)
    for i, (u, k) in enumerate(zip(hp.upsample_rates, hp.upsample_kernel_sizes)):
        h = jnp.where(h > 0, h, LRELU_SLOPE * h)
        h = convT(h, params['ups'][i]['w'], params['ups'][i]['b'], u, k // 2, u - 1)
        h = conv(h, params['resblocks'][i]['w'], params['resblocks'][i]['b'], RES_K // 2)
    h = jnp.where(h > 0, h, 0.01 * h)
    h = conv(h, params['conv_post']['w'], params['conv_post']['b'], POST_K // 2)
    return jnp.tanh(h)


# ------------------------------- parameter init ---------------------------------
def init_params(key):
    # weight_norm(v) at construction equals the raw weight (g = ||v||), so the
    # reparameterisation is a no-op here and synthetic raw weights are used.
    def conv_init(k, c_out, c_in, ksize):
        kw, kb = jax.random.split(k)
        std = 1.0 / np.sqrt(c_in * ksize)
        return dict(w=std * jax.random.normal(kw, (c_out, c_in, ksize), jnp.float32),
                    b=0.1 * jax.random.normal(kb, (c_out,), jnp.float32))

    def convT_init(k, c_in, c_out, ksize):
        kw, kb = jax.random.split(k)
        std = 1.0 / np.sqrt(c_in * ksize)
        return dict(w=std * jax.random.normal(kw, (c_in, c_out, ksize), jnp.float32),
                    b=0.1 * jax.random.normal(kb, (c_out,), jnp.float32))

    C0 = hp.upsample_initial_channel
    keys = list(jax.random.split(key, 2 + 2 * len(hp.upsample_rates)))
    params = {'conv_pre': conv_init(keys.pop(), C0, hp.n_mel, PRE_K),
              'ups': [], 'resblocks': []}
    for i, (u, k) in enumerate(zip(hp.upsample_rates, hp.upsample_kernel_sizes)):
        cin, cout = C0 // 2 ** i, C0 // 2 ** (i + 1)
        params['ups'].append(convT_init(keys.pop(), cin, cout, k))
        params['resblocks'].append(conv_init(keys.pop(), cout, cout, RES_K))
    ch = C0 // 2 ** len(hp.upsample_rates)
    params['conv_post'] = conv_init(keys.pop(), 1, ch, POST_K)
    return params


# ------------------------------------ main ---------------------------------------
if __name__ == "__main__":
    key = jax.random.PRNGKey(0)
    k_param, k_x = jax.random.split(key)
    params = init_params(k_param)

    B, T = 2, 32            # T=32 -> final store is a lane-dense (1, 128) row
    x = jax.random.normal(k_x, (B, hp.n_mel, T), jnp.float32)   # PyTorch NCL input

    out = jax.block_until_ready(jax.jit(generator_pallas)(params, x))

    ref = generator_ref(params, x)
    expected_len = T * int(np.prod(hp.upsample_rates))
    assert out.shape == (B, 1, expected_len), out.shape
    # Tolerance covers bf16 MXU operands (with f32 accumulation) vs the f32 XLA
    # conv reference; a tap/phase/layout bug gives O(1) errors, far above this.
    np.testing.assert_allclose(np.asarray(out), np.asarray(ref), rtol=5e-2, atol=2e-2)

    print("KERNEL_OK")
</pallas_src>

<mosaic_0001>
module attributes {stable_mosaic.version = 11 : i64} {
  func.func @_generator_kernel(%arg0: i32, %arg1: memref<1x8x32xf32, #tpu.memory_space<vmem>>, %arg2: memref<320x768xbf16, #tpu.memory_space<vmem>>, %arg3: memref<112x1xf32, #tpu.memory_space<vmem>>, %arg4: memref<1x1x128xf32, #tpu.memory_space<vmem>>, %arg5: memref<32x384xbf16, #tpu.memory_space<vmem>>, %arg6: memref<656x128xbf16, #tpu.memory_space<vmem>>) attributes {dimension_semantics = [#tpu.dimension_semantics<parallel>], iteration_bounds = array<i64: 2>, scalar_prefetch = 0 : i64, scratch_operands = 2 : i64, tpu.core_type = #tpu.core_type<tc>, window_params = [{transform_indices = @transform_0, window_bounds = array<i64: 1, 8, 32>}, {pipeline_mode = #tpu.pipeline_mode<synchronous>, transform_indices = @transform_1, window_bounds = array<i64: 320, 768>}, {pipeline_mode = #tpu.pipeline_mode<synchronous>, transform_indices = @transform_2, window_bounds = array<i64: 112, 1>}, {transform_indices = @transform_3, window_bounds = array<i64: 1, 1, 128>}]} {
    %cst = arith.constant 0.000000e+00 : bf16
    %0 = vector.broadcast %cst : bf16 to vector<32x384xbf16>
    %c0 = arith.constant 0 : index
    %c0_0 = arith.constant 0 : index
    %1 = vector.load %arg5[%c0, %c0_0] : memref<32x384xbf16, #tpu.memory_space<vmem>>, vector<32x384xbf16>
    tpu.vector_store %arg5[%c0, %c0_0], %0 {strides = array<i32>} : memref<32x384xbf16, #tpu.memory_space<vmem>>, vector<32x384xbf16>,
    %c0_1 = arith.constant 0 : index
    %c0_2 = arith.constant 0 : index
    %c0_3 = arith.constant 0 : index
    %2 = vector.load %arg1[%c0_1, %c0_2, %c0_3] : memref<1x8x32xf32, #tpu.memory_space<vmem>>, vector<1x8x32xf32>
    %3 = vector.shape_cast %2 : vector<1x8x32xf32> to vector<8x32xf32>
    %4 = arith.truncf %3 : vector<8x32xf32> to vector<8x32xbf16>
    %c0_4 = arith.constant 0 : index
    %c128 = arith.constant 128 : index
    %5 = vector.load %arg5[%c0_4, %c128] : memref<32x384xbf16, #tpu.memory_space<vmem>>, vector<8x32xbf16>
    tpu.vector_store %arg5[%c0_4, %c128], %4 {strides = array<i32>} : memref<32x384xbf16, #tpu.memory_space<vmem>>, vector<8x32xbf16>,
    %c0_5 = arith.constant 0 : index
    %c125 = arith.constant 125 : index
    %6 = vector.load %arg5[%c0_5, %c125] : memref<32x384xbf16, #tpu.memory_space<vmem>>, vector<16x32xbf16>
    %c0_6 = arith.constant 0 : index
    %c0_7 = arith.constant 0 : index
    %7 = vector.load %arg6[%c0_6, %c0_7] : memref<656x128xbf16, #tpu.memory_space<vmem>>, vector<16x32xbf16>
    tpu.vector_store %arg6[%c0_6, %c0_7], %6 {strides = array<i32>} : memref<656x128xbf16, #tpu.memory_space<vmem>>, vector<16x32xbf16>,
    %c0_8 = arith.constant 0 : index
    %c126 = arith.constant 126 : index
    %8 = vector.load %arg5[%c0_8, %c126] : memref<32x384xbf16, #tpu.memory_space<vmem>>, vector<16x32xbf16>
    %c16 = arith.constant 16 : index
    %c0_9 = arith.constant 0 : index
    %9 = vector.load %arg6[%c16, %c0_9] : memref<656x128xbf16, #tpu.memory_space<vmem>>, vector<16x32xbf16>
    tpu.vector_store %arg6[%c16, %c0_9], %8 {strides = array<i32>} : memref<656x128xbf16, #tpu.memory_space<vmem>>, vector<16x32xbf16>,
    %c0_10 = arith.constant 0 : index
    %c127 = arith.constant 127 : index
    %10 = vector.load %arg5[%c0_10, %c127] : memref<32x384xbf16, #tpu.memory_space<vmem>>, vector<16x32xbf16>
    %c32 = arith.constant 32 : index
    %c0_11 = arith.constant 0 : index
    %11 = vector.load %arg6[%c32, %c0_11] : memref<656x128xbf16, #tpu.memory_space<vmem>>, vector<16x32xbf16>
    tpu.vector_store %arg6[%c32, %c0_11], %10 {strides = array<i32>} : memref<656x128xbf16, #tpu.memory_space<vmem>>, vector<16x32xbf16>,
    %c0_12 = arith.constant 0 : index
    %c128_13 = arith.constant 128 : index
    %12 = vector.load %arg5[%c0_12, %c128_13] : memref<32x384xbf16, #tpu.memory_space<vmem>>, vector<16x32xbf16>
    %c48 = arith.constant 48 : index
    %c0_14 = arith.constant 0 : index
    %13 = vector.load %arg6[%c48, %c0_14] : memref<656x128xbf16, #tpu.memory_space<vmem>>, vector<16x32xbf16>
    tpu.vector_store %arg6[%c48, %c0_14], %12 {strides = array<i32>} : memref<656x128xbf16, #tpu.memory_space<vmem>>, vector<16x32xbf16>,
    %c0_15 = arith.constant 0 : index
    %c129 = arith.constant 129 : index
    %14 = vector.load %arg5[%c0_15, %c129] : memref<32x384xbf16, #tpu.memory_space<vmem>>, vector<16x32xbf16>
    %c64 = arith.constant 64 : index
    %c0_16 = arith.constant 0 : index
    %15 = vector.load %arg6[%c64, %c0_16] : memref<656x128xbf16, #tpu.memory_space<vmem>>, vector<16x32xbf16>
    tpu.vector_store %arg6[%c64, %c0_16], %14 {strides = array<i32>} : memref<656x128xbf16, #tpu.memory_space<vmem>>, vector<16x32xbf16>,
    %c0_17 = arith.constant 0 : index
    %c130 = arith.constant 130 : index
    %16 = vector.load %arg5[%c0_17, %c130] : memref<32x384xbf16, #tpu.memory_space<vmem>>, vector<16x32xbf16>
    %c80 = arith.constant 80 : index
    %c0_18 = arith.constant 0 : index
    %17 = vector.load %arg6[%c80, %c0_18] : memref<656x128xbf16, #tpu.memory_space<vmem>>, vector<16x32xbf16>
    tpu.vector_store %arg6[%c80, %c0_18], %16 {strides = array<i32>} : memref<656x128xbf16, #tpu.memory_space<vmem>>, vector<16x32xbf16>,
    %c0_19 = arith.constant 0 : index
    %c131 = arith.constant 131 : index
    %18 = vector.load %arg5[%c0_19, %c131] : memref<32x384xbf16, #tpu.memory_space<vmem>>, vector<16x32xbf16>
    %c96 = arith.constant 96 : index
    %c0_20 = arith.constant 0 : index
    %19 = vector.load %arg6[%c96, %c0_20] : memref<656x128xbf16, #tpu.memory_space<vmem>>, vector<16x32xbf16>
    tpu.vector_store %arg6[%c96, %c0_20], %18 {strides = array<i32>} : memref<656x128xbf16, #tpu.memory_space<vmem>>, vector<16x32xbf16>,
    %c0_21 = arith.constant 0 : index
    %c0_22 = arith.constant 0 : index
    %20 = vector.load %arg2[%c0_21, %c0_22] : memref<320x768xbf16, #tpu.memory_space<vmem>>, vector<32x112xbf16>
    %c0_23 = arith.constant 0 : index
    %c0_24 = arith.constant 0 : index
    %21 = vector.load %arg6[%c0_23, %c0_24] : memref<656x128xbf16, #tpu.memory_space<vmem>>, vector<112x32xbf16>
    %cst_25 = arith.constant dense<0.000000e+00> : vector<32x32xf32>
    %22 = tpu.matmul %20, %21, %cst_25 {dimension_numbers = #tpu.dot_dimension_numbers<[1], [0], [0], [1], [0, 0, 1, 1], [], []>} : vector<32x112xbf16>, vector<112x32xbf16>, vector<32x32xf32> -> vector<32x32xf32>
    %c0_26 = arith.constant 0 : index
    %c0_27 = arith.constant 0 : index
    %23 = vector.load %arg3[%c0_26, %c0_27] : memref<112x1xf32, #tpu.memory_space<vmem>>, vector<32x1xf32>
    %24 = vector.broadcast %23 : vector<32x1xf32> to vector<32x32xf32>
    %25 = arith.addf %22, %24 : vector<32x32xf32>
    %cst_28 = arith.constant 0.000000e+00 : f32
    %26 = vector.broadcast %cst_28 : f32 to vector<32x32xf32>
    %27 = arith.cmpf ogt, %25, %26 : vector<32x32xf32>
    %cst_29 = arith.constant 1.000000e-01 : f32
    %28 = vector.broadcast %cst_29 : f32 to vector<32x32xf32>
    %29 = arith.mulf %28, %25 : vector<32x32xf32>
    %30 = arith.select %27, %25, %29 : vector<32x32xi1>, vector<32x32xf32>
    %31 = arith.truncf %30 : vector<32x32xf32> to vector<32x32xbf16>
    %c0_30 = arith.constant 0 : index
    %c128_31 = arith.constant 128 : index
    %32 = vector.load %arg5[%c0_30, %c128_31] : memref<32x384xbf16, #tpu.memory_space<vmem>>, vector<32x32xbf16>
    tpu.vector_store %arg5[%c0_30, %c128_31], %31 {strides = array<i32>} : memref<32x384xbf16, #tpu.memory_space<vmem>>, vector<32x32xbf16>,
    %c0_32 = arith.constant 0 : index
    %c127_33 = arith.constant 127 : index
    %33 = vector.load %arg5[%c0_32, %c127_33] : memref<32x384xbf16, #tpu.memory_space<vmem>>, vector<32x32xbf16>
    %c0_34 = arith.constant 0 : index
    %c0_35 = arith.constant 0 : index
    %34 = vector.load %arg6[%c0_34, %c0_35] : memref<656x128xbf16, #tpu.memory_space<vmem>>, vector<32x32xbf16>
    tpu.vector_store %arg6[%c0_34, %c0_35], %33 {strides = array<i32>} : memref<656x128xbf16, #tpu.memory_space<vmem>>, vector<32x32xbf16>,
    %c0_36 = arith.constant 0 : index
    %c128_37 = arith.constant 128 : index
    %35 = vector.load %arg5[%c0_36, %c128_37] : memref<32x384xbf16, #tpu.memory_space<vmem>>, vector<32x32xbf16>
    %c32_38 = arith.constant 32 : index
    %c0_39 = arith.constant 0 : index
    %36 = vector.load %arg6[%c32_38, %c0_39] : memref<656x128xbf16, #tpu.memory_space<vmem>>, vector<32x32xbf16>
    tpu.vector_store %arg6[%c32_38, %c0_39], %35 {strides = array<i32>} : memref<656x128xbf16, #tpu.memory_space<vmem>>, vector<32x32xbf16>,
    %c0_40 = arith.constant 0 : index
    %c129_41 = arith.constant 129 : index
    %37 = vector.load %arg5[%c0_40, %c129_41] : memref<32x384xbf16, #tpu.memory_space<vmem>>, vector<32x32xbf16>
    %c64_42 = arith.constant 64 : index
    %c0_43 = arith.constant 0 : index
    %38 = vector.load %arg6[%c64_42, %c0_43] : memref<656x128xbf16, #tpu.memory_space<vmem>>, vector<32x32xbf16>
    tpu.vector_store %arg6[%c64_42, %c0_43], %37 {strides = array<i32>} : memref<656x128xbf16, #tpu.memory_space<vmem>>, vector<32x32xbf16>,
    %c32_44 = arith.constant 32 : index
    %c0_45 = arith.constant 0 : index
    %39 = vector.load %arg2[%c32_44, %c0_45] : memref<320x768xbf16, #tpu.memory_space<vmem>>, vector<32x96xbf16>
    %c0_46 = arith.constant 0 : index
    %c0_47 = arith.constant 0 : index
    %40 = vector.load %arg6[%c0_46, %c0_47] : memref<656x128xbf16, #tpu.memory_space<vmem>>, vector<96x32xbf16>
    %cst_48 = arith.constant dense<0.000000e+00> : vector<32x32xf32>
    %41 = tpu.matmul %39, %40, %cst_48 {dimension_numbers = #tpu.dot_dimension_numbers<[1], [0], [0], [1], [0, 0, 1, 1], [], []>} : vector<32x96xbf16>, vector<96x32xbf16>, vector<32x32xf32> -> vector<32x32xf32>
    %c32_49 = arith.constant 32 : index
    %c0_50 = arith.constant 0 : index
    %42 = vector.load %arg3[%c32_49, %c0_50] : memref<112x1xf32, #tpu.memory_space<vmem>>, vector<32x1xf32>
    %43 = vector.broadcast %42 : vector<32x1xf32> to vector<32x32xf32>
    %44 = arith.addf %41, %43 : vector<32x32xf32>
    %45 = vector.extract_strided_slice %44 {offsets = [0, 0], sizes = [16, 32], strides = [1, 1]} : vector<32x32xf32> to vector<16x32xf32>
    %46 = arith.truncf %45 : vector<16x32xf32> to vector<16x32xbf16>
    %c0_51 = arith.constant 0 : index
    %c0_52 = arith.constant 0 : index
    %47 = vector.load %arg6[%c0_51, %c0_52] : memref<656x128xbf16, #tpu.memory_space<vmem>>, vector<16x32xbf16>
    tpu.vector_store %arg6[%c0_51, %c0_52], %46 {strides = array<i32>} : memref<656x128xbf16, #tpu.memory_space<vmem>>, vector<16x32xbf16>,
    %48 = vector.extract_strided_slice %44 {offsets = [16, 0], sizes = [16, 32], strides = [1, 1]} : vector<32x32xf32> to vector<16x32xf32>
    %49 = arith.truncf %48 : vector<16x32xf32> to vector<16x32xbf16>
    %c0_53 = arith.constant 0 : index
    %c32_54 = arith.constant 32 : index
    %50 = vector.load %arg6[%c0_53, %c32_54] : memref<656x128xbf16, #tpu.memory_space<vmem>>, vector<16x32xbf16>
    tpu.vector_store %arg6[%c0_53, %c32_54], %49 {strides = array<i32>} : memref<656x128xbf16, #tpu.memory_space<vmem>>, vector<16x32xbf16>,
    %c0_55 = arith.constant 0 : index
    %c0_56 = arith.constant 0 : index
    %51 = vector.load %arg6[%c0_55, %c0_56] : memref<656x128xbf16, #tpu.memory_space<vmem>>, vector<16x64xbf16>
    %c80_57 = arith.constant 80 : index
    %c0_58 = arith.constant 0 : index
    %52 = vector.load %arg2[%c80_57, %c0_58] : memref<320x768xbf16, #tpu.memory_space<vmem>>, vector<64x64xbf16>
    %cst_59 = arith.constant dense<0.000000e+00> : vector<16x64xf32>
    %53 = tpu.matmul %51, %52, %cst_59 {dimension_numbers = #tpu.dot_dimension_numbers<[1], [0], [0], [1], [0, 0, 1, 1], [], []>} : vector<16x64xbf16>, vector<64x64xbf16>, vector<16x64xf32> -> vector<16x64xf32>
    %54 = arith.truncf %53 : vector<16x64xf32> to vector<16x64xbf16>
    %c0_60 = arith.constant 0 : index
    %c128_61 = arith.constant 128 : index
    %55 = vector.load %arg5[%c0_60, %c128_61] : memref<32x384xbf16, #tpu.memory_space<vmem>>, vector<16x64xbf16>
    tpu.vector_store %arg5[%c0_60, %c128_61], %54 {strides = array<i32>} : memref<32x384xbf16, #tpu.memory_space<vmem>>, vector<16x64xbf16>,
    %c0_62 = arith.constant 0 : index
    %c108 = arith.constant 108 : index
    %56 = vector.load %arg5[%c0_62, %c108] : memref<32x384xbf16, #tpu.memory_space<vmem>>, vector<16x64xbf16>
    %c0_63 = arith.constant 0 : index
    %c0_64 = arith.constant 0 : index
    %57 = vector.load %arg6[%c0_63, %c0_64] : memref<656x128xbf16, #tpu.memory_space<vmem>>, vector<16x64xbf16>
    tpu.vector_store %arg6[%c0_63, %c0_64], %56 {strides = array<i32>} : memref<656x128xbf16, #tpu.memory_space<vmem>>, vector<16x64xbf16>,
    %c0_65 = arith.constant 0 : index
    %c109 = arith.constant 109 : index
    %58 = vector.load %arg5[%c0_65, %c109] : memref<32x384xbf16, #tpu.memory_space<vmem>>, vector<16x64xbf16>
    %c16_66 = arith.constant 16 : index
    %c0_67 = arith.constant 0 : index
    %59 = vector.load %arg6[%c16_66, %c0_67] : memref<656x128xbf16, #tpu.memory_space<vmem>>, vector<16x64xbf16>
    tpu.vector_store %arg6[%c16_66, %c0_67], %58 {strides = array<i32>} : memref<656x128xbf16, #tpu.memory_space<vmem>>, vector<16x64xbf16>,
    %c0_68 = arith.constant 0 : index
    %c110 = arith.constant 110 : index
    %60 = vector.load %arg5[%c0_68, %c110] : memref<32x384xbf16, #tpu.memory_space<vmem>>, vector<16x64xbf16>
    %c32_69 = arith.constant 32 : index
    %c0_70 = arith.constant 0 : index
    %61 = vector.load %arg6[%c32_69, %c0_70] : memref<656x128xbf16, #tpu.memory_space<vmem>>, vector<16x64xbf16>
    tpu.vector_store %arg6[%c32_69, %c0_70], %60 {strides = array<i32>} : memref<656x128xbf16, #tpu.memory_space<vmem>>, vector<16x64xbf16>,
    %c0_71 = arith.constant 0 : index
    %c111 = arith.constant 111 : index
    %62 = vector.load %arg5[%c0_71, %c111] : memref<32x384xbf16, #tpu.memory_space<vmem>>, vector<16x64xbf16>
    %c48_72 = arith.constant 48 : index
    %c0_73 = arith.constant 0 : index
    %63 = vector.load %arg6[%c48_72, %c0_73] : memref<656x128xbf16, #tpu.memory_space<vmem>>, vector<16x64xbf16>
    tpu.vector_store %arg6[%c48_72, %c0_73], %62 {strides = array<i32>} : memref<656x128xbf16, #tpu.memory_space<vmem>>, vector<16x64xbf16>,
    %c0_74 = arith.constant 0 : index
    %c112 = arith.constant 112 : index
    %64 = vector.load %arg5[%c0_74, %c112] : memref<32x384xbf16, #tpu.memory_space<vmem>>, vector<16x64xbf16>
    %c64_75 = arith.constant 64 : index
    %c0_76 = arith.constant 0 : index
    %65 = vector.load %arg6[%c64_75, %c0_76] : memref<656x128xbf16, #tpu.memory_space<vmem>>, vector<16x64xbf16>
    tpu.vector_store %arg6[%c64_75, %c0_76], %64 {strides = array<i32>} : memref<656x128xbf16, #tpu.memory_space<vmem>>, vector<16x64xbf16>,
    %c0_77 = arith.constant 0 : index
    %c113 = arith.constant 113 : index
    %66 = vector.load %arg5[%c0_77, %c113] : memref<32x384xbf16, #tpu.memory_space<vmem>>, vector<16x64xbf16>
    %c80_78 = arith.constant 80 : index
    %c0_79 = arith.constant 0 : index
    %67 = vector.load %arg6[%c80_78, %c0_79] : memref<656x128xbf16, #tpu.memory_space<vmem>>, vector<16x64xbf16>
    tpu.vector_store %arg6[%c80_78, %c0_79], %66 {strides = array<i32>} : memref<656x128xbf16, #tpu.memory_space<vmem>>, vector<16x64xbf16>,
    %c0_80 = arith.constant 0 : index
    %c114 = arith.constant 114 : index
    %68 = vector.load %arg5[%c0_80, %c114] : memref<32x384xbf16, #tpu.memory_space<vmem>>, vector<16x64xbf16>
    %c96_81 = arith.constant 96 : index
    %c0_82 = arith.constant 0 : index
    %69 = vector.load %arg6[%c96_81, %c0_82] : memref<656x128xbf16, #tpu.memory_space<vmem>>, vector<16x64xbf16>
    tpu.vector_store %arg6[%c96_81, %c0_82], %68 {strides = array<i32>} : memref<656x128xbf16, #tpu.memory_space<vmem>>, vector<16x64xbf16>,
    %c0_83 = arith.constant 0 : index
    %c115 = arith.constant 115 : index
    %70 = vector.load %arg5[%c0_83, %c115] : memref<32x384xbf16, #tpu.memory_space<vmem>>, vector<16x64xbf16>
    %c112_84 = arith.constant 112 : index
    %c0_85 = arith.constant 0 : index
    %71 = vector.load %arg6[%c112_84, %c0_85] : memref<656x128xbf16, #tpu.memory_space<vmem>>, vector<16x64xbf16>
    tpu.vector_store %arg6[%c112_84, %c0_85], %70 {strides = array<i32>} : memref<656x128xbf16, #tpu.memory_space<vmem>>, vector<16x64xbf16>,
    %c0_86 = arith.constant 0 : index
    %c116 = arith.constant 116 : index
    %72 = vector.load %arg5[%c0_86, %c116] : memref<32x384xbf16, #tpu.memory_space<vmem>>, vector<16x64xbf16>
    %c128_87 = arith.constant 128 : index
    %c0_88 = arith.constant 0 : index
    %73 = vector.load %arg6[%c128_87, %c0_88] : memref<656x128xbf16, #tpu.memory_space<vmem>>, vector<16x64xbf16>
    tpu.vector_store %arg6[%c128_87, %c0_88], %72 {strides = array<i32>} : memref<656x128xbf16, #tpu.memory_space<vmem>>, vector<16x64xbf16>,
    %c0_89 = arith.constant 0 : index
    %c117 = arith.constant 117 : index
    %74 = vector.load %arg5[%c0_89, %c117] : memref<32x384xbf16, #tpu.memory_space<vmem>>, vector<16x64xbf16>
    %c144 = arith.constant 144 : index
    %c0_90 = arith.constant 0 : index
    %75 = vector.load %arg6[%c144, %c0_90] : memref<656x128xbf16, #tpu.memory_space<vmem>>, vector<16x64xbf16>
    tpu.vector_store %arg6[%c144, %c0_90], %74 {strides = array<i32>} : memref<656x128xbf16, #tpu.memory_space<vmem>>, vector<16x64xbf16>,
    %c0_91 = arith.constant 0 : index
    %c118 = arith.constant 118 : index
    %76 = vector.load %arg5[%c0_91, %c118] : memref<32x384xbf16, #tpu.memory_space<vmem>>, vector<16x64xbf16>
    %c160 = arith.constant 160 : index
    %c0_92 = arith.constant 0 : index
    %77 = vector.load %arg6[%c160, %c0_92] : memref<656x128xbf16, #tpu.memory_space<vmem>>, vector<16x64xbf16>
    tpu.vector_store %arg6[%c160, %c0_92], %76 {strides = array<i32>} : memref<656x128xbf16, #tpu.memory_space<vmem>>, vector<16x64xbf16>,
    %c0_93 = arith.constant 0 : index
    %c119 = arith.constant 119 : index
    %78 = vector.load %arg5[%c0_93, %c119] : memref<32x384xbf16, #tpu.memory_space<vmem>>, vector<16x64xbf16>
    %c176 = arith.constant 176 : index
    %c0_94 = arith.constant 0 : index
    %79 = vector.load %arg6[%c176, %c0_94] : memref<656x128xbf16, #tpu.memory_space<vmem>>, vector<16x64xbf16>
    tpu.vector_store %arg6[%c176, %c0_94], %78 {strides = array<i32>} : memref<656x128xbf16, #tpu.memory_space<vmem>>, vector<16x64xbf16>,
    %c0_95 = arith.constant 0 : index
    %c120 = arith.constant 120 : index
    %80 = vector.load %arg5[%c0_95, %c120] : memref<32x384xbf16, #tpu.memory_space<vmem>>, vector<16x64xbf16>
    %c192 = arith.constant 192 : index
    %c0_96 = arith.constant 0 : index
    %81 = vector.load %arg6[%c192, %c0_96] : memref<656x128xbf16, #tpu.memory_space<vmem>>, vector<16x64xbf16>
    tpu.vector_store %arg6[%c192, %c0_96], %80 {strides = array<i32>} : memref<656x128xbf16, #tpu.memory_space<vmem>>, vector<16x64xbf16>,
    %c0_97 = arith.constant 0 : index
    %c121 = arith.constant 121 : index
    %82 = vector.load %arg5[%c0_97, %c121] : memref<32x384xbf16, #tpu.memory_space<vmem>>, vector<16x64xbf16>
    %c208 = arith.constant 208 : index
    %c0_98 = arith.constant 0 : index
    %83 = vector.load %arg6[%c208, %c0_98] : memref<656x128xbf16, #tpu.memory_space<vmem>>, vector<16x64xbf16>
    tpu.vector_store %arg6[%c208, %c0_98], %82 {strides = array<i32>} : memref<656x128xbf16, #tpu.memory_space<vmem>>, vector<16x64xbf16>,
    %c0_99 = arith.constant 0 : index
    %c122 = arith.constant 122 : index
    %84 = vector.load %arg5[%c0_99, %c122] : memref<32x384xbf16, #tpu.memory_space<vmem>>, vector<16x64xbf16>
    %c224 = arith.constant 224 : index
    %c0_100 = arith.constant 0 : index
    %85 = vector.load %arg6[%c224, %c0_100] : memref<656x128xbf16, #tpu.memory_space<vmem>>, vector<16x64xbf16>
    tpu.vector_store %arg6[%c224, %c0_100], %84 {strides = array<i32>} : memref<656x128xbf16, #tpu.memory_space<vmem>>, vector<16x64xbf16>,
    %c0_101 = arith.constant 0 : index
    %c123 = arith.constant 123 : index
    %86 = vector.load %arg5[%c0_101, %c123] : memref<32x384xbf16, #tpu.memory_space<vmem>>, vector<16x64xbf16>
    %c240 = arith.constant 240 : index
    %c0_102 = arith.constant 0 : index
    %87 = vector.load %arg6[%c240, %c0_102] : memref<656x128xbf16, #tpu.memory_space<vmem>>, vector<16x64xbf16>
    tpu.vector_store %arg6[%c240, %c0_102], %86 {strides = array<i32>} : memref<656x128xbf16, #tpu.memory_space<vmem>>, vector<16x64xbf16>,
    %c0_103 = arith.constant 0 : index
    %c124 = arith.constant 124 : index
    %88 = vector.load %arg5[%c0_103, %c124] : memref<32x384xbf16, #tpu.memory_space<vmem>>, vector<16x64xbf16>
    %c256 = arith.constant 256 : index
    %c0_104 = arith.constant 0 : index
    %89 = vector.load %arg6[%c256, %c0_104] : memref<656x128xbf16, #tpu.memory_space<vmem>>, vector<16x64xbf16>
    tpu.vector_store %arg6[%c256, %c0_104], %88 {strides = array<i32>} : memref<656x128xbf16, #tpu.memory_space<vmem>>, vector<16x64xbf16>,
    %c0_105 = arith.constant 0 : index
    %c125_106 = arith.constant 125 : index
    %90 = vector.load %arg5[%c0_105, %c125_106] : memref<32x384xbf16, #tpu.memory_space<vmem>>, vector<16x64xbf16>
    %c272 = arith.constant 272 : index
    %c0_107 = arith.constant 0 : index
    %91 = vector.load %arg6[%c272, %c0_107] : memref<656x128xbf16, #tpu.memory_space<vmem>>, vector<16x64xbf16>
    tpu.vector_store %arg6[%c272, %c0_107], %90 {strides = array<i32>} : memref<656x128xbf16, #tpu.memory_space<vmem>>, vector<16x64xbf16>,
    %c0_108 = arith.constant 0 : index
    %c126_109 = arith.constant 126 : index
    %92 = vector.load %arg5[%c0_108, %c126_109] : memref<32x384xbf16, #tpu.memory_space<vmem>>, vector<16x64xbf16>
    %c288 = arith.constant 288 : index
    %c0_110 = arith.constant 0 : index
    %93 = vector.load %arg6[%c288, %c0_110] : memref<656x128xbf16, #tpu.memory_space<vmem>>, vector<16x64xbf16>
    tpu.vector_store %arg6[%c288, %c0_110], %92 {strides = array<i32>} : memref<656x128xbf16, #tpu.memory_space<vmem>>, vector<16x64xbf16>,
    %c0_111 = arith.constant 0 : index
    %c127_112 = arith.constant 127 : index
    %94 = vector.load %arg5[%c0_111, %c127_112] : memref<32x384xbf16, #tpu.memory_space<vmem>>, vector<16x64xbf16>
    %c304 = arith.constant 304 : index
    %c0_113 = arith.constant 0 : index
    %95 = vector.load %arg6[%c304, %c0_113] : memref<656x128xbf16, #tpu.memory_space<vmem>>, vector<16x64xbf16>
    tpu.vector_store %arg6[%c304, %c0_113], %94 {strides = array<i32>} : memref<656x128xbf16, #tpu.memory_space<vmem>>, vector<16x64xbf16>,
    %c0_114 = arith.constant 0 : index
    %c128_115 = arith.constant 128 : index
    %96 = vector.load %arg5[%c0_114, %c128_115] : memref<32x384xbf16, #tpu.memory_space<vmem>>, vector<16x64xbf16>
    %c320 = arith.constant 320 : index
    %c0_116 = arith.constant 0 : index
    %97 = vector.load %arg6[%c320, %c0_116] : memref<656x128xbf16, #tpu.memory_space<vmem>>, vector<16x64xbf16>
    tpu.vector_store %arg6[%c320, %c0_116], %96 {strides = array<i32>} : memref<656x128xbf16, #tpu.memory_space<vmem>>, vector<16x64xbf16>,
    %c0_117 = arith.constant 0 : index
    %c129_118 = arith.constant 129 : index
    %98 = vector.load %arg5[%c0_117, %c129_118] : memref<32x384xbf16, #tpu.memory_space<vmem>>, vector<16x64xbf16>
    %c336 = arith.constant 336 : index
    %c0_119 = arith.constant 0 : index
    %99 = vector.load %arg6[%c336, %c0_119] : memref<656x128xbf16, #tpu.memory_space<vmem>>, vector<16x64xbf16>
    tpu.vector_store %arg6[%c336, %c0_119], %98 {strides = array<i32>} : memref<656x128xbf16, #tpu.memory_space<vmem>>, vector<16x64xbf16>,
    %c0_120 = arith.constant 0 : index
    %c130_121 = arith.constant 130 : index
    %100 = vector.load %arg5[%c0_120, %c130_121] : memref<32x384xbf16, #tpu.memory_space<vmem>>, vector<16x64xbf16>
    %c352 = arith.constant 352 : index
    %c0_122 = arith.constant 0 : index
    %101 = vector.load %arg6[%c352, %c0_122] : memref<656x128xbf16, #tpu.memory_space<vmem>>, vector<16x64xbf16>
    tpu.vector_store %arg6[%c352, %c0_122], %100 {strides = array<i32>} : memref<656x128xbf16, #tpu.memory_space<vmem>>, vector<16x64xbf16>,
    %c0_123 = arith.constant 0 : index
    %c131_124 = arith.constant 131 : index
    %102 = vector.load %arg5[%c0_123, %c131_124] : memref<32x384xbf16, #tpu.memory_space<vmem>>, vector<16x64xbf16>
    %c368 = arith.constant 368 : index
    %c0_125 = arith.constant 0 : index
    %103 = vector.load %arg6[%c368, %c0_125] : memref<656x128xbf16, #tpu.memory_space<vmem>>, vector<16x64xbf16>
    tpu.vector_store %arg6[%c368, %c0_125], %102 {strides = array<i32>} : memref<656x128xbf16, #tpu.memory_space<vmem>>, vector<16x64xbf16>,
    %c0_126 = arith.constant 0 : index
    %c132 = arith.constant 132 : index
    %104 = vector.load %arg5[%c0_126, %c132] : memref<32x384xbf16, #tpu.memory_space<vmem>>, vector<16x64xbf16>
    %c384 = arith.constant 384 : index
    %c0_127 = arith.constant 0 : index
    %105 = vector.load %arg6[%c384, %c0_127] : memref<656x128xbf16, #tpu.memory_space<vmem>>, vector<16x64xbf16>
    tpu.vector_store %arg6[%c384, %c0_127], %104 {strides = array<i32>} : memref<656x128xbf16, #tpu.memory_space<vmem>>, vector<16x64xbf16>,
    %c0_128 = arith.constant 0 : index
    %c133 = arith.constant 133 : index
    %106 = vector.load %arg5[%c0_128, %c133] : memref<32x384xbf16, #tpu.memory_space<vmem>>, vector<16x64xbf16>
    %c400 = arith.constant 400 : index
    %c0_129 = arith.constant 0 : index
    %107 = vector.load %arg6[%c400, %c0_129] : memref<656x128xbf16, #tpu.memory_space<vmem>>, vector<16x64xbf16>
    tpu.vector_store %arg6[%c400, %c0_129], %106 {strides = array<i32>} : memref<656x128xbf16, #tpu.memory_space<vmem>>, vector<16x64xbf16>,
    %c0_130 = arith.constant 0 : index
    %c134 = arith.constant 134 : index
    %108 = vector.load %arg5[%c0_130, %c134] : memref<32x384xbf16, #tpu.memory_space<vmem>>, vector<16x64xbf16>
    %c416 = arith.constant 416 : index
    %c0_131 = arith.constant 0 : index
    %109 = vector.load %arg6[%c416, %c0_131] : memref<656x128xbf16, #tpu.memory_space<vmem>>, vector<16x64xbf16>
    tpu.vector_store %arg6[%c416, %c0_131], %108 {strides = array<i32>} : memref<656x128xbf16, #tpu.memory_space<vmem>>, vector<16x64xbf16>,
    %c0_132 = arith.constant 0 : index
    %c135 = arith.constant 135 : index
    %110 = vector.load %arg5[%c0_132, %c135] : memref<32x384xbf16, #tpu.memory_space<vmem>>, vector<16x64xbf16>
    %c432 = arith.constant 432 : index
    %c0_133 = arith.constant 0 : index
    %111 = vector.load %arg6[%c432, %c0_133] : memref<656x128xbf16, #tpu.memory_space<vmem>>, vector<16x64xbf16>
    tpu.vector_store %arg6[%c432, %c0_133], %110 {strides = array<i32>} : memref<656x128xbf16, #tpu.memory_space<vmem>>, vector<16x64xbf16>,
    %c0_134 = arith.constant 0 : index
    %c136 = arith.constant 136 : index
    %112 = vector.load %arg5[%c0_134, %c136] : memref<32x384xbf16, #tpu.memory_space<vmem>>, vector<16x64xbf16>
    %c448 = arith.constant 448 : index
    %c0_135 = arith.constant 0 : index
    %113 = vector.load %arg6[%c448, %c0_135] : memref<656x128xbf16, #tpu.memory_space<vmem>>, vector<16x64xbf16>
    tpu.vector_store %arg6[%c448, %c0_135], %112 {strides = array<i32>} : memref<656x128xbf16, #tpu.memory_space<vmem>>, vector<16x64xbf16>,
    %c0_136 = arith.constant 0 : index
    %c137 = arith.constant 137 : index
    %114 = vector.load %arg5[%c0_136, %c137] : memref<32x384xbf16, #tpu.memory_space<vmem>>, vector<16x64xbf16>
    %c464 = arith.constant 464 : index
    %c0_137 = arith.constant 0 : index
    %115 = vector.load %arg6[%c464, %c0_137] : memref<656x128xbf16, #tpu.memory_space<vmem>>, vector<16x64xbf16>
    tpu.vector_store %arg6[%c464, %c0_137], %114 {strides = array<i32>} : memref<656x128xbf16, #tpu.memory_space<vmem>>, vector<16x64xbf16>,
    %c0_138 = arith.constant 0 : index
    %c138 = arith.constant 138 : index
    %116 = vector.load %arg5[%c0_138, %c138] : memref<32x384xbf16, #tpu.memory_space<vmem>>, vector<16x64xbf16>
    %c480 = arith.constant 480 : index
    %c0_139 = arith.constant 0 : index
    %117 = vector.load %arg6[%c480, %c0_139] : memref<656x128xbf16, #tpu.memory_space<vmem>>, vector<16x64xbf16>
    tpu.vector_store %arg6[%c480, %c0_139], %116 {strides = array<i32>} : memref<656x128xbf16, #tpu.memory_space<vmem>>, vector<16x64xbf16>,
    %c0_140 = arith.constant 0 : index
    %c139 = arith.constant 139 : index
    %118 = vector.load %arg5[%c0_140, %c139] : memref<32x384xbf16, #tpu.memory_space<vmem>>, vector<16x64xbf16>
    %c496 = arith.constant 496 : index
    %c0_141 = arith.constant 0 : index
    %119 = vector.load %arg6[%c496, %c0_141] : memref<656x128xbf16, #tpu.memory_space<vmem>>, vector<16x64xbf16>
    tpu.vector_store %arg6[%c496, %c0_141], %118 {strides = array<i32>} : memref<656x128xbf16, #tpu.memory_space<vmem>>, vector<16x64xbf16>,
    %c0_142 = arith.constant 0 : index
    %c140 = arith.constant 140 : index
    %120 = vector.load %arg5[%c0_142, %c140] : memref<32x384xbf16, #tpu.memory_space<vmem>>, vector<16x64xbf16>
    %c512 = arith.constant 512 : index
    %c0_143 = arith.constant 0 : index
    %121 = vector.load %arg6[%c512, %c0_143] : memref<656x128xbf16, #tpu.memory_space<vmem>>, vector<16x64xbf16>
    tpu.vector_store %arg6[%c512, %c0_143], %120 {strides = array<i32>} : memref<656x128xbf16, #tpu.memory_space<vmem>>, vector<16x64xbf16>,
    %c0_144 = arith.constant 0 : index
    %c141 = arith.constant 141 : index
    %122 = vector.load %arg5[%c0_144, %c141] : memref<32x384xbf16, #tpu.memory_space<vmem>>, vector<16x64xbf16>
    %c528 = arith.constant 528 : index
    %c0_145 = arith.constant 0 : index
    %123 = vector.load %arg6[%c528, %c0_145] : memref<656x128xbf16, #tpu.memory_space<vmem>>, vector<16x64xbf16>
    tpu.vector_store %arg6[%c528, %c0_145], %122 {strides = array<i32>} : memref<656x128xbf16, #tpu.memory_space<vmem>>, vector<16x64xbf16>,
    %c0_146 = arith.constant 0 : index
    %c142 = arith.constant 142 : index
    %124 = vector.load %arg5[%c0_146, %c142] : memref<32x384xbf16, #tpu.memory_space<vmem>>, vector<16x64xbf16>
    %c544 = arith.constant 544 : index
    %c0_147 = arith.constant 0 : index
    %125 = vector.load %arg6[%c544, %c0_147] : memref<656x128xbf16, #tpu.memory_space<vmem>>, vector<16x64xbf16>
    tpu.vector_store %arg6[%c544, %c0_147], %124 {strides = array<i32>} : memref<656x128xbf16, #tpu.memory_space<vmem>>, vector<16x64xbf16>,
    %c0_148 = arith.constant 0 : index
    %c143 = arith.constant 143 : index
    %126 = vector.load %arg5[%c0_148, %c143] : memref<32x384xbf16, #tpu.memory_space<vmem>>, vector<16x64xbf16>
    %c560 = arith.constant 560 : index
    %c0_149 = arith.constant 0 : index
    %127 = vector.load %arg6[%c560, %c0_149] : memref<656x128xbf16, #tpu.memory_space<vmem>>, vector<16x64xbf16>
    tpu.vector_store %arg6[%c560, %c0_149], %126 {strides = array<i32>} : memref<656x128xbf16, #tpu.memory_space<vmem>>, vector<16x64xbf16>,
    %c0_150 = arith.constant 0 : index
    %c144_151 = arith.constant 144 : index
    %128 = vector.load %arg5[%c0_150, %c144_151] : memref<32x384xbf16, #tpu.memory_space<vmem>>, vector<16x64xbf16>
    %c576 = arith.constant 576 : index
    %c0_152 = arith.constant 0 : index
    %129 = vector.load %arg6[%c576, %c0_152] : memref<656x128xbf16, #tpu.memory_space<vmem>>, vector<16x64xbf16>
    tpu.vector_store %arg6[%c576, %c0_152], %128 {strides = array<i32>} : memref<656x128xbf16, #tpu.memory_space<vmem>>, vector<16x64xbf16>,
    %c0_153 = arith.constant 0 : index
    %c145 = arith.constant 145 : index
    %130 = vector.load %arg5[%c0_153, %c145] : memref<32x384xbf16, #tpu.memory_space<vmem>>, vector<16x64xbf16>
    %c592 = arith.constant 592 : index
    %c0_154 = arith.constant 0 : index
    %131 = vector.load %arg6[%c592, %c0_154] : memref<656x128xbf16, #tpu.memory_space<vmem>>, vector<16x64xbf16>
    tpu.vector_store %arg6[%c592, %c0_154], %130 {strides = array<i32>} : memref<656x128xbf16, #tpu.memory_space<vmem>>, vector<16x64xbf16>,
    %c0_155 = arith.constant 0 : index
    %c146 = arith.constant 146 : index
    %132 = vector.load %arg5[%c0_155, %c146] : memref<32x384xbf16, #tpu.memory_space<vmem>>, vector<16x64xbf16>
    %c608 = arith.constant 608 : index
    %c0_156 = arith.constant 0 : index
    %133 = vector.load %arg6[%c608, %c0_156] : memref<656x128xbf16, #tpu.memory_space<vmem>>, vector<16x64xbf16>
    tpu.vector_store %arg6[%c608, %c0_156], %132 {strides = array<i32>} : memref<656x128xbf16, #tpu.memory_space<vmem>>, vector<16x64xbf16>,
    %c0_157 = arith.constant 0 : index
    %c147 = arith.constant 147 : index
    %134 = vector.load %arg5[%c0_157, %c147] : memref<32x384xbf16, #tpu.memory_space<vmem>>, vector<16x64xbf16>
    %c624 = arith.constant 624 : index
    %c0_158 = arith.constant 0 : index
    %135 = vector.load %arg6[%c624, %c0_158] : memref<656x128xbf16, #tpu.memory_space<vmem>>, vector<16x64xbf16>
    tpu.vector_store %arg6[%c624, %c0_158], %134 {strides = array<i32>} : memref<656x128xbf16, #tpu.memory_space<vmem>>, vector<16x64xbf16>,
    %c0_159 = arith.constant 0 : index
    %c148 = arith.constant 148 : index
    %136 = vector.load %arg5[%c0_159, %c148] : memref<32x384xbf16, #tpu.memory_space<vmem>>, vector<16x64xbf16>
    %c640 = arith.constant 640 : index
    %c0_160 = arith.constant 0 : index
    %137 = vector.load %arg6[%c640, %c0_160] : memref<656x128xbf16, #tpu.memory_space<vmem>>, vector<16x64xbf16>
    tpu.vector_store %arg6[%c640, %c0_160], %136 {strides = array<i32>} : memref<656x128xbf16, #tpu.memory_space<vmem>>, vector<16x64xbf16>,
    %c64_161 = arith.constant 64 : index
    %c0_162 = arith.constant 0 : index
    %138 = vector.load %arg2[%c64_161, %c0_162] : memref<320x768xbf16, #tpu.memory_space<vmem>>, vector<16x656xbf16>
    %c0_163 = arith.constant 0 : index
    %c0_164 = arith.constant 0 : index
    %139 = vector.load %arg6[%c0_163, %c0_164] : memref<656x128xbf16, #tpu.memory_space<vmem>>, vector<656x64xbf16>
    %cst_165 = arith.constant dense<0.000000e+00> : vector<16x64xf32>
    %140 = tpu.matmul %138, %139, %cst_165 {dimension_numbers = #tpu.dot_dimension_numbers<[1], [0], [0], [1], [0, 0, 1, 1], [], []>} : vector<16x656xbf16>, vector<656x64xbf16>, vector<16x64xf32> -> vector<16x64xf32>
    %c64_166 = arith.constant 64 : index
    %c0_167 = arith.constant 0 : index
    %141 = vector.load %arg3[%c64_166, %c0_167] : memref<112x1xf32, #tpu.memory_space<vmem>>, vector<16x1xf32>
    %142 = vector.broadcast %141 : vector<16x1xf32> to vector<16x64xf32>
    %143 = arith.addf %140, %142 : vector<16x64xf32>
    %cst_168 = arith.constant 0.000000e+00 : f32
    %144 = vector.broadcast %cst_168 : f32 to vector<16x64xf32>
    %145 = arith.cmpf ogt, %143, %144 : vector<16x64xf32>
    %cst_169 = arith.constant 1.000000e-01 : f32
    %146 = vector.broadcast %cst_169 : f32 to vector<16x64xf32>
    %147 = arith.mulf %146, %143 : vector<16x64xf32>
    %148 = arith.select %145, %143, %147 : vector<16x64xi1>, vector<16x64xf32>
    %149 = arith.truncf %148 : vector<16x64xf32> to vector<16x64xbf16>
    %c0_170 = arith.constant 0 : index
    %c128_171 = arith.constant 128 : index
    %150 = vector.load %arg5[%c0_170, %c128_171] : memref<32x384xbf16, #tpu.memory_space<vmem>>, vector<16x64xbf16>
    tpu.vector_store %arg5[%c0_170, %c128_171], %149 {strides = array<i32>} : memref<32x384xbf16, #tpu.memory_space<vmem>>, vector<16x64xbf16>,
    %c0_172 = arith.constant 0 : index
    %c127_173 = arith.constant 127 : index
    %151 = vector.load %arg5[%c0_172, %c127_173] : memref<32x384xbf16, #tpu.memory_space<vmem>>, vector<16x64xbf16>
    %c0_174 = arith.constant 0 : index
    %c0_175 = arith.constant 0 : index
    %152 = vector.load %arg6[%c0_174, %c0_175] : memref<656x128xbf16, #tpu.memory_space<vmem>>, vector<16x64xbf16>
    tpu.vector_store %arg6[%c0_174, %c0_175], %151 {strides = array<i32>} : memref<656x128xbf16, #tpu.memory_space<vmem>>, vector<16x64xbf16>,
    %c0_176 = arith.constant 0 : index
    %c128_177 = arith.constant 128 : index
    %153 = vector.load %arg5[%c0_176, %c128_177] : memref<32x384xbf16, #tpu.memory_space<vmem>>, vector<16x64xbf16>
    %c16_178 = arith.constant 16 : index
    %c0_179 = arith.constant 0 : index
    %154 = vector.load %arg6[%c16_178, %c0_179] : memref<656x128xbf16, #tpu.memory_space<vmem>>, vector<16x64xbf16>
    tpu.vector_store %arg6[%c16_178, %c0_179], %153 {strides = array<i32>} : memref<656x128xbf16, #tpu.memory_space<vmem>>, vector<16x64xbf16>,
    %c0_180 = arith.constant 0 : index
    %c129_181 = arith.constant 129 : index
    %155 = vector.load %arg5[%c0_180, %c129_181] : memref<32x384xbf16, #tpu.memory_space<vmem>>, vector<16x64xbf16>
    %c32_182 = arith.constant 32 : index
    %c0_183 = arith.constant 0 : index
    %156 = vector.load %arg6[%c32_182, %c0_183] : memref<656x128xbf16, #tpu.memory_space<vmem>>, vector<16x64xbf16>
    tpu.vector_store %arg6[%c32_182, %c0_183], %155 {strides = array<i32>} : memref<656x128xbf16, #tpu.memory_space<vmem>>, vector<16x64xbf16>,
    %c144_184 = arith.constant 144 : index
    %c0_185 = arith.constant 0 : index
    %157 = vector.load %arg2[%c144_184, %c0_185] : memref<320x768xbf16, #tpu.memory_space<vmem>>, vector<16x48xbf16>
    %c0_186 = arith.constant 0 : index
    %c0_187 = arith.constant 0 : index
    %158 = vector.load %arg6[%c0_186, %c0_187] : memref<656x128xbf16, #tpu.memory_space<vmem>>, vector<48x64xbf16>
    %cst_188 = arith.constant dense<0.000000e+00> : vector<16x64xf32>
    %159 = tpu.matmul %157, %158, %cst_188 {dimension_numbers = #tpu.dot_dimension_numbers<[1], [0], [0], [1], [0, 0, 1, 1], [], []>} : vector<16x48xbf16>, vector<48x64xbf16>, vector<16x64xf32> -> vector<16x64xf32>
    %c80_189 = arith.constant 80 : index
    %c0_190 = arith.constant 0 : index
    %160 = vector.load %arg3[%c80_189, %c0_190] : memref<112x1xf32, #tpu.memory_space<vmem>>, vector<16x1xf32>
    %161 = vector.broadcast %160 : vector<16x1xf32> to vector<16x64xf32>
    %162 = arith.addf %159, %161 : vector<16x64xf32>
    %163 = vector.extract_strided_slice %162 {offsets = [0, 0], sizes = [8, 64], strides = [1, 1]} : vector<16x64xf32> to vector<8x64xf32>
    %164 = arith.truncf %163 : vector<8x64xf32> to vector<8x64xbf16>
    %c0_191 = arith.constant 0 : index
    %c0_192 = arith.constant 0 : index
    %165 = vector.load %arg6[%c0_191, %c0_192] : memref<656x128xbf16, #tpu.memory_space<vmem>>, vector<8x64xbf16>
    tpu.vector_store %arg6[%c0_191, %c0_192], %164 {strides = array<i32>} : memref<656x128xbf16, #tpu.memory_space<vmem>>, vector<8x64xbf16>,
    %166 = vector.extract_strided_slice %162 {offsets = [8, 0], sizes = [8, 64], strides = [1, 1]} : vector<16x64xf32> to vector<8x64xf32>
    %167 = arith.truncf %166 : vector<8x64xf32> to vector<8x64xbf16>
    %c0_193 = arith.constant 0 : index
    %c64_194 = arith.constant 64 : index
    %168 = vector.load %arg6[%c0_193, %c64_194] : memref<656x128xbf16, #tpu.memory_space<vmem>>, vector<8x64xbf16>
    tpu.vector_store %arg6[%c0_193, %c64_194], %167 {strides = array<i32>} : memref<656x128xbf16, #tpu.memory_space<vmem>>, vector<8x64xbf16>,
    %c0_195 = arith.constant 0 : index
    %c0_196 = arith.constant 0 : index
    %169 = vector.load %arg6[%c0_195, %c0_196] : memref<656x128xbf16, #tpu.memory_space<vmem>>, vector<8x128xbf16>
    %c176_197 = arith.constant 176 : index
    %c0_198 = arith.constant 0 : index
    %170 = vector.load %arg2[%c176_197, %c0_198] : memref<320x768xbf16, #tpu.memory_space<vmem>>, vector<128x128xbf16>
    %cst_199 = arith.constant dense<0.000000e+00> : vector<8x128xf32>
    %171 = tpu.matmul %169, %170, %cst_199 {dimension_numbers = #tpu.dot_dimension_numbers<[1], [0], [0], [1], [0, 0, 1, 1], [], []>} : vector<8x128xbf16>, vector<128x128xbf16>, vector<8x128xf32> -> vector<8x128xf32>
    %172 = arith.truncf %171 : vector<8x128xf32> to vector<8x128xbf16>
    %c0_200 = arith.constant 0 : index
    %c128_201 = arith.constant 128 : index
    %173 = vector.load %arg5[%c0_200, %c128_201] : memref<32x384xbf16, #tpu.memory_space<vmem>>, vector<8x128xbf16>
    tpu.vector_store %arg5[%c0_200, %c128_201], %172 {strides = array<i32>} : memref<32x384xbf16, #tpu.memory_space<vmem>>, vector<8x128xbf16>,
    %c0_202 = arith.constant 0 : index
    %c108_203 = arith.constant 108 : index
    %174 = vector.load %arg5[%c0_202, %c108_203] : memref<32x384xbf16, #tpu.memory_space<vmem>>, vector<16x128xbf16>
    %c0_204 = arith.constant 0 : index
    %c0_205 = arith.constant 0 : index
    %175 = vector.load %arg6[%c0_204, %c0_205] : memref<656x128xbf16, #tpu.memory_space<vmem>>, vector<16x128xbf16>
    tpu.vector_store %arg6[%c0_204, %c0_205], %174 {strides = array<i32>} : memref<656x128xbf16, #tpu.memory_space<vmem>>, vector<16x128xbf16>,
    %c0_206 = arith.constant 0 : index
    %c109_207 = arith.constant 109 : index
    %176 = vector.load %arg5[%c0_206, %c109_207] : memref<32x384xbf16, #tpu.memory_space<vmem>>, vector<16x128xbf16>
    %c16_208 = arith.constant 16 : index
    %c0_209 = arith.constant 0 : index
    %177 = vector.load %arg6[%c16_208, %c0_209] : memref<656x128xbf16, #tpu.memory_space<vmem>>, vector<16x128xbf16>
    tpu.vector_store %arg6[%c16_208, %c0_209], %176 {strides = array<i32>} : memref<656x128xbf16, #tpu.memory_space<vmem>>, vector<16x128xbf16>,
    %c0_210 = arith.constant 0 : index
    %c110_211 = arith.constant 110 : index
    %178 = vector.load %arg5[%c0_210, %c110_211] : memref<32x384xbf16, #tpu.memory_space<vmem>>, vector<16x128xbf16>
    %c32_212 = arith.constant 32 : index
    %c0_213 = arith.constant 0 : index
    %179 = vector.load %arg6[%c32_212, %c0_213] : memref<656x128xbf16, #tpu.memory_space<vmem>>, vector<16x128xbf16>
    tpu.vector_store %arg6[%c32_212, %c0_213], %178 {strides = array<i32>} : memref<656x128xbf16, #tpu.memory_space<vmem>>, vector<16x128xbf16>,
    %c0_214 = arith.constant 0 : index
    %c111_215 = arith.constant 111 : index
    %180 = vector.load %arg5[%c0_214, %c111_215] : memref<32x384xbf16, #tpu.memory_space<vmem>>, vector<16x128xbf16>
    %c48_216 = arith.constant 48 : index
    %c0_217 = arith.constant 0 : index
    %181 = vector.load %arg6[%c48_216, %c0_217] : memref<656x128xbf16, #tpu.memory_space<vmem>>, vector<16x128xbf16>
    tpu.vector_store %arg6[%c48_216, %c0_217], %180 {strides = array<i32>} : memref<656x128xbf16, #tpu.memory_space<vmem>>, vector<16x128xbf16>,
    %c0_218 = arith.constant 0 : index
    %c112_219 = arith.constant 112 : index
    %182 = vector.load %arg5[%c0_218, %c112_219] : memref<32x384xbf16, #tpu.memory_space<vmem>>, vector<16x128xbf16>
    %c64_220 = arith.constant 64 : index
    %c0_221 = arith.constant 0 : index
    %183 = vector.load %arg6[%c64_220, %c0_221] : memref<656x128xbf16, #tpu.memory_space<vmem>>, vector<16x128xbf16>
    tpu.vector_store %arg6[%c64_220, %c0_221], %182 {strides = array<i32>} : memref<656x128xbf16, #tpu.memory_space<vmem>>, vector<16x128xbf16>,
    %c0_222 = arith.constant 0 : index
    %c113_223 = arith.constant 113 : index
    %184 = vector.load %arg5[%c0_222, %c113_223] : memref<32x384xbf16, #tpu.memory_space<vmem>>, vector<16x128xbf16>
    %c80_224 = arith.constant 80 : index
    %c0_225 = arith.constant 0 : index
    %185 = vector.load %arg6[%c80_224, %c0_225] : memref<656x128xbf16, #tpu.memory_space<vmem>>, vector<16x128xbf16>
    tpu.vector_store %arg6[%c80_224, %c0_225], %184 {strides = array<i32>} : memref<656x128xbf16, #tpu.memory_space<vmem>>, vector<16x128xbf16>,
    %c0_226 = arith.constant 0 : index
    %c114_227 = arith.constant 114 : index
    %186 = vector.load %arg5[%c0_226, %c114_227] : memref<32x384xbf16, #tpu.memory_space<vmem>>, vector<16x128xbf16>
    %c96_228 = arith.constant 96 : index
    %c0_229 = arith.constant 0 : index
    %187 = vector.load %arg6[%c96_228, %c0_229] : memref<656x128xbf16, #tpu.memory_space<vmem>>, vector<16x128xbf16>
    tpu.vector_store %arg6[%c96_228, %c0_229], %186 {strides = array<i32>} : memref<656x128xbf16, #tpu.memory_space<vmem>>, vector<16x128xbf16>,
    %c0_230 = arith.constant 0 : index
    %c115_231 = arith.constant 115 : index
    %188 = vector.load %arg5[%c0_230, %c115_231] : memref<32x384xbf16, #tpu.memory_space<vmem>>, vector<16x128xbf16>
    %c112_232 = arith.constant 112 : index
    %c0_233 = arith.constant 0 : index
    %189 = vector.load %arg6[%c112_232, %c0_233] : memref<656x128xbf16, #tpu.memory_space<vmem>>, vector<16x128xbf16>
    tpu.vector_store %arg6[%c112_232, %c0_233], %188 {strides = array<i32>} : memref<656x128xbf16, #tpu.memory_space<vmem>>, vector<16x128xbf16>,
    %c0_234 = arith.constant 0 : index
    %c116_235 = arith.constant 116 : index
    %190 = vector.load %arg5[%c0_234, %c116_235] : memref<32x384xbf16, #tpu.memory_space<vmem>>, vector<16x128xbf16>
    %c128_236 = arith.constant 128 : index
    %c0_237 = arith.constant 0 : index
    %191 = vector.load %arg6[%c128_236, %c0_237] : memref<656x128xbf16, #tpu.memory_space<vmem>>, vector<16x128xbf16>
    tpu.vector_store %arg6[%c128_236, %c0_237], %190 {strides = array<i32>} : memref<656x128xbf16, #tpu.memory_space<vmem>>, vector<16x128xbf16>,
    %c0_238 = arith.constant 0 : index
    %c117_239 = arith.constant 117 : index
    %192 = vector.load %arg5[%c0_238, %c117_239] : memref<32x384xbf16, #tpu.memory_space<vmem>>, vector<16x128xbf16>
    %c144_240 = arith.constant 144 : index
    %c0_241 = arith.constant 0 : index
    %193 = vector.load %arg6[%c144_240, %c0_241] : memref<656x128xbf16, #tpu.memory_space<vmem>>, vector<16x128xbf16>
    tpu.vector_store %arg6[%c144_240, %c0_241], %192 {strides = array<i32>} : memref<656x128xbf16, #tpu.memory_space<vmem>>, vector<16x128xbf16>,
    %c0_242 = arith.constant 0 : index
    %c118_243 = arith.constant 118 : index
    %194 = vector.load %arg5[%c0_242, %c118_243] : memref<32x384xbf16, #tpu.memory_space<vmem>>, vector<16x128xbf16>
    %c160_244 = arith.constant 160 : index
    %c0_245 = arith.constant 0 : index
    %195 = vector.load %arg6[%c160_244, %c0_245] : memref<656x128xbf16, #tpu.memory_space<vmem>>, vector<16x128xbf16>
    tpu.vector_store %arg6[%c160_244, %c0_245], %194 {strides = array<i32>} : memref<656x128xbf16, #tpu.memory_space<vmem>>, vector<16x128xbf16>,
    %c0_246 = arith.constant 0 : index
    %c119_247 = arith.constant 119 : index
    %196 = vector.load %arg5[%c0_246, %c119_247] : memref<32x384xbf16, #tpu.memory_space<vmem>>, vector<16x128xbf16>
    %c176_248 = arith.constant 176 : index
    %c0_249 = arith.constant 0 : index
    %197 = vector.load %arg6[%c176_248, %c0_249] : memref<656x128xbf16, #tpu.memory_space<vmem>>, vector<16x128xbf16>
    tpu.vector_store %arg6[%c176_248, %c0_249], %196 {strides = array<i32>} : memref<656x128xbf16, #tpu.memory_space<vmem>>, vector<16x128xbf16>,
    %c0_250 = arith.constant 0 : index
    %c120_251 = arith.constant 120 : index
    %198 = vector.load %arg5[%c0_250, %c120_251] : memref<32x384xbf16, #tpu.memory_space<vmem>>, vector<16x128xbf16>
    %c192_252 = arith.constant 192 : index
    %c0_253 = arith.constant 0 : index
    %199 = vector.load %arg6[%c192_252, %c0_253] : memref<656x128xbf16, #tpu.memory_space<vmem>>, vector<16x128xbf16>
    tpu.vector_store %arg6[%c192_252, %c0_253], %198 {strides = array<i32>} : memref<656x128xbf16, #tpu.memory_space<vmem>>, vector<16x128xbf16>,
    %c0_254 = arith.constant 0 : index
    %c121_255 = arith.constant 121 : index
    %200 = vector.load %arg5[%c0_254, %c121_255] : memref<32x384xbf16, #tpu.memory_space<vmem>>, vector<16x128xbf16>
    %c208_256 = arith.constant 208 : index
    %c0_257 = arith.constant 0 : index
    %201 = vector.load %arg6[%c208_256, %c0_257] : memref<656x128xbf16, #tpu.memory_space<vmem>>, vector<16x128xbf16>
    tpu.vector_store %arg6[%c208_256, %c0_257], %200 {strides = array<i32>} : memref<656x128xbf16, #tpu.memory_space<vmem>>, vector<16x128xbf16>,
    %c0_258 = arith.constant 0 : index
    %c122_259 = arith.constant 122 : index
    %202 = vector.load %arg5[%c0_258, %c122_259] : memref<32x384xbf16, #tpu.memory_space<vmem>>, vector<16x128xbf16>
    %c224_260 = arith.constant 224 : index
    %c0_261 = arith.constant 0 : index
    %203 = vector.load %arg6[%c224_260, %c0_261] : memref<656x128xbf16, #tpu.memory_space<vmem>>, vector<16x128xbf16>
    tpu.vector_store %arg6[%c224_260, %c0_261], %202 {strides = array<i32>} : memref<656x128xbf16, #tpu.memory_space<vmem>>, vector<16x128xbf16>,
    %c0_262 = arith.constant 0 : index
    %c123_263 = arith.constant 123 : index
    %204 = vector.load %arg5[%c0_262, %c123_263] : memref<32x384xbf16, #tpu.memory_space<vmem>>, vector<16x128xbf16>
    %c240_264 = arith.constant 240 : index
    %c0_265 = arith.constant 0 : index
    %205 = vector.load %arg6[%c240_264, %c0_265] : memref<656x128xbf16, #tpu.memory_space<vmem>>, vector<16x128xbf16>
    tpu.vector_store %arg6[%c240_264, %c0_265], %204 {strides = array<i32>} : memref<656x128xbf16, #tpu.memory_space<vmem>>, vector<16x128xbf16>,
    %c0_266 = arith.constant 0 : index
    %c124_267 = arith.constant 124 : index
    %206 = vector.load %arg5[%c0_266, %c124_267] : memref<32x384xbf16, #tpu.memory_space<vmem>>, vector<16x128xbf16>
    %c256_268 = arith.constant 256 : index
    %c0_269 = arith.constant 0 : index
    %207 = vector.load %arg6[%c256_268, %c0_269] : memref<656x128xbf16, #tpu.memory_space<vmem>>, vector<16x128xbf16>
    tpu.vector_store %arg6[%c256_268, %c0_269], %206 {strides = array<i32>} : memref<656x128xbf16, #tpu.memory_space<vmem>>, vector<16x128xbf16>,
    %c0_270 = arith.constant 0 : index
    %c125_271 = arith.constant 125 : index
    %208 = vector.load %arg5[%c0_270, %c125_271] : memref<32x384xbf16, #tpu.memory_space<vmem>>, vector<16x128xbf16>
    %c272_272 = arith.constant 272 : index
    %c0_273 = arith.constant 0 : index
    %209 = vector.load %arg6[%c272_272, %c0_273] : memref<656x128xbf16, #tpu.memory_space<vmem>>, vector<16x128xbf16>
    tpu.vector_store %arg6[%c272_272, %c0_273], %208 {strides = array<i32>} : memref<656x128xbf16, #tpu.memory_space<vmem>>, vector<16x128xbf16>,
    %c0_274 = arith.constant 0 : index
    %c126_275 = arith.constant 126 : index
    %210 = vector.load %arg5[%c0_274, %c126_275] : memref<32x384xbf16, #tpu.memory_space<vmem>>, vector<16x128xbf16>
    %c288_276 = arith.constant 288 : index
    %c0_277 = arith.constant 0 : index
    %211 = vector.load %arg6[%c288_276, %c0_277] : memref<656x128xbf16, #tpu.memory_space<vmem>>, vector<16x128xbf16>
    tpu.vector_store %arg6[%c288_276, %c0_277], %210 {strides = array<i32>} : memref<656x128xbf16, #tpu.memory_space<vmem>>, vector<16x128xbf16>,
    %c0_278 = arith.constant 0 : index
    %c127_279 = arith.constant 127 : index
    %212 = vector.load %arg5[%c0_278, %c127_279] : memref<32x384xbf16, #tpu.memory_space<vmem>>, vector<16x128xbf16>
    %c304_280 = arith.constant 304 : index
    %c0_281 = arith.constant 0 : index
    %213 = vector.load %arg6[%c304_280, %c0_281] : memref<656x128xbf16, #tpu.memory_space<vmem>>, vector<16x128xbf16>
    tpu.vector_store %arg6[%c304_280, %c0_281], %212 {strides = array<i32>} : memref<656x128xbf16, #tpu.memory_space<vmem>>, vector<16x128xbf16>,
    %c0_282 = arith.constant 0 : index
    %c128_283 = arith.constant 128 : index
    %214 = vector.load %arg5[%c0_282, %c128_283] : memref<32x384xbf16, #tpu.memory_space<vmem>>, vector<16x128xbf16>
    %c320_284 = arith.constant 320 : index
    %c0_285 = arith.constant 0 : index
    %215 = vector.load %arg6[%c320_284, %c0_285] : memref<656x128xbf16, #tpu.memory_space<vmem>>, vector<16x128xbf16>
    tpu.vector_store %arg6[%c320_284, %c0_285], %214 {strides = array<i32>} : memref<656x128xbf16, #tpu.memory_space<vmem>>, vector<16x128xbf16>,
    %c0_286 = arith.constant 0 : index
    %c129_287 = arith.constant 129 : index
    %216 = vector.load %arg5[%c0_286, %c129_287] : memref<32x384xbf16, #tpu.memory_space<vmem>>, vector<16x128xbf16>
    %c336_288 = arith.constant 336 : index
    %c0_289 = arith.constant 0 : index
    %217 = vector.load %arg6[%c336_288, %c0_289] : memref<656x128xbf16, #tpu.memory_space<vmem>>, vector<16x128xbf16>
    tpu.vector_store %arg6[%c336_288, %c0_289], %216 {strides = array<i32>} : memref<656x128xbf16, #tpu.memory_space<vmem>>, vector<16x128xbf16>,
    %c0_290 = arith.constant 0 : index
    %c130_291 = arith.constant 130 : index
    %218 = vector.load %arg5[%c0_290, %c130_291] : memref<32x384xbf16, #tpu.memory_space<vmem>>, vector<16x128xbf16>
    %c352_292 = arith.constant 352 : index
    %c0_293 = arith.constant 0 : index
    %219 = vector.load %arg6[%c352_292, %c0_293] : memref<656x128xbf16, #tpu.memory_space<vmem>>, vector<16x128xbf16>
    tpu.vector_store %arg6[%c352_292, %c0_293], %218 {strides = array<i32>} : memref<656x128xbf16, #tpu.memory_space<vmem>>, vector<16x128xbf16>,
    %c0_294 = arith.constant 0 : index
    %c131_295 = arith.constant 131 : index
    %220 = vector.load %arg5[%c0_294, %c131_295] : memref<32x384xbf16, #tpu.memory_space<vmem>>, vector<16x128xbf16>
    %c368_296 = arith.constant 368 : index
    %c0_297 = arith.constant 0 : index
    %221 = vector.load %arg6[%c368_296, %c0_297] : memref<656x128xbf16, #tpu.memory_space<vmem>>, vector<16x128xbf16>
    tpu.vector_store %arg6[%c368_296, %c0_297], %220 {strides = array<i32>} : memref<656x128xbf16, #tpu.memory_space<vmem>>, vector<16x128xbf16>,
    %c0_298 = arith.constant 0 : index
    %c132_299 = arith.constant 132 : index
    %222 = vector.load %arg5[%c0_298, %c132_299] : memref<32x384xbf16, #tpu.memory_space<vmem>>, vector<16x128xbf16>
    %c384_300 = arith.constant 384 : index
    %c0_301 = arith.constant 0 : index
    %223 = vector.load %arg6[%c384_300, %c0_301] : memref<656x128xbf16, #tpu.memory_space<vmem>>, vector<16x128xbf16>
    tpu.vector_store %arg6[%c384_300, %c0_301], %222 {strides = array<i32>} : memref<656x128xbf16, #tpu.memory_space<vmem>>, vector<16x128xbf16>,
    %c0_302 = arith.constant 0 : index
    %c133_303 = arith.constant 133 : index
    %224 = vector.load %arg5[%c0_302, %c133_303] : memref<32x384xbf16, #tpu.memory_space<vmem>>, vector<16x128xbf16>
    %c400_304 = arith.constant 400 : index
    %c0_305 = arith.constant 0 : index
    %225 = vector.load %arg6[%c400_304, %c0_305] : memref<656x128xbf16, #tpu.memory_space<vmem>>, vector<16x128xbf16>
    tpu.vector_store %arg6[%c400_304, %c0_305], %224 {strides = array<i32>} : memref<656x128xbf16, #tpu.memory_space<vmem>>, vector<16x128xbf16>,
    %c0_306 = arith.constant 0 : index
    %c134_307 = arith.constant 134 : index
    %226 = vector.load %arg5[%c0_306, %c134_307] : memref<32x384xbf16, #tpu.memory_space<vmem>>, vector<16x128xbf16>
    %c416_308 = arith.constant 416 : index
    %c0_309 = arith.constant 0 : index
    %227 = vector.load %arg6[%c416_308, %c0_309] : memref<656x128xbf16, #tpu.memory_space<vmem>>, vector<16x128xbf16>
    tpu.vector_store %arg6[%c416_308, %c0_309], %226 {strides = array<i32>} : memref<656x128xbf16, #tpu.memory_space<vmem>>, vector<16x128xbf16>,
    %c0_310 = arith.constant 0 : index
    %c135_311 = arith.constant 135 : index
    %228 = vector.load %arg5[%c0_310, %c135_311] : memref<32x384xbf16, #tpu.memory_space<vmem>>, vector<16x128xbf16>
    %c432_312 = arith.constant 432 : index
    %c0_313 = arith.constant 0 : index
    %229 = vector.load %arg6[%c432_312, %c0_313] : memref<656x128xbf16, #tpu.memory_space<vmem>>, vector<16x128xbf16>
    tpu.vector_store %arg6[%c432_312, %c0_313], %228 {strides = array<i32>} : memref<656x128xbf16, #tpu.memory_space<vmem>>, vector<16x128xbf16>,
    %c0_314 = arith.constant 0 : index
    %c136_315 = arith.constant 136 : index
    %230 = vector.load %arg5[%c0_314, %c136_315] : memref<32x384xbf16, #tpu.memory_space<vmem>>, vector<16x128xbf16>
    %c448_316 = arith.constant 448 : index
    %c0_317 = arith.constant 0 : index
    %231 = vector.load %arg6[%c448_316, %c0_317] : memref<656x128xbf16, #tpu.memory_space<vmem>>, vector<16x128xbf16>
    tpu.vector_store %arg6[%c448_316, %c0_317], %230 {strides = array<i32>} : memref<656x128xbf16, #tpu.memory_space<vmem>>, vector<16x128xbf16>,
    %c0_318 = arith.constant 0 : index
    %c137_319 = arith.constant 137 : index
    %232 = vector.load %arg5[%c0_318, %c137_319] : memref<32x384xbf16, #tpu.memory_space<vmem>>, vector<16x128xbf16>
    %c464_320 = arith.constant 464 : index
    %c0_321 = arith.constant 0 : index
    %233 = vector.load %arg6[%c464_320, %c0_321] : memref<656x128xbf16, #tpu.memory_space<vmem>>, vector<16x128xbf16>
    tpu.vector_store %arg6[%c464_320, %c0_321], %232 {strides = array<i32>} : memref<656x128xbf16, #tpu.memory_space<vmem>>, vector<16x128xbf16>,
    %c0_322 = arith.constant 0 : index
    %c138_323 = arith.constant 138 : index
    %234 = vector.load %arg5[%c0_322, %c138_323] : memref<32x384xbf16, #tpu.memory_space<vmem>>, vector<16x128xbf16>
    %c480_324 = arith.constant 480 : index
    %c0_325 = arith.constant 0 : index
    %235 = vector.load %arg6[%c480_324, %c0_325] : memref<656x128xbf16, #tpu.memory_space<vmem>>, vector<16x128xbf16>
    tpu.vector_store %arg6[%c480_324, %c0_325], %234 {strides = array<i32>} : memref<656x128xbf16, #tpu.memory_space<vmem>>, vector<16x128xbf16>,
    %c0_326 = arith.constant 0 : index
    %c139_327 = arith.constant 139 : index
    %236 = vector.load %arg5[%c0_326, %c139_327] : memref<32x384xbf16, #tpu.memory_space<vmem>>, vector<16x128xbf16>
    %c496_328 = arith.constant 496 : index
    %c0_329 = arith.constant 0 : index
    %237 = vector.load %arg6[%c496_328, %c0_329] : memref<656x128xbf16, #tpu.memory_space<vmem>>, vector<16x128xbf16>
    tpu.vector_store %arg6[%c496_328, %c0_329], %236 {strides = array<i32>} : memref<656x128xbf16, #tpu.memory_space<vmem>>, vector<16x128xbf16>,
    %c0_330 = arith.constant 0 : index
    %c140_331 = arith.constant 140 : index
    %238 = vector.load %arg5[%c0_330, %c140_331] : memref<32x384xbf16, #tpu.memory_space<vmem>>, vector<16x128xbf16>
    %c512_332 = arith.constant 512 : index
    %c0_333 = arith.constant 0 : index
    %239 = vector.load %arg6[%c512_332, %c0_333] : memref<656x128xbf16, #tpu.memory_space<vmem>>, vector<16x128xbf16>
    tpu.vector_store %arg6[%c512_332, %c0_333], %238 {strides = array<i32>} : memref<656x128xbf16, #tpu.memory_space<vmem>>, vector<16x128xbf16>,
    %c0_334 = arith.constant 0 : index
    %c141_335 = arith.constant 141 : index
    %240 = vector.load %arg5[%c0_334, %c141_335] : memref<32x384xbf16, #tpu.memory_space<vmem>>, vector<16x128xbf16>
    %c528_336 = arith.constant 528 : index
    %c0_337 = arith.constant 0 : index
    %241 = vector.load %arg6[%c528_336, %c0_337] : memref<656x128xbf16, #tpu.memory_space<vmem>>, vector<16x128xbf16>
    tpu.vector_store %arg6[%c528_336, %c0_337], %240 {strides = array<i32>} : memref<656x128xbf16, #tpu.memory_space<vmem>>, vector<16x128xbf16>,
    %c0_338 = arith.constant 0 : index
    %c142_339 = arith.constant 142 : index
    %242 = vector.load %arg5[%c0_338, %c142_339] : memref<32x384xbf16, #tpu.memory_space<vmem>>, vector<16x128xbf16>
    %c544_340 = arith.constant 544 : index
    %c0_341 = arith.constant 0 : index
    %243 = vector.load %arg6[%c544_340, %c0_341] : memref<656x128xbf16, #tpu.memory_space<vmem>>, vector<16x128xbf16>
    tpu.vector_store %arg6[%c544_340, %c0_341], %242 {strides = array<i32>} : memref<656x128xbf16, #tpu.memory_space<vmem>>, vector<16x128xbf16>,
    %c0_342 = arith.constant 0 : index
    %c143_343 = arith.constant 143 : index
    %244 = vector.load %arg5[%c0_342, %c143_343] : memref<32x384xbf16, #tpu.memory_space<vmem>>, vector<16x128xbf16>
    %c560_344 = arith.constant 560 : index
    %c0_345 = arith.constant 0 : index
    %245 = vector.load %arg6[%c560_344, %c0_345] : memref<656x128xbf16, #tpu.memory_space<vmem>>, vector<16x128xbf16>
    tpu.vector_store %arg6[%c560_344, %c0_345], %244 {strides = array<i32>} : memref<656x128xbf16, #tpu.memory_space<vmem>>, vector<16x128xbf16>,
    %c0_346 = arith.constant 0 : index
    %c144_347 = arith.constant 144 : index
    %246 = vector.load %arg5[%c0_346, %c144_347] : memref<32x384xbf16, #tpu.memory_space<vmem>>, vector<16x128xbf16>
    %c576_348 = arith.constant 576 : index
    %c0_349 = arith.constant 0 : index
    %247 = vector.load %arg6[%c576_348, %c0_349] : memref<656x128xbf16, #tpu.memory_space<vmem>>, vector<16x128xbf16>
    tpu.vector_store %arg6[%c576_348, %c0_349], %246 {strides = array<i32>} : memref<656x128xbf16, #tpu.memory_space<vmem>>, vector<16x128xbf16>,
    %c0_350 = arith.constant 0 : index
    %c145_351 = arith.constant 145 : index
    %248 = vector.load %arg5[%c0_350, %c145_351] : memref<32x384xbf16, #tpu.memory_space<vmem>>, vector<16x128xbf16>
    %c592_352 = arith.constant 592 : index
    %c0_353 = arith.constant 0 : index
    %249 = vector.load %arg6[%c592_352, %c0_353] : memref<656x128xbf16, #tpu.memory_space<vmem>>, vector<16x128xbf16>
    tpu.vector_store %arg6[%c592_352, %c0_353], %248 {strides = array<i32>} : memref<656x128xbf16, #tpu.memory_space<vmem>>, vector<16x128xbf16>,
    %c0_354 = arith.constant 0 : index
    %c146_355 = arith.constant 146 : index
    %250 = vector.load %arg5[%c0_354, %c146_355] : memref<32x384xbf16, #tpu.memory_space<vmem>>, vector<16x128xbf16>
    %c608_356 = arith.constant 608 : index
    %c0_357 = arith.constant 0 : index
    %251 = vector.load %arg6[%c608_356, %c0_357] : memref<656x128xbf16, #tpu.memory_space<vmem>>, vector<16x128xbf16>
    tpu.vector_store %arg6[%c608_356, %c0_357], %250 {strides = array<i32>} : memref<656x128xbf16, #tpu.memory_space<vmem>>, vector<16x128xbf16>,
    %c0_358 = arith.constant 0 : index
    %c147_359 = arith.constant 147 : index
    %252 = vector.load %arg5[%c0_358, %c147_359] : memref<32x384xbf16, #tpu.memory_space<vmem>>, vector<16x128xbf16>
    %c624_360 = arith.constant 624 : index
    %c0_361 = arith.constant 0 : index
    %253 = vector.load %arg6[%c624_360, %c0_361] : memref<656x128xbf16, #tpu.memory_space<vmem>>, vector<16x128xbf16>
    tpu.vector_store %arg6[%c624_360, %c0_361], %252 {strides = array<i32>} : memref<656x128xbf16, #tpu.memory_space<vmem>>, vector<16x128xbf16>,
    %c0_362 = arith.constant 0 : index
    %c148_363 = arith.constant 148 : index
    %254 = vector.load %arg5[%c0_362, %c148_363] : memref<32x384xbf16, #tpu.memory_space<vmem>>, vector<16x128xbf16>
    %c640_364 = arith.constant 640 : index
    %c0_365 = arith.constant 0 : index
    %255 = vector.load %arg6[%c640_364, %c0_365] : memref<656x128xbf16, #tpu.memory_space<vmem>>, vector<16x128xbf16>
    tpu.vector_store %arg6[%c640_364, %c0_365], %254 {strides = array<i32>} : memref<656x128xbf16, #tpu.memory_space<vmem>>, vector<16x128xbf16>,
    %c160_366 = arith.constant 160 : index
    %c0_367 = arith.constant 0 : index
    %256 = vector.load %arg2[%c160_366, %c0_367] : memref<320x768xbf16, #tpu.memory_space<vmem>>, vector<8x656xbf16>
    %c0_368 = arith.constant 0 : index
    %c0_369 = arith.constant 0 : index
    %257 = vector.load %arg6[%c0_368, %c0_369] : memref<656x128xbf16, #tpu.memory_space<vmem>>, vector<656x128xbf16>
    %cst_370 = arith.constant dense<0.000000e+00> : vector<8x128xf32>
    %258 = tpu.matmul %256, %257, %cst_370 {dimension_numbers = #tpu.dot_dimension_numbers<[1], [0], [0], [1], [0, 0, 1, 1], [], []>} : vector<8x656xbf16>, vector<656x128xbf16>, vector<8x128xf32> -> vector<8x128xf32>
    %c96_371 = arith.constant 96 : index
    %c0_372 = arith.constant 0 : index
    %259 = vector.load %arg3[%c96_371, %c0_372] : memref<112x1xf32, #tpu.memory_space<vmem>>, vector<8x1xf32>
    %260 = vector.broadcast %259 : vector<8x1xf32> to vector<8x128xf32>
    %261 = arith.addf %258, %260 : vector<8x128xf32>
    %cst_373 = arith.constant 0.000000e+00 : f32
    %262 = vector.broadcast %cst_373 : f32 to vector<8x128xf32>
    %263 = arith.cmpf ogt, %261, %262 : vector<8x128xf32>
    %cst_374 = arith.constant 0.00999999977 : f32
    %264 = vector.broadcast %cst_374 : f32 to vector<8x128xf32>
    %265 = arith.mulf %264, %261 : vector<8x128xf32>
    %266 = arith.select %263, %261, %265 : vector<8x128xi1>, vector<8x128xf32>
    %267 = arith.truncf %266 : vector<8x128xf32> to vector<8x128xbf16>
    %c0_375 = arith.constant 0 : index
    %c128_376 = arith.constant 128 : index
    %268 = vector.load %arg5[%c0_375, %c128_376] : memref<32x384xbf16, #tpu.memory_space<vmem>>, vector<8x128xbf16>
    tpu.vector_store %arg5[%c0_375, %c128_376], %267 {strides = array<i32>} : memref<32x384xbf16, #tpu.memory_space<vmem>>, vector<8x128xbf16>,
    %c0_377 = arith.constant 0 : index
    %c125_378 = arith.constant 125 : index
    %269 = vector.load %arg5[%c0_377, %c125_378] : memref<32x384xbf16, #tpu.memory_space<vmem>>, vector<16x128xbf16>
    %c0_379 = arith.constant 0 : index
    %c0_380 = arith.constant 0 : index
    %270 = vector.load %arg6[%c0_379, %c0_380] : memref<656x128xbf16, #tpu.memory_space<vmem>>, vector<16x128xbf16>
    tpu.vector_store %arg6[%c0_379, %c0_380], %269 {strides = array<i32>} : memref<656x128xbf16, #tpu.memory_space<vmem>>, vector<16x128xbf16>,
    %c0_381 = arith.constant 0 : index
    %c126_382 = arith.constant 126 : index
    %271 = vector.load %arg5[%c0_381, %c126_382] : memref<32x384xbf16, #tpu.memory_space<vmem>>, vector<16x128xbf16>
    %c16_383 = arith.constant 16 : index
    %c0_384 = arith.constant 0 : index
    %272 = vector.load %arg6[%c16_383, %c0_384] : memref<656x128xbf16, #tpu.memory_space<vmem>>, vector<16x128xbf16>
    tpu.vector_store %arg6[%c16_383, %c0_384], %271 {strides = array<i32>} : memref<656x128xbf16, #tpu.memory_space<vmem>>, vector<16x128xbf16>,
    %c0_385 = arith.constant 0 : index
    %c127_386 = arith.constant 127 : index
    %273 = vector.load %arg5[%c0_385, %c127_386] : memref<32x384xbf16, #tpu.memory_space<vmem>>, vector<16x128xbf16>
    %c32_387 = arith.constant 32 : index
    %c0_388 = arith.constant 0 : index
    %274 = vector.load %arg6[%c32_387, %c0_388] : memref<656x128xbf16, #tpu.memory_space<vmem>>, vector<16x128xbf16>
    tpu.vector_store %arg6[%c32_387, %c0_388], %273 {strides = array<i32>} : memref<656x128xbf16, #tpu.memory_space<vmem>>, vector<16x128xbf16>,
    %c0_389 = arith.constant 0 : index
    %c128_390 = arith.constant 128 : index
    %275 = vector.load %arg5[%c0_389, %c128_390] : memref<32x384xbf16, #tpu.memory_space<vmem>>, vector<16x128xbf16>
    %c48_391 = arith.constant 48 : index
    %c0_392 = arith.constant 0 : index
    %276 = vector.load %arg6[%c48_391, %c0_392] : memref<656x128xbf16, #tpu.memory_space<vmem>>, vector<16x128xbf16>
    tpu.vector_store %arg6[%c48_391, %c0_392], %275 {strides = array<i32>} : memref<656x128xbf16, #tpu.memory_space<vmem>>, vector<16x128xbf16>,
    %c0_393 = arith.constant 0 : index
    %c129_394 = arith.constant 129 : index
    %277 = vector.load %arg5[%c0_393, %c129_394] : memref<32x384xbf16, #tpu.memory_space<vmem>>, vector<16x128xbf16>
    %c64_395 = arith.constant 64 : index
    %c0_396 = arith.constant 0 : index
    %278 = vector.load %arg6[%c64_395, %c0_396] : memref<656x128xbf16, #tpu.memory_space<vmem>>, vector<16x128xbf16>
    tpu.vector_store %arg6[%c64_395, %c0_396], %277 {strides = array<i32>} : memref<656x128xbf16, #tpu.memory_space<vmem>>, vector<16x128xbf16>,
    %c0_397 = arith.constant 0 : index
    %c130_398 = arith.constant 130 : index
    %279 = vector.load %arg5[%c0_397, %c130_398] : memref<32x384xbf16, #tpu.memory_space<vmem>>, vector<16x128xbf16>
    %c80_399 = arith.constant 80 : index
    %c0_400 = arith.constant 0 : index
    %280 = vector.load %arg6[%c80_399, %c0_400] : memref<656x128xbf16, #tpu.memory_space<vmem>>, vector<16x128xbf16>
    tpu.vector_store %arg6[%c80_399, %c0_400], %279 {strides = array<i32>} : memref<656x128xbf16, #tpu.memory_space<vmem>>, vector<16x128xbf16>,
    %c0_401 = arith.constant 0 : index
    %c131_402 = arith.constant 131 : index
    %281 = vector.load %arg5[%c0_401, %c131_402] : memref<32x384xbf16, #tpu.memory_space<vmem>>, vector<16x128xbf16>
    %c96_403 = arith.constant 96 : index
    %c0_404 = arith.constant 0 : index
    %282 = vector.load %arg6[%c96_403, %c0_404] : memref<656x128xbf16, #tpu.memory_space<vmem>>, vector<16x128xbf16>
    tpu.vector_store %arg6[%c96_403, %c0_404], %281 {strides = array<i32>} : memref<656x128xbf16, #tpu.memory_space<vmem>>, vector<16x128xbf16>,
    %c304_405 = arith.constant 304 : index
    %c0_406 = arith.constant 0 : index
    %283 = vector.load %arg2[%c304_405, %c0_406] : memref<320x768xbf16, #tpu.memory_space<vmem>>, vector<1x112xbf16>
    %c0_407 = arith.constant 0 : index
    %c0_408 = arith.constant 0 : index
    %284 = vector.load %arg6[%c0_407, %c0_408] : memref<656x128xbf16, #tpu.memory_space<vmem>>, vector<112x128xbf16>
    %cst_409 = arith.constant dense<0.000000e+00> : vector<1x128xf32>
    %285 = tpu.matmul %283, %284, %cst_409 {dimension_numbers = #tpu.dot_dimension_numbers<[1], [0], [0], [1], [0, 0, 1, 1], [], []>} : vector<1x112xbf16>, vector<112x128xbf16>, vector<1x128xf32> -> vector<1x128xf32>
    %c104 = arith.constant 104 : index
    %c0_410 = arith.constant 0 : index
    %286 = vector.load %arg3[%c104, %c0_410] : memref<112x1xf32, #tpu.memory_space<vmem>>, vector<1x1xf32>
    %287 = vector.broadcast %286 : vector<1x1xf32> to vector<1x128xf32>
    %288 = arith.addf %285, %287 : vector<1x128xf32>
    %289 = math.tanh %288 : vector<1x128xf32>
    %c0_411 = arith.constant 0 : index
    %c0_412 = arith.constant 0 : index
    %c0_413 = arith.constant 0 : index
    %290 = vector.load %arg4[%c0_411, %c0_412, %c0_413] : memref<1x1x128xf32, #tpu.memory_space<vmem>>, vector<1x1x128xf32>
    %291 = vector.shape_cast %290 : vector<1x1x128xf32> to vector<1x128xf32>
    %292 = vector.shape_cast %289 : vector<1x128xf32> to vector<1x1x128xf32>
    tpu.vector_store %arg4[%c0_411, %c0_412, %c0_413], %292 {strides = array<i32>} : memref<1x1x128xf32, #tpu.memory_space<vmem>>, vector<1x1x128xf32>,
    return
  }
  func.func @transform_0(%arg0: i32) -> (i32, i32, i32) {
    %c0_i32 = arith.constant 0 : i32
    %c0_i32_0 = arith.constant 0 : i32
    %c0_i32_1 = arith.constant 0 : i32
    return %arg0, %c0_i32, %c0_i32_0 : i32, i32, i32
  }
  func.func @transform_1(%arg0: i32) -> (i32, i32) {
    %c0_i32 = arith.constant 0 : i32
    %c0_i32_0 = arith.constant 0 : i32
    %c0_i32_1 = arith.constant 0 : i32
    return %c0_i32, %c0_i32_0 : i32, i32
  }
  func.func @transform_2(%arg0: i32) -> (i32, i32) {
    %c0_i32 = arith.constant 0 : i32
    %c0_i32_0 = arith.constant 0 : i32
    %c0_i32_1 = arith.constant 0 : i32
    return %c0_i32, %c0_i32_0 : i32, i32
  }
  func.func @transform_3(%arg0: i32) -> (i32, i32, i32) {
    %c0_i32 = arith.constant 0 : i32
    %c0_i32_0 = arith.constant 0 : i32
    %c0_i32_1 = arith.constant 0 : i32
    return %arg0, %c0_i32, %c0_i32_0 : i32, i32, i32
  }
}

</mosaic_0001>

<bundles_post_ra>
// kernel: tile.13
= control target key start
LH: loop header
LB: loop body
LE: loop exit
PB: predicated region body
PF: predicated region fallthrough
CT: control target
= control target key end

     0   :  { %s22_s0 = inlined_call_operand.vmem [shape: f32[16], index: 0, kind: input, shape index: {}]   ;;  %s23_s1 = inlined_call_operand.vmem [shape: f32[2,16], index: 1, kind: output, shape index: {}]  }
   0x1   :  { %v4_v0 = vld [vmem:[%s22_s0] ss:$0 sm:$0xff] }
   0x2   :  { %5 = vst [vmem:[%s23_s1] sm:$0x3] %v4_v0 }

// kernel: tile.18
= control target key start
LH: loop header
LB: loop body
LE: loop exit
PB: predicated region body
PF: predicated region fallthrough
CT: control target
= control target key end

     0   :  { %s22_s0 = inlined_call_operand.vmem [shape: f32[8], index: 0, kind: input, shape index: {}]   ;;  %s23_s1 = inlined_call_operand.vmem [shape: f32[2,8], index: 1, kind: output, shape index: {}]  }
   0x1   :  { %v4_v0 = vld [vmem:[%s22_s0] ss:$0 sm:$0xff] }
   0x2   :  { %5 = vst [vmem:[%s23_s1] sm:$0x3] %v4_v0 }

// kernel: generator_pallas.1
= control target key start
LH: loop header
LB: loop body
LE: loop exit
PB: predicated region body
PF: predicated region fallthrough
CT: control target
= control target key end

     0   :  { %s3702_s0 = inlined_call_operand.vmem [shape: f32[2,8,32], index: 0, kind: input, shape index: {}]   ;;  %s3703_s1 = inlined_call_operand.vmem [shape: bf16[320,768], index: 1, kind: input, shape index: {}]   ;;  %s3704_s2 = inlined_call_operand.vmem [shape: f32[112,1], index: 2, kind: input, shape index: {}]   ;;  %s3705_s3 = inlined_call_operand.hbm [shape: f32[2,1,128], index: 3, kind: output, shape index: {}]  }
   0x1   :  { %3804 = sst [smem:[#allocation16_spill]] %s3702_s0 }
   0x2   :  { %3805 = sst [smem:[#allocation17_spill]] %s3704_s2 }
   0x3   :  { %3806 = sst [smem:[#allocation18_spill]] %s3705_s3 }
   0x4   :  { %8 = vsyncpa [#allocation5], 0 }
   0x5   :  { %10 = vsyncpa [#allocation5 + $0x1], 0  ;;  %s2740_s12 = smov 0   ;;  %s2742_s13 = smov 0  }
   0x6   :  { %s2744_s14 = smov 0   ;;  %s2746_s15 = smov 0  }
   0x7 LB: > { %3807 = sst [smem:[#allocation7_spill]] %s2660_s12  ;;  %s2761_s16 = sadd.s32 4294967295, %s2672_s15   ;;  %s2672_s15 = sphi %s2746_s15, %s3882_s15   ;;  %s2668_s14 = sphi %s2744_s14, %s3885_s14   ;;  %s2664_s13 = sphi %s2742_s13, %s3884_s13   ;;  %s2660_s12 = sphi %s2740_s12, %s3883_s12  }
   0x8   : > { %3808 = sst [smem:[#allocation8_spill]] %s2664_s13  ;;  %s2217_s17 = sadd.s32 4294967294, %s2672_s15  }
   0x9   : > { %3809 = sst [smem:[#allocation9_spill]] %s2668_s14  ;;  %s2765_s18 = sadd.s32 1, %s2672_s15  }
   0xa   : > { %3810 = sst [smem:[#allocation10_spill]] %s2672_s15  ;;  %s91_s19 = sadd.s32 1, %s2668_s14 }
   0xb   : > { %3811 = sst [smem:[#allocation11_spill]] %s2761_s16  ;;  %s88_s20 = ssub.s32 %s2672_s15, %s2765_s18 }
   0xc   : > { %3812 = sst [smem:[#allocation12_spill]] %s2765_s18  ;;  %p101_p0 = scmp.ne.s32.totalorder %s2668_s14, %s2664_s13 }
   0xd   : > { %p89_p1 = scmp.eq.s32.totalorder %s88_s20, 0  ;;  %p102_p2 = scmp.eq.s32.totalorder %s2761_s16, 1 }
   0xe   : > { %p107_p3 = scmp.ne.s32.totalorder %s2664_s13, %s2660_s12  ;;  %p108_p4 = scmp.eq.s32.totalorder %s2217_s17, 1 }
   0xf   : > { %s2776_s21 = scalar_select %p89_p1, %s2668_s14, %s91_s19  }
  0x10   : > { %p2778_p5 = por %p102_p2, %p101_p0  ;;  %p2782_p6 = por %p108_p4, %p107_p3 }
  0x11   : > { %3813 = sst [smem:[#allocation13_spill]] %s2776_s21  ;;  %p2220_p7 = scmp.ge.s32.totalorder %s2672_s15, 1 }
  0x12   : > { %s3814_s22 = scalar_select %p2778_p5, 1, 0 }
  0x13   : > { %s3816_s23 = scalar_select %p2782_p6, 1, 0 }
  0x14   : > { %3815 = sst [smem:[#allocation14_spill]] %s3814_s22  ;;  %p139_p8 = scmp.lt.s32.totalorder %s2672_s15, 3 }
  0x15   : > { %3817 = sst [smem:[#allocation15_spill]] %s3816_s23 }
  0x16   : > { %p140_p9 = pnand %p2220_p7, %p139_p8 }
  0x17   : > { %v2674_v0 = vmov (!%p140_p9), 0   ;;  %s3716_s24 = smov (!%p140_p9), 2   ;;  %s3718_s25 = smov (!%p140_p9), 3   ;;  %vm174_vm0 = vcmask (!%p140_p9), 257024   ;;  %vm187_vm1 = vcmask (!%p140_p9), 261120   ;;  %vm3770_vm2 = vcmask (!%p140_p9), 916480  }
  0x18   : > { %143 = sbr.rel (%p140_p9) target bundleno = 3139 (0xc43), region = 32  ;;  %166 = vst [vmem:[#allocation2] sm:$0xff] (!%p140_p9), %v2674_v0  ;;  %193 = vrot.lane.b32.xlu1 (!%p140_p9), %v2674_v0, %s3716_s24  ;;  %167 = vst [vmem:[#allocation2 + $0x8] sm:$0xff] (!%p140_p9), %v2674_v0  ;;  %180 = vrot.lane.b32.xlu0 (!%p140_p9), %v2674_v0, %s3718_s25  ;;  %p161_p10 = scmp.lt.s32.totalorder (!%p140_p9), %s2761_s16, 1  ;;  %v2574_v4 = vld [vmem:[%s3703_s1] ss:$24 sps:$4 sm:$0xff] (!%p140_p9)  }
  0x19   : > { %170 = vst [vmem:[#allocation2 + $0x20] sm:$0xff] (!%p140_p9), %v2674_v0  ;;  %2572 = vset.pattern.permute.xlu1 (!%p140_p9), %v2674_v0  ;;  %2573 = vset.pattern.permute.xlu0 (!%p140_p9), %v2674_v0  ;;  %s3818_s0 = sld [smem:[#allocation16_spill]] (!%p140_p9)  ;;  %s3788_s4 = smov (!%p140_p9), 1   ;;  %vm3781_vm3 = vcmask (!%p140_p9), 15360   ;;  %vm3782_vm4 = vcmask (!%p140_p9), 23552   ;;  %vm209_vm5 = vcmask (!%p140_p9), 7168  }
  0x1a   : > { %s3708_s5 = smov (!%p140_p9), 127   ;;  %s3738_s6 = smov (!%p140_p9), 126   ;;  %2408 = vmatprep.mubr.msk.bf16.mxu0 (!%p140_p9), %vm3770_vm2, %v2574_v4  ;;  %v2575_v28 = vld [vmem:[%s3703_s1 + $0x30] ss:$24 sps:$4 sm:$0xff] (!%p140_p9)   ;;  %v2576_v57 = vld [vmem:[%s3703_s1 + $0x60] ss:$24 sps:$4 sm:$0xff] (!%p140_p9)  }
  0x1b   : > { %s3706_s7 = smov (!%p140_p9), 125   ;;  %s3819_s2 = sld [smem:[#allocation17_spill]] (!%p140_p9)  ;;  %vm432_vm10 = vcmask (!%p140_p9), 785408   ;;  %vm2682_vm11 = vmmov (!%p140_p9), 0   ;;  %vm495_vm12 = vcmask (!%p140_p9), 523520   ;;  %vm530_vm13 = vcmask (!%p140_p9), 523264  }
  0x1c   : > { %2424 = vmatprep.mubr.msk.bf16.mxu1 (!%p140_p9), %vm432_vm10, %v2576_v57  ;;  %s2684_s28 = smov (!%p140_p9), 32   ;;  %s3786_s29 = smov (!%p140_p9), 20   ;;  %vm681_vm14 = vcmask (!%p140_p9), 97280   ;;  %vm585_vm15 = vcmask (!%p140_p9), 162816  }
  0x1d   : > { %s3784_s8 = smov (!%p140_p9), 19   ;;  %s3783_s9 = smov (!%p140_p9), 10  }
  0x1e   : > { %s3742_s10 = smov (!%p140_p9), 18   ;;  %s3736_s11 = smov (!%p140_p9), 9  }
  0x1f   : > { %s162_s26 = scalar_select %p161_p10, %s2761_s16, 1 }
  0x20   : > { %s3740_s17 = smov 17   ;;  %s3710_s19 = smov 8  }
  0x21   : > { %s2221_s27 = sshll.u32 %s162_s26, 3  ;;  %v244_v5 = vld [vmem:[%s3819_s2] sm:$0xff]  ;;  %v245_v6 = vld [vmem:[%s3819_s2 + $0x8] sm:$0xff]  ;;  %v246_v7 = vld [vmem:[%s3819_s2 + $0x10] sm:$0xff]  ;;  %s3712_s20 = smov 16  }
  0x22   : > { %s164_s30 = scalar_lea.vmem %s3818_s0, %s2221_s27  ;;  %v247_v8 = vld [vmem:[%s3819_s2 + $0x18] sm:$0xff]  ;;  %v400_v53 = vld [vmem:[%s3819_s2 + $0x30] sm:$0xff]  ;;  %v398_v54 = vld [vmem:[%s3819_s2 + $0x20] sm:$0xff]  ;;  %s3787_s27 = smov 12  }
  0x23   : > { %v172_v1 = vld [vmem:[%s164_s30] sm:$0xff]  ;;  %v401_v55 = vld [vmem:[%s3819_s2 + $0x38] sm:$0xff]  ;;  %v399_v56 = vld [vmem:[%s3819_s2 + $0x28] sm:$0xff]  ;;  %s3785_s30 = smov 11   ;;  %s3714_s26 = smov 7  }
  0x24   : > { %v173_v2 = vpack.c.bf16 %v172_v1, %v172_v1  ;;  %s2718_s0 = smov 64   ;;  %s3836_s14 = smov 124  }
  0x25   : > { %s3837_s18 = smov 116   ;;  %s3838_s21 = smov 123  }
  0x26   : > { %175 = vst.msk [vmem:[#allocation2 + $0x8] sm:$0xf] %vm174_vm0, %v173_v2  ;;  %vm693_vm0 = vcmask 89088   ;;  %s3839_s12 = smov 115   ;;  %s3840_s23 = smov 122  }
  0x27   : > { %s3844_s15 = smov 120   ;;  %s3845_s3 = smov 112  }
  0x28   : > { %s3846_s22 = smov 119   ;;  %s3847_s16 = smov 111  }
  0x29   : > { %s3848_s13 = smov 118  }
  0x2d   : > { %v190_v3 = vld [vmem:[#allocation2 + $0x8] sm:$0xff] }
  0x2e   : > { %195 = vrot.lane.b32.xlu1 %v190_v3, %s3716_s24  ;;  %182 = vrot.lane.b32.xlu0 %v190_v3, %s3718_s25  ;;  %214 = vst.msk [vmem:[#allocation3 + $0x18] sm:$0xff] %vm187_vm1, %v190_v3 }
  0x32   : > { %207 = vrot.lane.b32.xlu1 %v190_v3, %s3788_s4  ;;  %205 = vrot.lane.b32.xlu0 %v2674_v0, %s3788_s4 }
  0x35   : > { %v240_v24 = vld [vmem:[#allocation3 + $0x18] sm:$0xff] }
  0x36   : > { %217 = vrot.lane.b32.xlu0 %v190_v3, %s3708_s5  ;;  %223 = vrot.lane.b32.xlu1 %v190_v3, %s3738_s6 }
  0x3a   : > { %229 = vrot.lane.b32.xlu0 %v190_v3, %s3706_s7  ;;  %250 = vperm.xlu1 %2572, %v244_v5   ;;  %s3760_s7 = smov 6  }
  0x3e   : > { %255 = vperm.xlu0 %2573, %v245_v6   ;;  %260 = vperm.xlu1 %2572, %v246_v7  }
  0x42   : > { %358 = vrot.lane.b32.xlu0 %v2674_v0, %s3788_s4  ;;  %265 = vperm.xlu1 %2572, %v247_v8  }
  0x46   : > { %362 = vrot.lane.b32.xlu0 %v2674_v0, %s3788_s4 }
  0x8a   : > { %v194_v9 = vpop.permute.xlu1 %193  ;;  %v181_v10 = vpop.permute.xlu0 %180 }
  0xa0   : > { %v196_v11 = vpop.permute.xlu1 %195  ;;  %v183_v12 = vpop.permute.xlu0 %182 }
  0xa1   : > { %v198_v13 = vsel %vm3781_vm3, %v194_v9, %v196_v11  ;;  %v185_v14 = vsel %vm3782_vm4, %v181_v10, %v183_v12  ;;  %v2577_v9 = vld [vmem:[%s3703_s1 + $0x90] ss:$24 sps:$4 sm:$0xff]   ;;  %v2681_v11 = vmov 0.0   ;;  %v2579_v12 = vld [vmem:[%s3703_s1 + $0x120] ss:$24 sps:$4 sm:$0xff]  }
  0xa2   : > { %200 = vst.msk [vmem:[#allocation3 + $0x8] sm:$0xff] %vm187_vm1, %v198_v13  ;;  %188 = vst.msk [vmem:[#allocation3] sm:$0xff] %vm187_vm1, %v185_v14  ;;  %v2578_v10 = vld [vmem:[%s3703_s1 + $0xf0] ss:$24 sps:$4 sm:$0xff]   ;;  %v2581_v14 = vld [vmem:[%s3703_s1 + $0x180] ss:$24 sps:$4 sm:$0xff]  }
  0xa3   : > { %v2580_v13 = vld [vmem:[%s3703_s1 + $0x150] ss:$24 sps:$4 sm:$0xff]  }
  0xa4   : > { %v208_v15 = vpop.permute.xlu1 %207  ;;  %v206_v16 = vpop.permute.xlu0 %205 }
  0xa5   : > { %v210_v17 = vsel %vm209_vm5, %v206_v16, %v208_v15 }
  0xa6   : > { %212 = vst.msk [vmem:[#allocation3 + $0x10] sm:$0xff] %vm187_vm1, %v210_v17 }
  0xa8   : > { %v218_v18 = vpop.permute.xlu0 %217  ;;  %v224_v19 = vpop.permute.xlu1 %223 }
  0xa9   : > { %v237_v20 = vld [vmem:[#allocation3] sm:$0xff]  ;;  %220 = vst.msk [vmem:[#allocation3 + $0x20] sm:$0xff] %vm187_vm1, %v218_v18  ;;  %226 = vst.msk [vmem:[#allocation3 + $0x28] sm:$0xff] %vm187_vm1, %v224_v19  ;;  %v238_v21 = vld [vmem:[#allocation3 + $0x8] sm:$0xff] }
  0xaa   : > { %2394 = vmatprep.subr.bf16.mxu0 %v237_v20 }
  0xab   : > { %2395 = vmatpush3.bf16.msra.mxu0 %v237_v20 }
  0xac   : > { %2396 = vmatprep.subr.bf16.mxu0 %v238_v21  ;;  %v230_v22 = vpop.permute.xlu0 %229 }
  0xad   : > { %v239_v23 = vld [vmem:[#allocation3 + $0x10] sm:$0xff]  ;;  %232 = vst.msk [vmem:[#allocation3 + $0x30] sm:$0xff] %vm187_vm1, %v230_v22 }
  0xaf   : > { %2397 = vmatpush3.bf16.msra.mxu0 %v238_v21 }
  0xb0   : > { %2398 = vmatprep.subr.bf16.mxu0 %v239_v23  ;;  %v241_v25 = vld [vmem:[#allocation3 + $0x20] sm:$0xff]  ;;  %v242_v26 = vld [vmem:[#allocation3 + $0x28] sm:$0xff] }
  0xb3   : > { %2399 = vmatpush3.bf16.msra.mxu0 %v239_v23 }
  0xb4   : > { %2400 = vmatprep.subr.bf16.mxu0 %v240_v24  ;;  %v243_v27 = vld [vmem:[#allocation3 + $0x30] sm:$0xff] }
  0xb7   : > { %2401 = vmatpush3.bf16.msra.mxu0 %v240_v24 }
  0xb8   : > { %2402 = vmatprep.subr.bf16.mxu0 %v241_v25 }
  0xb9   : > { %v251_v29 = vpop.permute.xlu1 %250 }
  0xbb   : > { %2403 = vmatpush3.bf16.msra.mxu0 %v241_v25 }
  0xbc   : > { %2404 = vmatprep.subr.bf16.mxu0 %v242_v26 }
  0xbd   : > { %v261_v30 = vpop.permute.xlu1 %260  ;;  %v256_v34 = vpop.permute.xlu0 %255 }
  0xbf   : > { %2405 = vmatpush3.bf16.msra.mxu0 %v242_v26 }
  0xc0   : > { %2406 = vmatprep.subr.bf16.mxu0 %v243_v27 }
  0xc1   : > { %v266_v35 = vpop.permute.xlu1 %265  ;;  %v359_v58 = vpop.permute.xlu0 %358 }
  0xc3   : > { %2407 = vmatpush3.bf16.msra.mxu0 %v243_v27 }
  0xc5   : > { %v363_v59 = vpop.permute.xlu0 %362 }
  0xc6   : > { %2409 = vmatmul.mubr.msk.bf16.vlgmr.msra.gmra.mrb[0].mxu0 %vm3770_vm2, %v2575_v28  ;;  %vm3773_vm2 = vcmask 56320  }
 0x199   : > { %v2410_v31 = vpop.f32.mrb[0].mxu0 }
 0x19a   : > { %v328_v32 = vadd.f32 %v2410_v31, %v261_v30  ;;  %v319_v33 = vpop.f32.mrb[1].mxu0 }
 0x19b   : > { %v320_v36 = vadd.f32 %v319_v33, %v251_v29  ;;  %v2411_v37 = vpop.f32.mrb[2].mxu0 }
 0x19c   : > { %v340_v38 = vmul.f32 0.1, %v328_v32  ;;  %v331_v39 = vadd.f32 %v2411_v37, %v266_v35  ;;  %v322_v40 = vpop.f32.mrb[3].mxu0  ;;  %vm336_vm6 = vcmp.gt.f32.partialorder %v328_v32, 0.0 }
 0x19d   : > { %v338_v41 = vmul.f32 0.1, %v320_v36  ;;  %v323_v42 = vadd.f32 %v322_v40, %v256_v34  ;;  %vm334_vm7 = vcmp.gt.f32.partialorder %v320_v36, 0.0 }
 0x19e   : > { %vm337_vm8 = vcmp.gt.f32.partialorder %v331_v39, 0.0  ;;  %v341_v43 = vmul.f32 0.1, %v331_v39  ;;  %v344_v45 = vsel %vm336_vm6, %v328_v32, %v340_v38  ;;  %vm705_vm6 = vcmask 80896  }
 0x19f   : > { %vm335_vm9 = vcmp.gt.f32.partialorder %v323_v42, 0.0  ;;  %v339_v44 = vmul.f32 0.1, %v323_v42  ;;  %v342_v47 = vsel %vm334_vm7, %v320_v36, %v338_v41  ;;  %vm609_vm7 = vcmask 146432  }
 0x1a0   : > { %v345_v46 = vsel %vm337_vm8, %v331_v39, %v341_v43  ;;  %vm717_vm8 = vcmask 72704  }
 0x1a1   : > { %v347_v48 = vpack.c.bf16 %v345_v46, %v344_v45  ;;  %v343_v49 = vsel %vm335_vm9, %v323_v42, %v339_v44  ;;  %v983_v45 = vld [vmem:[%s3819_s2 + $0x40] sm:$0xff]  ;;  %vm3772_vm9 = vcmask 138240  }
 0x1a2   : > { %v346_v50 = vpack.c.bf16 %v343_v49, %v342_v47  ;;  %v2584_v49 = vld [vmem:[%s3703_s1 + $0xc4] ss:$24 sps:$4 sm:$0xff]  }
 0x1a3   : > { %349 = vst.msk [vmem:[#allocation2 + $0x20] sm:$0xff] %vm187_vm1, %v347_v48  ;;  %1060 = vmatprep.mubr.bf16.mxu0 %v2584_v49 }
 0x1a4   : > { %348 = vst.msk [vmem:[#allocation2 + $0x8] sm:$0xff] %vm187_vm1, %v346_v50 }
 0x1aa   : > { %v353_v51 = vld [vmem:[#allocation2 + $0x20] sm:$0xff] }
 0x1ab   : > { %v376_v52 = vld [vmem:[#allocation2 + $0x8] sm:$0xff]  ;;  %375 = vst.msk [vmem:[#allocation3 + $0x18] sm:$0xff] %vm187_vm1, %v353_v51 }
 0x1ac   : > { %380 = vrot.lane.b32.xlu0 %v376_v52, %s3708_s5  ;;  %360 = vrot.lane.b32.xlu1 %v376_v52, %s3788_s4  ;;  %374 = vst.msk [vmem:[#allocation3 + $0x10] sm:$0xff] %vm187_vm1, %v376_v52 }
 0x1b0   : > { %414 = vperm.xlu0 %2573, %v400_v53   ;;  %364 = vrot.lane.b32.xlu1 %v353_v51, %s3788_s4 }
 0x1b2   : > { %v395_v6 = vld [vmem:[#allocation3 + $0x18] sm:$0xff] }
 0x1b3   : > { %v394_v5 = vld [vmem:[#allocation3 + $0x10] sm:$0xff] }
 0x1b4   : > { %404 = vperm.xlu0 %2573, %v398_v54   ;;  %382 = vrot.lane.b32.xlu1 %v353_v51, %s3708_s5  ;;  %s3756_s5 = smov 14  }
 0x1b8   : > { %419 = vperm.xlu1 %2572, %v401_v55  }
 0x1bc   : > { %409 = vperm.xlu1 %2572, %v399_v56  }
 0x1c0   : > { %677 = vrot.lane.b32.xlu1 %v2674_v0, %s3787_s27 }
 0x1c4   : > { %581 = vrot.lane.b32.xlu1 %v2674_v0, %s3786_s29 }
 0x1c8   : > { %689 = vrot.lane.b32.xlu1 %v2674_v0, %s3785_s30 }
 0x1cc   : > { %593 = vrot.lane.b32.xlu1 %v2674_v0, %s3784_s8 }
 0x1d0   : > { %701 = vrot.lane.b32.xlu1 %v2674_v0, %s3783_s9 }
 0x1d4   : > { %605 = vrot.lane.b32.xlu1 %v2674_v0, %s3742_s10 }
 0x1d8   : > { %713 = vrot.lane.b32.xlu1 %v2674_v0, %s3736_s11 }
 0x1dc   : > { %617 = vrot.lane.b32.xlu1 %v2674_v0, %s3740_s17 }
 0x1e0   : > { %725 = vrot.lane.b32.xlu1 %v2674_v0, %s3710_s19  ;;  %s3748_s19 = smov 5  }
 0x1e4   : > { %629 = vrot.lane.b32.xlu1 %v2674_v0, %s3712_s20  ;;  %s3750_s20 = smov 13  }
 0x1e8   : > { %737 = vrot.lane.b32.xlu1 %v2674_v0, %s3714_s26  ;;  %s3720_s26 = smov 4  }
 0x21e   : > { %v361_v60 = vpop.permute.xlu1 %360  ;;  %v381_v61 = vpop.permute.xlu0 %380 }
 0x21f   : > { %v366_v62 = vsel %vm209_vm5, %v359_v58, %v361_v60  ;;  %386 = vst.msk [vmem:[#allocation3 + $0x20] sm:$0xff] %vm187_vm1, %v381_v61  ;;  %v2587_v58 = vld [vmem:[%s3703_s1 + $0xcc] ss:$24 sps:$4 sm:$0xff]  }
 0x220   : > { %370 = vst.msk [vmem:[#allocation3] sm:$0xff] %vm187_vm1, %v366_v62 }
 0x222   : > { %v365_v63 = vpop.permute.xlu1 %364 }
 0x223   : > { %v367_v1 = vsel %vm209_vm5, %v363_v59, %v365_v63  ;;  %v984_v63 = vld [vmem:[%s3819_s2 + $0x48] sm:$0xff] }
 0x224   : > { %371 = vst.msk [vmem:[#allocation3 + $0x8] sm:$0xff] %vm187_vm1, %v367_v1 }
 0x226   : > { %v383_v2 = vpop.permute.xlu1 %382  ;;  %v396_v7 = vld [vmem:[#allocation3 + $0x20] sm:$0xff] }
 0x227   : > { %387 = vst.msk [vmem:[#allocation3 + $0x28] sm:$0xff] %vm187_vm1, %v383_v2  ;;  %v392_v3 = vld [vmem:[#allocation3] sm:$0xff] }
 0x228   : > { %2412 = vmatprep.subr.bf16.mxu1 %v392_v3 }
 0x229   : > { %2413 = vmatpush3.bf16.msra.mxu1 %v392_v3 }
 0x22b   : > { %v393_v4 = vld [vmem:[#allocation3 + $0x8] sm:$0xff] }
 0x22c   : > { %2414 = vmatprep.subr.bf16.mxu1 %v393_v4 }
 0x22d   : > { %2415 = vmatpush3.bf16.msra.mxu1 %v393_v4 }
 0x22e   : > { %2416 = vmatprep.subr.bf16.mxu1 %v394_v5  ;;  %v397_v8 = vld [vmem:[#allocation3 + $0x28] sm:$0xff] }
 0x22f   : > { %v415_v15 = vpop.permute.xlu0 %414 }
 0x231   : > { %2417 = vmatpush3.bf16.msra.mxu1 %v394_v5 }
 0x232   : > { %2418 = vmatprep.subr.bf16.mxu1 %v395_v6 }
 0x233   : > { %v405_v19 = vpop.permute.xlu0 %404 }
 0x235   : > { %2419 = vmatpush3.bf16.msra.mxu1 %v395_v6 }
 0x236   : > { %2420 = vmatprep.subr.bf16.mxu1 %v396_v7 }
 0x237   : > { %v420_v16 = vpop.permute.xlu1 %419 }
 0x239   : > { %2421 = vmatpush3.bf16.msra.mxu1 %v396_v7 }
 0x23a   : > { %2422 = vmatprep.subr.bf16.mxu1 %v397_v8 }
 0x23b   : > { %v410_v21 = vpop.permute.xlu1 %409 }
 0x23d   : > { %2423 = vmatpush3.bf16.msra.mxu1 %v397_v8 }
 0x23e   : > { %2428 = vmatprep.subr.bf16.mxu1 %v2681_v11 }
 0x23f   : > { %v2939_v36 = vpop.permute.xlu1 %677 }
 0x240   : > { %2425 = vmatmul.mubr.msk.bf16.vlgmr.msra.gmra.mrb[0].mxu1 %vm432_vm10, %v2577_v9  ;;  %vm3771_vm10 = vcmask 64512  }
 0x241   : > { %2429 = vmatpush3.bf16.msra.mxu1 %v2578_v10  ;;  %2436 = vmatprep.mubr.msk.bf16.mxu1 %vm2682_vm11, %v2681_v11 }
 0x242   : > { %2430 = vmatprep.subr.bf16.mxu1 %v2681_v11 }
 0x243   : > { %v2947_v38 = vpop.permute.xlu1 %581 }
 0x245   : > { %2431 = vmatpush3.bf16.msra.mxu1 %v2579_v12 }
 0x246   : > { %2432 = vmatprep.subr.bf16.mxu1 %v2681_v11 }
 0x247   : > { %v2955_v39 = vpop.permute.xlu1 %689 }
 0x249   : > { %2433 = vmatpush3.bf16.msra.mxu1 %v2580_v13 }
 0x24a   : > { %2434 = vmatprep.subr.bf16.mxu1 %v2681_v11 }
 0x24b   : > { %v2965_v40 = vpop.permute.xlu1 %593 }
 0x24d   : > { %2435 = vmatpush3.bf16.msra.mxu1 %v2581_v14 }
 0x24f   : > { %v2971_v41 = vpop.permute.xlu1 %701 }
 0x253   : > { %v2981_v42 = vpop.permute.xlu1 %605 }
 0x257   : > { %v2987_v43 = vpop.permute.xlu1 %713 }
 0x25b   : > { %v2997_v44 = vpop.permute.xlu1 %617 }
 0x25f   : > { %v3004_v46 = vpop.permute.xlu1 %725 }
 0x263   : > { %v3012_v47 = vpop.permute.xlu1 %629 }
 0x267   : > { %v3016_v48 = vpop.permute.xlu1 %737 }
 0x313   : > { %v2426_v17 = vpop.f32.mrb[0].mxu1 }
 0x314   : > { %v473_v18 = vpop.f32.mrb[1].mxu1  ;;  %v482_v22 = vadd.f32 %v2426_v17, %v415_v15 }
 0x315   : > { %v2427_v20 = vpop.f32.mrb[2].mxu1  ;;  %v474_v25 = vadd.f32 %v473_v18, %v405_v19 }
 0x316   : > { %v485_v23 = vadd.f32 %v2427_v20, %v420_v16  ;;  %v476_v24 = vpop.f32.mrb[3].mxu1 }
 0x317   : > { %v477_v26 = vadd.f32 %v476_v24, %v410_v21 }
 0x318   : > { %v490_v27 = vpack.c.bf16 %v485_v23, %v482_v22 }
 0x319   : > { %v488_v28 = vpack.c.bf16 %v477_v26, %v474_v25 }
 0x31a   : > { %492 = vrot.lane.b32.xlu0 %v490_v27, %s2684_s28  ;;  %s3762_s28 = smov 15  }
 0x31b   : > { %489 = vst.msk [vmem:[#allocation3] sm:$0xff] %vm187_vm1, %v488_v28  ;;  %641 = vrot.lane.b32.xlu1 %v2674_v0, %s3762_s28  ;;  %vm597_vm1 = vcmask 154624  }
 0x31f   : > { %749 = vrot.lane.b32.xlu1 %v2674_v0, %s3760_s7 }
 0x323   : > { %653 = vrot.lane.b32.xlu1 %v2674_v0, %s3756_s5 }
 0x327   : > { %761 = vrot.lane.b32.xlu1 %v2674_v0, %s3748_s19 }
 0x32b   : > { %665 = vrot.lane.b32.xlu1 %v2674_v0, %s3750_s20 }
 0x32f   : > { %773 = vrot.lane.b32.xlu1 %v2674_v0, %s3720_s26  ;;  %s3726_s26 = smov 122  }
 0x333   : > { %785 = vrot.lane.b32.xlu1 %v2674_v0, %s3718_s25  ;;  %s3724_s25 = smov 123  }
 0x337   : > { %796 = vrot.lane.b32.xlu1 %v2674_v0, %s3716_s24  ;;  %s3722_s24 = smov 124  }
 0x33b   : > { %807 = vrot.lane.b32.xlu1 %v2674_v0, %s3788_s4 }
 0x38c   : > { %v493_v29 = vpop.permute.xlu0 %492 }
 0x38d   : > { %496 = vst.msk [vmem:[#allocation3] sm:$0xff] %vm495_vm12, %v493_v29  ;;  %v3025_v50 = vpop.permute.xlu1 %641  ;;  %vm633_vm12 = vcmask 130048  }
 0x391   : > { %v3029_v51 = vpop.permute.xlu1 %749 }
 0x394   : > { %v497_v30 = vld [vmem:[#allocation3] sm:$0xff] }
 0x395   : > { %2437 = vmatmul.mubr.msk.bf16.vlgmr.msra.gmra.mrb[4].mxu1 %vm530_vm13, %v497_v30  ;;  %v3035_v52 = vpop.permute.xlu1 %653 }
 0x396   : > { %1101 = vmatprep.mubr.bf16.mxu1 %v2587_v58 }
 0x399   : > { %v3039_v53 = vpop.permute.xlu1 %761 }
 0x39d   : > { %v3045_v54 = vpop.permute.xlu1 %665 }
 0x3a1   : > { %v3049_v55 = vpop.permute.xlu1 %773 }
 0x3a5   : > { %v3055_v56 = vpop.permute.xlu1 %785 }
 0x3a9   : > { %v3059_v57 = vpop.permute.xlu1 %796 }
 0x3ad   : > { %v3068_v59 = vpop.permute.xlu1 %807 }
 0x468   : > { %v568_v31 = vpop.f32.mrb[4].mxu1 }
 0x469   : > { %v2438_v32 = vpop.f32.mrb[5].mxu1 }
 0x46a   : > { %v571_v33 = vpop.f32.mrb[6].mxu1 }
 0x46b   : > { %v575_v34 = vpack.c.bf16 %v571_v33, %v568_v31  ;;  %v2439_v35 = vpop.f32.mrb[7].mxu1 }
 0x46d   : > { %576 = vst.msk [vmem:[#allocation2 + $0x8] sm:$0xff] %vm530_vm13, %v575_v34 }
 0x474   : > { %v2941_v37 = vld [vmem:[#allocation2 + $0x8] sm:$0xff] }
 0x475   : > { %836 = vrot.lane.b32.xlu1 %v2941_v37, %s3722_s24  ;;  %679 = vrot.lane.b32.xlu0 %v2941_v37, %s3787_s27  ;;  %815 = vst.msk [vmem:[#allocation3 + $0xa0] sm:$0xff] %vm530_vm13, %v2941_v37  ;;  %s3728_s24 = smov 121  }
 0x479   : > { %842 = vrot.lane.b32.xlu1 %v2941_v37, %s3724_s25  ;;  %583 = vrot.lane.b32.xlu0 %v2941_v37, %s3786_s29  ;;  %s3732_s25 = smov 120  }
 0x47d   : > { %848 = vrot.lane.b32.xlu1 %v2941_v37, %s3726_s26  ;;  %691 = vrot.lane.b32.xlu0 %v2941_v37, %s3785_s30  ;;  %s3730_s26 = smov 119  }
 0x481   : > { %854 = vrot.lane.b32.xlu1 %v2941_v37, %s3728_s24  ;;  %595 = vrot.lane.b32.xlu0 %v2941_v37, %s3784_s8  ;;  %s3734_s24 = smov 111  }
 0x485   : > { %860 = vrot.lane.b32.xlu1 %v2941_v37, %s3732_s25  ;;  %703 = vrot.lane.b32.xlu0 %v2941_v37, %s3783_s9  ;;  %s3820_s25 = smov 8  }
 0x489   : > { %866 = vrot.lane.b32.xlu1 %v2941_v37, %s3730_s26  ;;  %607 = vrot.lane.b32.xlu0 %v2941_v37, %s3742_s10  ;;  %s3746_s26 = smov 117   ;;  %s3822_s10 = smov 7  }
 0x48d   : > { %914 = vrot.lane.b32.xlu1 %v2941_v37, %s3734_s24  ;;  %715 = vrot.lane.b32.xlu0 %v2941_v37, %s3736_s11  ;;  %s3744_s24 = smov 109   ;;  %s3821_s11 = smov 16  }
 0x491   : > { %824 = vrot.lane.b32.xlu1 %v2941_v37, %s3738_s6  ;;  %619 = vrot.lane.b32.xlu0 %v2941_v37, %s3740_s17  ;;  %s3754_s6 = smov 115   ;;  %s3825_s17 = smov 2  }
 0x495   : > { %878 = vrot.lane.b32.xlu1 %v2941_v37, %s3746_s26  ;;  %727 = vrot.lane.b32.xlu0 %v2941_v37, %s3820_s25  ;;  %s3752_s26 = smov 116  }
 0x499   : > { %926 = vrot.lane.b32.xlu1 %v2941_v37, %s3744_s24  ;;  %631 = vrot.lane.b32.xlu0 %v2941_v37, %s3821_s11  ;;  %s3823_s24 = smov 4  }
 0x49d   : > { %987 = vperm.xlu1 %2572, %v983_v45   ;;  %739 = vrot.lane.b32.xlu0 %v2941_v37, %s3822_s10 }
 0x4a1   : > { %643 = vrot.lane.b32.xlu0 %v2941_v37, %s3762_s28  ;;  %1163 = vrot.lane.b32.xlu1 %v2674_v0, %s3788_s4  ;;  %s3831_s28 = smov 15  }
 0x4a5   : > { %751 = vrot.lane.b32.xlu0 %v2941_v37, %s3760_s7  ;;  %s3777_s7 = smov 108  }
 0x4a9   : > { %655 = vrot.lane.b32.xlu0 %v2941_v37, %s3756_s5  ;;  %s3826_s5 = smov 127  }
 0x4ad   : > { %763 = vrot.lane.b32.xlu0 %v2941_v37, %s3748_s19  ;;  %s3824_s19 = smov 3  }
 0x4b1   : > { %667 = vrot.lane.b32.xlu0 %v2941_v37, %s3750_s20  ;;  %s3758_s20 = smov 114  }
 0x4b5   : > { %775 = vrot.lane.b32.xlu0 %v2941_v37, %s3823_s24 }
 0x4b9   : > { %884 = vrot.lane.b32.xlu0 %v2941_v37, %s3752_s26  ;;  %s3764_s26 = smov 113  }
 0x4bd   : > { %787 = vrot.lane.b32.xlu0 %v2941_v37, %s3824_s19 }
 0x4c1   : > { %890 = vrot.lane.b32.xlu0 %v2941_v37, %s3754_s6  ;;  %s3766_s6 = smov 112  }
 0x4c5   : > { %798 = vrot.lane.b32.xlu0 %v2941_v37, %s3825_s17 }
 0x4c9   : > { %896 = vrot.lane.b32.xlu0 %v2941_v37, %s3758_s20  ;;  %s3779_s20 = smov 118  }
 0x4cd   : > { %809 = vrot.lane.b32.xlu0 %v2941_v37, %s3788_s4 }
 0x4d1   : > { %902 = vrot.lane.b32.xlu0 %v2941_v37, %s3764_s26  ;;  %s3768_s26 = smov 110  }
 0x4d5   : > { %908 = vrot.lane.b32.xlu0 %v2941_v37, %s3766_s6  ;;  %s3827_s6 = smov 125  }
 0x4d9   : > { %818 = vrot.lane.b32.xlu0 %v2941_v37, %s3826_s5 }
 0x4dd   : > { %872 = vrot.lane.b32.xlu0 %v2941_v37, %s3779_s20  ;;  %s3828_s20 = smov 18  }
 0x4e1   : > { %920 = vrot.lane.b32.xlu0 %v2941_v37, %s3768_s26  ;;  %s3830_s26 = smov 17  }
 0x4e5   : > { %830 = vrot.lane.b32.xlu0 %v2941_v37, %s3827_s6 }
 0x4e7   : > { %v837_v60 = vpop.permute.xlu1 %836  ;;  %v680_v61 = vpop.permute.xlu0 %679 }
 0x4e8   : > { %839 = vst.msk [vmem:[#allocation3 + $0xc0] sm:$0xff] %vm530_vm13, %v837_v60  ;;  %v682_v62 = vsel %vm681_vm14, %v2939_v36, %v680_v61 }
 0x4e9   : > { %684 = vst.msk [vmem:[#allocation3 + $0x40] sm:$0xff] %vm530_vm13, %v682_v62  ;;  %932 = vrot.lane.b32.xlu0 %v2941_v37, %s3777_s7  ;;  %s3829_s7 = smov 9  }
 0x4eb   : > { %v843_v1 = vpop.permute.xlu1 %842  ;;  %v584_v2 = vpop.permute.xlu0 %583 }
 0x4ec   : > { %845 = vst.msk [vmem:[#allocation3 + $0xc8] sm:$0xff] %vm530_vm13, %v843_v1  ;;  %v586_v3 = vsel %vm585_vm15, %v2947_v38, %v584_v2 }
 0x4ed   : > { %588 = vst.msk [vmem:[#allocation3] sm:$0xff] %vm530_vm13, %v586_v3  ;;  %992 = vperm.xlu0 %2573, %v984_v63   ;;  %v2588_v3 = vld [vmem:[%s3703_s1 + $0xd4] ss:$24 sps:$4 sm:$0xff]  }
 0x4ef   : > { %v849_v4 = vpop.permute.xlu1 %848  ;;  %v692_v5 = vpop.permute.xlu0 %691  ;;  %v966_v6 = vld [vmem:[#allocation3 + $0xc0] sm:$0xff] }
 0x4f0   : > { %851 = vst.msk [vmem:[#allocation3 + $0xd0] sm:$0xff] %vm530_vm13, %v849_v4  ;;  %v694_v7 = vsel %vm693_vm0, %v2955_v39, %v692_v5  ;;  %2307 = vmatprep.subr.bf16.mxu1 %v966_v6  ;;  %v950_v8 = vld [vmem:[#allocation3 + $0x40] sm:$0xff] }
 0x4f1   : > { %696 = vst.msk [vmem:[#allocation3 + $0x48] sm:$0xff] %vm530_vm13, %v694_v7  ;;  %2285 = vmatprep.subr.bf16.mxu0 %v950_v8 }
 0x4f3   : > { %v855_v9 = vpop.permute.xlu1 %854  ;;  %v596_v10 = vpop.permute.xlu0 %595  ;;  %v967_v6 = vld [vmem:[#allocation3 + $0xc8] sm:$0xff] }
 0x4f4   : > { %857 = vst.msk [vmem:[#allocation3 + $0xd8] sm:$0xff] %vm530_vm13, %v855_v9  ;;  %v598_v12 = vsel %vm597_vm1, %v2965_v40, %v596_v10  ;;  %v942_v13 = vld [vmem:[#allocation3] sm:$0xff]  ;;  %v3151_v9 = vld [vmem:[#allocation2] sm:$0xff] }
 0x4f5   : > { %600 = vst.msk [vmem:[#allocation3 + $0x8] sm:$0xff] %vm530_vm13, %v598_v12  ;;  %2286 = vmatpush3.bf16.msra.mxu0 %v942_v13 }
 0x4f7   : > { %v861_v14 = vpop.permute.xlu1 %860  ;;  %v704_v15 = vpop.permute.xlu0 %703  ;;  %v968_v12 = vld [vmem:[#allocation3 + $0xd0] sm:$0xff] }
 0x4f8   : > { %863 = vst.msk [vmem:[#allocation3 + $0xe0] sm:$0xff] %vm530_vm13, %v861_v14  ;;  %v706_v16 = vsel %vm705_vm6, %v2971_v41, %v704_v15  ;;  %v951_v17 = vld [vmem:[#allocation3 + $0x48] sm:$0xff] }
 0x4f9   : > { %708 = vst.msk [vmem:[#allocation3 + $0x50] sm:$0xff] %vm530_vm13, %v706_v16  ;;  %2287 = vmatprep.subr.bf16.mxu0 %v951_v17 }
 0x4fb   : > { %v867_v18 = vpop.permute.xlu1 %866  ;;  %v608_v19 = vpop.permute.xlu0 %607 }
 0x4fc   : > { %869 = vst.msk [vmem:[#allocation3 + $0xe8] sm:$0xff] %vm530_vm13, %v867_v18  ;;  %v610_v20 = vsel %vm609_vm7, %v2981_v42, %v608_v19  ;;  %v943_v21 = vld [vmem:[#allocation3 + $0x8] sm:$0xff] }
 0x4fd   : > { %612 = vst.msk [vmem:[#allocation3 + $0x10] sm:$0xff] %vm530_vm13, %v610_v20  ;;  %2288 = vmatpush3.bf16.msra.mxu0 %v943_v21 }
 0x4ff   : > { %v915_v22 = vpop.permute.xlu1 %914  ;;  %v716_v23 = vpop.permute.xlu0 %715 }
 0x500   : > { %917 = vst.msk [vmem:[#allocation3 + $0x128] sm:$0xff] %vm530_vm13, %v915_v22  ;;  %v718_v24 = vsel %vm717_vm8, %v2987_v43, %v716_v23  ;;  %v952_v25 = vld [vmem:[#allocation3 + $0x50] sm:$0xff]  ;;  %v970_v22 = vld [vmem:[#allocation3 + $0xe0] sm:$0xff] }
 0x501   : > { %720 = vst.msk [vmem:[#allocation3 + $0x58] sm:$0xff] %vm530_vm13, %v718_v24  ;;  %2289 = vmatprep.subr.bf16.mxu0 %v952_v25  ;;  %v962_v24 = vld [vmem:[#allocation3 + $0xa0] sm:$0xff] }
 0x503   : > { %v825_v26 = vpop.permute.xlu1 %824  ;;  %v620_v27 = vpop.permute.xlu0 %619  ;;  %v971_v25 = vld [vmem:[#allocation3 + $0xe8] sm:$0xff] }
 0x504   : > { %827 = vst.msk [vmem:[#allocation3 + $0xb0] sm:$0xff] %vm530_vm13, %v825_v26  ;;  %v622_v28 = vsel %vm3772_vm9, %v2997_v44, %v620_v27  ;;  %v944_v29 = vld [vmem:[#allocation3 + $0x10] sm:$0xff]  ;;  %vm3775_vm9 = vcmask 48128  }
 0x505   : > { %624 = vst.msk [vmem:[#allocation3 + $0x18] sm:$0xff] %vm530_vm13, %v622_v28  ;;  %2290 = vmatpush3.bf16.msra.mxu0 %v944_v29 }
 0x507   : > { %v879_v30 = vpop.permute.xlu1 %878  ;;  %v728_v31 = vpop.permute.xlu0 %727 }
 0x508   : > { %881 = vst.msk [vmem:[#allocation3 + $0xf8] sm:$0xff] %vm530_vm13, %v879_v30  ;;  %v730_v32 = vsel %vm3771_vm10, %v3004_v46, %v728_v31  ;;  %v953_v33 = vld [vmem:[#allocation3 + $0x58] sm:$0xff]  ;;  %vm3774_vm10 = vcmask 121856   ;;  %v979_v30 = vld [vmem:[#allocation3 + $0x128] sm:$0xff] }
 0x509   : > { %732 = vst.msk [vmem:[#allocation3 + $0x60] sm:$0xff] %vm530_vm13, %v730_v32  ;;  %2291 = vmatprep.subr.bf16.mxu0 %v953_v33 }
 0x50b   : > { %v927_v34 = vpop.permute.xlu1 %926  ;;  %v632_v35 = vpop.permute.xlu0 %631  ;;  %v964_v33 = vld [vmem:[#allocation3 + $0xb0] sm:$0xff] }
 0x50c   : > { %929 = vst.msk [vmem:[#allocation3 + $0x138] sm:$0xff] %vm530_vm13, %v927_v34  ;;  %v634_v36 = vsel %vm633_vm12, %v3012_v47, %v632_v35  ;;  %v945_v37 = vld [vmem:[#allocation3 + $0x18] sm:$0xff] }
 0x50d   : > { %636 = vst.msk [vmem:[#allocation3 + $0x20] sm:$0xff] %vm530_vm13, %v634_v36  ;;  %2292 = vmatpush3.bf16.msra.mxu0 %v945_v37 }
 0x50f   : > { %v740_v38 = vpop.permute.xlu0 %739  ;;  %v973_v34 = vld [vmem:[#allocation3 + $0xf8] sm:$0xff] }
 0x510   : > { %v742_v39 = vsel %vm3773_vm2, %v3016_v48, %v740_v38  ;;  %v954_v40 = vld [vmem:[#allocation3 + $0x60] sm:$0xff]  ;;  %vm3776_vm2 = vcmask 113664  }
 0x511   : > { %744 = vst.msk [vmem:[#allocation3 + $0x68] sm:$0xff] %vm530_vm13, %v742_v39  ;;  %2293 = vmatprep.subr.bf16.mxu0 %v954_v40  ;;  %v2585_v39 = vld [vmem:[%s3703_s1 + $0xc8] ss:$24 sps:$4 sm:$0xff]  }
 0x513   : > { %v644_v41 = vpop.permute.xlu0 %643  ;;  %v981_v38 = vld [vmem:[#allocation3 + $0x138] sm:$0xff] }
 0x514   : > { %v646_v42 = vsel %vm3774_vm10, %v3025_v50, %v644_v41  ;;  %v946_v43 = vld [vmem:[#allocation3 + $0x20] sm:$0xff]  ;;  %vm765_vm10 = vcmask 39936  }
 0x515   : > { %648 = vst.msk [vmem:[#allocation3 + $0x28] sm:$0xff] %vm530_vm13, %v646_v42  ;;  %2294 = vmatpush3.bf16.msra.mxu0 %v946_v43  ;;  %v2590_v41 = vld [vmem:[%s3703_s1 + $0xd0] ss:$24 sps:$4 sm:$0xff]  }
 0x517   : > { %v752_v44 = vpop.permute.xlu0 %751 }
 0x518   : > { %v754_v45 = vsel %vm3775_vm9, %v3029_v51, %v752_v44  ;;  %v955_v46 = vld [vmem:[#allocation3 + $0x68] sm:$0xff]  ;;  %vm669_vm9 = vcmask 105472  }
 0x519   : > { %756 = vst.msk [vmem:[#allocation3 + $0x70] sm:$0xff] %vm530_vm13, %v754_v45  ;;  %2295 = vmatprep.subr.bf16.mxu0 %v955_v46 }
 0x51b   : > { %v656_v47 = vpop.permute.xlu0 %655 }
 0x51c   : > { %v658_v48 = vsel %vm3776_vm2, %v3035_v52, %v656_v47  ;;  %v947_v49 = vld [vmem:[#allocation3 + $0x28] sm:$0xff]  ;;  %vm777_vm2 = vcmask 31744  }
 0x51d   : > { %660 = vst.msk [vmem:[#allocation3 + $0x30] sm:$0xff] %vm530_vm13, %v658_v48  ;;  %2296 = vmatpush3.bf16.msra.mxu0 %v947_v49  ;;  %v988_v49 = vpop.permute.xlu1 %987 }
 0x51f   : > { %v764_v50 = vpop.permute.xlu0 %763 }
 0x520   : > { %v766_v58 = vsel %vm765_vm10, %v3039_v53, %v764_v50  ;;  %v956_v60 = vld [vmem:[#allocation3 + $0x70] sm:$0xff] }
 0x521   : > { %768 = vst.msk [vmem:[#allocation3 + $0x78] sm:$0xff] %vm530_vm13, %v766_v58  ;;  %2297 = vmatprep.subr.bf16.mxu0 %v956_v60 }
 0x523   : > { %v668_v51 = vpop.permute.xlu0 %667 }
 0x524   : > { %v670_v61 = vsel %vm669_vm9, %v3045_v54, %v668_v51  ;;  %v948_v62 = vld [vmem:[#allocation3 + $0x30] sm:$0xff] }
 0x525   : > { %672 = vst.msk [vmem:[#allocation3 + $0x38] sm:$0xff] %vm530_vm13, %v670_v61  ;;  %2298 = vmatpush3.bf16.msra.mxu0 %v948_v62  ;;  %v2582_v54 = vld [vmem:[%s3703_s1 + $0xc0] ss:$24 sps:$4 sm:$0xff]  }
 0x527   : > { %v776_v52 = vpop.permute.xlu0 %775 }
 0x528   : > { %v778_v63 = vsel %vm777_vm2, %v3049_v55, %v776_v52  ;;  %v957_v1 = vld [vmem:[#allocation3 + $0x78] sm:$0xff] }
 0x529   : > { %780 = vst.msk [vmem:[#allocation3 + $0x80] sm:$0xff] %vm530_vm13, %v778_v63  ;;  %2299 = vmatprep.subr.bf16.mxu0 %v957_v1 }
 0x52b   : > { %v885_v53 = vpop.permute.xlu0 %884 }
 0x52c   : > { %887 = vst.msk [vmem:[#allocation3 + $0x100] sm:$0xff] %vm530_vm13, %v885_v53  ;;  %v949_v2 = vld [vmem:[#allocation3 + $0x38] sm:$0xff] }
 0x52d   : > { %2300 = vmatpush3.bf16.msra.mxu0 %v949_v2 }
 0x52e   : > { %1110 = vmatprep.subr.bf16.mxu0 %v2674_v0 }
 0x52f   : > { %v788_v55 = vpop.permute.xlu0 %787 }
 0x530   : > { %v789_v4 = vsel %vm3782_vm4, %v3055_v56, %v788_v55  ;;  %1061 = vmatmul.mubr.bf16.vlgmr.msra.gmra.mrb[4].mxu0 %v2582_v54  ;;  %v958_v5 = vld [vmem:[#allocation3 + $0x80] sm:$0xff] }
 0x531   : > { %791 = vst.msk [vmem:[#allocation3 + $0x88] sm:$0xff] %vm530_vm13, %v789_v4  ;;  %2308 = vmatpush3.bf16.msra.mxu1 %v958_v5  ;;  %2241 = vmatprep.mubr.msk.bf16.mxu0 %vm633_vm12, %v2588_v3 }
 0x532   : > { %2309 = vmatprep.subr.bf16.mxu1 %v967_v6 }
 0x533   : > { %v891_v7 = vpop.permute.xlu0 %890  ;;  %v974_v8 = vld [vmem:[#allocation3 + $0x100] sm:$0xff] }
 0x534   : > { %893 = vst.msk [vmem:[#allocation3 + $0x108] sm:$0xff] %vm530_vm13, %v891_v7  ;;  %1111 = vmatpush1.bf16.msra.mxu0 %v974_v8 }
 0x535   : > { %1112 = vmatprep.subr.bf16.mxu0 %v3151_v9 }
 0x537   : > { %v799_v0 = vpop.permute.xlu0 %798 }
 0x538   : > { %v800_v56 = vsel %vm3781_vm3, %v3059_v57, %v799_v0  ;;  %v959_v10 = vld [vmem:[#allocation3 + $0x88] sm:$0xff]  ;;  %v969_v57 = vld [vmem:[#allocation3 + $0xd8] sm:$0xff] }
 0x539   : > { %802 = vst.msk [vmem:[#allocation3 + $0x90] sm:$0xff] %vm530_vm13, %v800_v56  ;;  %2310 = vmatpush3.bf16.msra.mxu1 %v959_v10 }
 0x53a   : > { %2311 = vmatprep.subr.bf16.mxu1 %v968_v12  ;;  %v1183_v12 = vld [vmem:[%s3819_s2 + $0x50] sm:$0xff] }
 0x53b   : > { %v897_v13 = vpop.permute.xlu0 %896  ;;  %v975_v14 = vld [vmem:[#allocation3 + $0x108] sm:$0xff] }
 0x53c   : > { %899 = vst.msk [vmem:[#allocation3 + $0x110] sm:$0xff] %vm530_vm13, %v897_v13  ;;  %1113 = vmatpush1.bf16.msra.mxu0 %v975_v14  ;;  %v1184_v13 = vld [vmem:[%s3819_s2 + $0x58] sm:$0xff]  ;;  %v1164_v14 = vpop.permute.xlu1 %1163  ;;  %s3849_s2 = smov 12  }
 0x53d   : > { %1114 = vmatprep.subr.bf16.mxu0 %v3151_v9 }
 0x53f   : > { %v810_v15 = vpop.permute.xlu0 %809 }
 0x540   : > { %v811_v16 = vsel %vm209_vm5, %v3068_v59, %v810_v15  ;;  %v960_v17 = vld [vmem:[#allocation3 + $0x90] sm:$0xff] }
 0x541   : > { %813 = vst.msk [vmem:[#allocation3 + $0x98] sm:$0xff] %vm530_vm13, %v811_v16  ;;  %2312 = vmatpush3.bf16.msra.mxu1 %v960_v17 }
 0x542   : > { %2313 = vmatprep.subr.bf16.mxu1 %v969_v57 }
 0x543   : > { %v903_v18 = vpop.permute.xlu0 %902  ;;  %v976_v19 = vld [vmem:[#allocation3 + $0x110] sm:$0xff] }
 0x544   : > { %905 = vst.msk [vmem:[#allocation3 + $0x118] sm:$0xff] %vm530_vm13, %v903_v18  ;;  %1115 = vmatpush1.bf16.msra.mxu0 %v976_v19 }
 0x545   : > { %1116 = vmatprep.subr.bf16.mxu0 %v3151_v9 }
 0x547   : > { %v909_v20 = vpop.permute.xlu0 %908 }
 0x548   : > { %911 = vst.msk [vmem:[#allocation3 + $0x120] sm:$0xff] %vm530_vm13, %v909_v20  ;;  %v961_v21 = vld [vmem:[#allocation3 + $0x98] sm:$0xff] }
 0x549   : > { %2314 = vmatpush3.bf16.msra.mxu1 %v961_v21  ;;  %v2591_v20 = vld [vmem:[%s3703_s1 + $0x1b0] ss:$24 sps:$4 sm:$0xff]  }
 0x54a   : > { %2315 = vmatprep.subr.bf16.mxu1 %v970_v22  ;;  %v2592_v21 = vld [vmem:[%s3703_s1 + $0x210] ss:$24 sps:$4 sm:$0xff]   ;;  %v2593_v22 = vld [vmem:[%s3703_s1 + $0x240] ss:$24 sps:$4 sm:$0xff]  }
 0x54b   : > { %v819_v59 = vpop.permute.xlu0 %818  ;;  %v977_v23 = vld [vmem:[#allocation3 + $0x118] sm:$0xff] }
 0x54c   : > { %821 = vst.msk [vmem:[#allocation3 + $0xa8] sm:$0xff] %vm530_vm13, %v819_v59  ;;  %1117 = vmatpush1.bf16.msra.mxu0 %v977_v23  ;;  %v2594_v59 = vld [vmem:[%s3703_s1 + $0x270] ss:$24 sps:$4 sm:$0xff]   ;;  %v2595_v23 = vld [vmem:[%s3703_s1 + $0x2a0] ss:$24 sps:$4 sm:$0xff]  }
 0x54d   : > { %2316 = vmatpush3.bf16.msra.mxu1 %v962_v24  ;;  %1118 = vmatprep.subr.bf16.mxu0 %v3151_v9  ;;  %v2596_v24 = vld [vmem:[%s3703_s1 + $0x2d0] ss:$24 sps:$4 sm:$0xff]  }
 0x54e   : > { %2317 = vmatprep.subr.bf16.mxu1 %v971_v25  ;;  %v2597_v25 = vld [vmem:[%s3703_s1 + $0x300] ss:$24 sps:$4 sm:$0xff]  }
 0x54f   : > { %v873_v26 = vpop.permute.xlu0 %872  ;;  %v978_v27 = vld [vmem:[#allocation3 + $0x120] sm:$0xff] }
 0x550   : > { %875 = vst.msk [vmem:[#allocation3 + $0xf0] sm:$0xff] %vm530_vm13, %v873_v26  ;;  %1119 = vmatpush1.bf16.msra.mxu0 %v978_v27  ;;  %v2598_v26 = vld [vmem:[%s3703_s1 + $0x330] ss:$24 sps:$4 sm:$0xff]   ;;  %v2599_v27 = vld [vmem:[%s3703_s1 + $0x360] ss:$24 sps:$4 sm:$0xff]  }
 0x551   : > { %1120 = vmatprep.subr.bf16.mxu0 %v3151_v9 }
 0x553   : > { %v921_v28 = vpop.permute.xlu0 %920  ;;  %v963_v29 = vld [vmem:[#allocation3 + $0xa8] sm:$0xff] }
 0x554   : > { %923 = vst.msk [vmem:[#allocation3 + $0x130] sm:$0xff] %vm530_vm13, %v921_v28  ;;  %2318 = vmatpush3.bf16.msra.mxu1 %v963_v29  ;;  %1121 = vmatpush1.bf16.msra.mxu0 %v979_v30 }
 0x555   : > { %1122 = vmatprep.subr.bf16.mxu0 %v3151_v9 }
 0x557   : > { %v831_v31 = vpop.permute.xlu0 %830  ;;  %v972_v32 = vld [vmem:[#allocation3 + $0xf0] sm:$0xff] }
 0x558   : > { %833 = vst.msk [vmem:[#allocation3 + $0xb8] sm:$0xff] %vm530_vm13, %v831_v31  ;;  %2319 = vmatprep.subr.bf16.mxu1 %v972_v32 }
 0x559   : > { %2320 = vmatpush3.bf16.msra.mxu1 %v964_v33 }
 0x55a   : > { %2321 = vmatprep.subr.bf16.mxu1 %v973_v34 }
 0x55b   : > { %v933_v35 = vpop.permute.xlu0 %932  ;;  %v980_v36 = vld [vmem:[#allocation3 + $0x130] sm:$0xff] }
 0x55c   : > { %935 = vst.msk [vmem:[#allocation3 + $0x140] sm:$0xff] %vm530_vm13, %v933_v35  ;;  %1123 = vmatpush1.bf16.msra.mxu0 %v980_v36 }
 0x55d   : > { %1124 = vmatprep.subr.bf16.mxu0 %v3151_v9 }
 0x55f   : > { %v965_v37 = vld [vmem:[#allocation3 + $0xb8] sm:$0xff] }
 0x560   : > { %2322 = vmatpush3.bf16.msra.mxu1 %v965_v37  ;;  %1125 = vmatpush1.bf16.msra.mxu0 %v981_v38 }
 0x561   : > { %1126 = vmatprep.subr.bf16.mxu0 %v3151_v9  ;;  %2440 = vmatprep.subr.bf16.mxu1 %v2681_v11 }
 0x563   : > { %1102 = vmatmul.mubr.bf16.vlgmr.msra.gmra.mrb[8].mxu1 %v2585_v39  ;;  %v982_v40 = vld [vmem:[#allocation3 + $0x140] sm:$0xff] }
 0x564   : > { %1127 = vmatpush1.bf16.msra.mxu0 %v982_v40  ;;  %2446 = vmatprep.mubr.msk.bf16.mxu1 %vm2682_vm11, %v2681_v11 }
 0x567   : > { %1143 = vmatmul.mubr.bf16.vlgmr.msra.gmra.mrb[8].mxu0 %v2590_v41 }
 0x56c   : > { %v993_v61 = vpop.permute.xlu0 %992 }
 0x603   : > { %v2301_v42 = vpop.f32.mrb[4].mxu0 }
 0x604   : > { %v2302_v43 = vpop.f32.mrb[5].mxu0 }
 0x605   : > { %v2303_v44 = vadd.f32 %v2302_v43, %v2301_v42  ;;  %v2304_v45 = vpop.f32.mrb[6].mxu0 }
 0x606   : > { %v2305_v46 = vpop.f32.mrb[7].mxu0 }
 0x607   : > { %v2306_v47 = vadd.f32 %v2305_v46, %v2304_v45  ;;  %v1063_v58 = vadd.f32 %v2303_v44, %v988_v49 }
 0x609   : > { %v1066_v52 = vadd.f32 %v2306_v47, %v993_v61 }
 0x636   : > { %v2323_v48 = vpop.f32.mrb[8].mxu1 }
 0x637   : > { %v2324_v50 = vpop.f32.mrb[9].mxu1 }
 0x638   : > { %v2325_v60 = vadd.f32 %v2324_v50, %v2323_v48  ;;  %v2326_v51 = vpop.f32.mrb[10].mxu1 }
 0x639   : > { %v2327_v62 = vpop.f32.mrb[11].mxu1 }
 0x63a   : > { %v2328_v63 = vadd.f32 %v2327_v62, %v2326_v51  ;;  %v1104_v1 = vadd.f32 %v2325_v60, %v1063_v58  ;;  %v1144_v53 = vpop.f32.mrb[8].mxu0 }
 0x63b   : > { %v1146_v2 = vpop.f32.mrb[9].mxu0 }
 0x63c   : > { %v1145_v54 = vadd.f32 %v1144_v53, %v1104_v1  ;;  %v1107_v3 = vadd.f32 %v2328_v63, %v1066_v52  ;;  %v1147_v55 = vpop.f32.mrb[10].mxu0  ;;  %v3382_v1 = vld [vmem:[%s3703_s1 + $0x1e0] sm:$0xff] }
 0x63d   : > { %v1149_v4 = vpop.f32.mrb[11].mxu0 }
 0x63e   : > { %v1153_v5 = vmul.f32 0.1, %v1145_v54  ;;  %v1148_v6 = vadd.f32 %v1147_v55, %v1107_v3  ;;  %vm1151_vm3 = vcmp.gt.f32.partialorder %v1145_v54, 0.0 }
 0x640   : > { %vm1152_vm4 = vcmp.gt.f32.partialorder %v1148_v6, 0.0  ;;  %v1154_v7 = vmul.f32 0.1, %v1148_v6  ;;  %v1155_v8 = vsel %vm1151_vm3, %v1145_v54, %v1153_v5  ;;  %vm1200_vm3 = vcmask 392192  }
 0x641   : > { %v2253_v54 = vcombine.high %v3382_v1, %v3382_v1 }
 0x642   : > { %v1156_v0 = vsel %vm1152_vm4, %v1148_v6, %v1154_v7  ;;  %vm1246_vm4 = vcmask 519168  }
 0x643   : > { %v1157_v56 = vpack.c.bf16 %v1156_v0, %v1155_v8  ;;  %1929 = vmatprep.mubr.bf16.mxu0 %v2253_v54 }
 0x645   : > { %1158 = vst.msk [vmem:[#allocation2 + $0x8] sm:$0xff] %vm530_vm13, %v1157_v56 }
 0x64c   : > { %v1170_v10 = vld [vmem:[#allocation2 + $0x8] sm:$0xff] }
 0x64d   : > { %1171 = vst.msk [vmem:[#allocation3 + $0x8] sm:$0xff] %vm530_vm13, %v1170_v10  ;;  %1174 = vrot.lane.b32.xlu1 %v1170_v10, %s3826_s5  ;;  %1165 = vrot.lane.b32.xlu0 %v1170_v10, %s3788_s4 }
 0x651   : > { %1187 = vperm.xlu1 %2572, %v1183_v12   ;;  %1192 = vperm.xlu0 %2573, %v1184_v13   ;;  %v3448_v13 = vld [vmem:[%s3703_s1 + $0x1e8] sm:$0xff] }
 0x654   : > { %v1181_v18 = vld [vmem:[#allocation3 + $0x8] sm:$0xff] }
 0x655   : > { %1454 = vrot.lane.b32.xlu1 %v3151_v9, %s3787_s27  ;;  %s3842_s27 = smov 121  }
 0x659   : > { %1366 = vrot.lane.b32.xlu1 %v3151_v9, %s3786_s29  ;;  %s3835_s29 = smov 13  }
 0x65d   : > { %1465 = vrot.lane.b32.xlu1 %v3151_v9, %s3785_s30  ;;  %s3834_s30 = smov 5  }
 0x661   : > { %1377 = vrot.lane.b32.xlu1 %v3151_v9, %s3784_s8  ;;  %s3833_s8 = smov 14  }
 0x665   : > { %1476 = vrot.lane.b32.xlu1 %v3151_v9, %s3783_s9  ;;  %s3832_s9 = smov 6  }
 0x669   : > { %1388 = vrot.lane.b32.xlu1 %v3151_v9, %s3828_s20 }
 0x66d   : > { %1487 = vrot.lane.b32.xlu1 %v3151_v9, %s3829_s7 }
 0x671   : > { %1399 = vrot.lane.b32.xlu1 %v3151_v9, %s3830_s26 }
 0x675   : > { %1498 = vrot.lane.b32.xlu1 %v3151_v9, %s3820_s25 }
 0x679   : > { %1410 = vrot.lane.b32.xlu1 %v3151_v9, %s3821_s11 }
 0x67d   : > { %1509 = vrot.lane.b32.xlu1 %v3151_v9, %s3822_s10 }
 0x681   : > { %1421 = vrot.lane.b32.xlu1 %v3151_v9, %s3831_s28 }
 0x685   : > { %1520 = vrot.lane.b32.xlu1 %v3151_v9, %s3832_s9 }
 0x689   : > { %1432 = vrot.lane.b32.xlu1 %v3151_v9, %s3833_s8 }
 0x68d   : > { %1531 = vrot.lane.b32.xlu1 %v3151_v9, %s3834_s30 }
 0x691   : > { %1443 = vrot.lane.b32.xlu1 %v3151_v9, %s3835_s29 }
 0x695   : > { %1542 = vrot.lane.b32.xlu1 %v3151_v9, %s3823_s24 }
 0x699   : > { %1553 = vrot.lane.b32.xlu1 %v3151_v9, %s3824_s19  ;;  %s3851_s19 = smov 11  }
 0x69d   : > { %1564 = vrot.lane.b32.xlu1 %v3151_v9, %s3825_s17  ;;  %s3850_s17 = smov 20  }
 0x6a1   : > { %1575 = vrot.lane.b32.xlu1 %v3151_v9, %s3788_s4  ;;  %s3841_s4 = smov 114  }
 0x6bf   : > { %v1175_v15 = vpop.permute.xlu1 %1174  ;;  %v1166_v16 = vpop.permute.xlu0 %1165 }
 0x6c0   : > { %1177 = vst.msk [vmem:[#allocation3 + $0x10] sm:$0xff] %vm530_vm13, %v1175_v15  ;;  %v1167_v17 = vsel %vm209_vm5, %v1164_v14, %v1166_v16  ;;  %v2255_v14 = vcombine.high %v3448_v13, %v3448_v13 }
 0x6c1   : > { %1169 = vst.msk [vmem:[#allocation3] sm:$0xff] %vm530_vm13, %v1167_v17  ;;  %vm1253_vm13 = vcmask 1043968  }
 0x6c7   : > { %v1182_v19 = vld [vmem:[#allocation3 + $0x10] sm:$0xff] }
 0x6c8   : > { %v1180_v57 = vld [vmem:[#allocation3] sm:$0xff] }
 0x6c9   : > { %2441 = vmatpush3.bf16.msra.mxu1 %v1180_v57 }
 0x6ca   : > { %2442 = vmatprep.subr.bf16.mxu1 %v2681_v11 }
 0x6cd   : > { %2443 = vmatpush3.bf16.msra.mxu1 %v1181_v18 }
 0x6ce   : > { %2444 = vmatprep.subr.bf16.mxu1 %v2681_v11 }
 0x6d0   : > { %v1188_v28 = vpop.permute.xlu1 %1187  ;;  %v1193_v32 = vpop.permute.xlu0 %1192 }
 0x6d1   : > { %2445 = vmatpush3.bf16.msra.mxu1 %v1182_v19 }
 0x6d2   : > { %2450 = vmatprep.subr.bf16.mxu1 %v2681_v11 }
 0x6d4   : > { %2447 = vmatmul.mubr.msk.bf16.vlgmr.msra.gmra.mrb[12].mxu1 %vm1200_vm3, %v2591_v20  ;;  %v3304_v45 = vpop.permute.xlu1 %1454  ;;  %vm1628_vm3 = vcmask 1014784  }
 0x6d5   : > { %2466 = vmatprep.mubr.msk.bf16.mxu1 %vm2682_vm11, %v2681_v11  ;;  %2451 = vmatpush3.bf16.msra.mxu1 %v2592_v21 }
 0x6d6   : > { %2452 = vmatprep.subr.bf16.mxu1 %v2681_v11 }
 0x6d8   : > { %v3313_v47 = vpop.permute.xlu1 %1366 }
 0x6d9   : > { %2453 = vmatpush3.bf16.msra.mxu1 %v2593_v22 }
 0x6da   : > { %2454 = vmatprep.subr.bf16.mxu1 %v2681_v11 }
 0x6dc   : > { %v3319_v48 = vpop.permute.xlu1 %1465 }
 0x6dd   : > { %2455 = vmatpush3.bf16.msra.mxu1 %v2594_v59 }
 0x6de   : > { %2456 = vmatprep.subr.bf16.mxu1 %v2681_v11 }
 0x6e0   : > { %v3329_v49 = vpop.permute.xlu1 %1377 }
 0x6e1   : > { %2457 = vmatpush3.bf16.msra.mxu1 %v2595_v23 }
 0x6e2   : > { %2458 = vmatprep.subr.bf16.mxu1 %v2681_v11 }
 0x6e4   : > { %v3335_v50 = vpop.permute.xlu1 %1476 }
 0x6e5   : > { %2459 = vmatpush3.bf16.msra.mxu1 %v2596_v24 }
 0x6e6   : > { %2460 = vmatprep.subr.bf16.mxu1 %v2681_v11 }
 0x6e8   : > { %v3345_v58 = vpop.permute.xlu1 %1388 }
 0x6e9   : > { %2461 = vmatpush3.bf16.msra.mxu1 %v2597_v25 }
 0x6ea   : > { %2462 = vmatprep.subr.bf16.mxu1 %v2681_v11 }
 0x6ec   : > { %v3351_v60 = vpop.permute.xlu1 %1487 }
 0x6ed   : > { %2463 = vmatpush3.bf16.msra.mxu1 %v2598_v26 }
 0x6ee   : > { %2464 = vmatprep.subr.bf16.mxu1 %v2681_v11 }
 0x6f0   : > { %v3363_v61 = vpop.permute.xlu1 %1399 }
 0x6f1   : > { %2465 = vmatpush3.bf16.msra.mxu1 %v2599_v27 }
 0x6f4   : > { %v3371_v52 = vpop.permute.xlu1 %1498 }
 0x6f8   : > { %v3388_v53 = vpop.permute.xlu1 %1410 }
 0x6fc   : > { %v3398_v3 = vpop.permute.xlu1 %1509 }
 0x700   : > { %v3410_v4 = vpop.permute.xlu1 %1421 }
 0x704   : > { %v3418_v6 = vpop.permute.xlu1 %1520 }
 0x708   : > { %v3430_v8 = vpop.permute.xlu1 %1432 }
 0x70c   : > { %v3441_v10 = vpop.permute.xlu1 %1531 }
 0x710   : > { %v3456_v15 = vpop.permute.xlu1 %1443 }
 0x714   : > { %v3462_v17 = vpop.permute.xlu1 %1542 }
 0x718   : > { %v3470_v18 = vpop.permute.xlu1 %1553 }
 0x71c   : > { %v3476_v20 = vpop.permute.xlu1 %1564 }
 0x720   : > { %v3482_v22 = vpop.permute.xlu1 %1575 }
 0x7a7   : > { %v1238_v29 = vpop.f32.mrb[12].mxu1 }
 0x7a8   : > { %v1239_v30 = vadd.f32 %v1238_v29, %v1188_v28  ;;  %v2448_v31 = vpop.f32.mrb[13].mxu1 }
 0x7a9   : > { %v1241_v33 = vpop.f32.mrb[14].mxu1 }
 0x7aa   : > { %v1245_v34 = vpack.c.bf16 %v1239_v30, %v1239_v30  ;;  %v1242_v35 = vadd.f32 %v1241_v33, %v1193_v32  ;;  %v2449_v36 = vpop.f32.mrb[15].mxu1 }
 0x7ac   : > { %v1248_v37 = vpack.c.bf16 %v1242_v35, %v1242_v35  ;;  %1247 = vst.msk [vmem:[#allocation3] sm:$0xf] %vm1246_vm4, %v1245_v34  ;;  %vm1724_vm4 = vcmask 949248  }
 0x7ae   : > { %1250 = vrot.lane.b32.xlu0 %v1248_v37, %s2718_s0  ;;  %s3843_s0 = smov 113  }
 0x7b2   : > { %1626 = vrot.lane.b32.xlu0 %v3151_v9, %s3836_s14 }
 0x7b6   : > { %1722 = vrot.lane.b32.xlu0 %v3151_v9, %s3837_s18 }
 0x7ba   : > { %1638 = vrot.lane.b32.xlu0 %v3151_v9, %s3838_s21 }
 0x7be   : > { %1734 = vrot.lane.b32.xlu0 %v3151_v9, %s3839_s12 }
 0x7c2   : > { %1650 = vrot.lane.b32.xlu0 %v3151_v9, %s3840_s23 }
 0x7c6   : > { %1746 = vrot.lane.b32.xlu0 %v3151_v9, %s3841_s4 }
 0x7ca   : > { %1662 = vrot.lane.b32.xlu0 %v3151_v9, %s3842_s27 }
 0x7ce   : > { %1758 = vrot.lane.b32.xlu0 %v3151_v9, %s3843_s0 }
 0x7d2   : > { %1674 = vrot.lane.b32.xlu0 %v3151_v9, %s3844_s15 }
 0x7d6   : > { %1770 = vrot.lane.b32.xlu0 %v3151_v9, %s3845_s3 }
 0x7da   : > { %1686 = vrot.lane.b32.xlu0 %v3151_v9, %s3846_s22 }
 0x7de   : > { %1590 = vrot.lane.b32.xlu0 %v3151_v9, %s3826_s5 }
 0x7e2   : > { %1782 = vrot.lane.b32.xlu0 %v3151_v9, %s3847_s16 }
 0x7e6   : > { %1698 = vrot.lane.b32.xlu0 %v3151_v9, %s3848_s13 }
 0x820   : > { %v1251_v38 = vpop.permute.xlu0 %1250 }
 0x821   : > { %1254 = vst.msk [vmem:[#allocation3] sm:$0xf] %vm1253_vm13, %v1251_v38  ;;  %vm1640_vm13 = vcmask 1006592  }
 0x824   : > { %v3353_v51 = vpop.permute.xlu0 %1626 }
 0x828   : > { %v1255_v39 = vld [vmem:[#allocation3] sm:$0xf]  ;;  %v3365_v62 = vpop.permute.xlu0 %1722 }
 0x829   : > { %2467 = vmatmul.mubr.bf16.vlgmr.msra.gmra.mrb[16].mxu1 %v1255_v39 }
 0x82a   : > { %1969 = vmatprep.mubr.bf16.mxu1 %v2255_v14 }
 0x82c   : > { %v3373_v63 = vpop.permute.xlu0 %1638 }
 0x830   : > { %v3390_v2 = vpop.permute.xlu0 %1734 }
 0x834   : > { %v3400_v55 = vpop.permute.xlu0 %1650 }
 0x838   : > { %v3412_v5 = vpop.permute.xlu0 %1746 }
 0x83c   : > { %v3420_v7 = vpop.permute.xlu0 %1662 }
 0x840   : > { %v3432_v0 = vpop.permute.xlu0 %1758 }
 0x844   : > { %v3443_v12 = vpop.permute.xlu0 %1674 }
 0x848   : > { %v3458_v16 = vpop.permute.xlu0 %1770 }
 0x84c   : > { %v3464_v57 = vpop.permute.xlu0 %1686 }
 0x850   : > { %v3472_v19 = vpop.permute.xlu0 %1590 }
 0x854   : > { %v3478_v21 = vpop.permute.xlu0 %1782 }
 0x858   : > { %v3484_v59 = vpop.permute.xlu0 %1698 }
 0x8fc   : > { %v1354_v40 = vpop.f32.mrb[16].mxu1 }
 0x8fd   : > { %v1360_v41 = vpack.c.bf16 %v1354_v40, %v1354_v40  ;;  %v2468_v42 = vpop.f32.mrb[17].mxu1 }
 0x8fe   : > { %v1357_v43 = vpop.f32.mrb[18].mxu1 }
 0x8ff   : > { %1361 = vst [vmem:[#allocation2 + $0x8] sm:$0xf] %v1360_v41  ;;  %v2469_v44 = vpop.f32.mrb[19].mxu1 }
 0x906   : > { %v3306_v46 = vld [vmem:[#allocation2 + $0x8] sm:$0xff] }
 0x907   : > { %1583 = vst [vmem:[#allocation3 + $0xa0] sm:$0xff] %v3306_v46  ;;  %1624 = vrot.lane.b32.xlu1 %v3306_v46, %s3836_s14  ;;  %1456 = vrot.lane.b32.xlu0 %v3306_v46, %s3849_s2  ;;  %s3852_s2 = smov 19  }
 0x90b   : > { %1720 = vrot.lane.b32.xlu1 %v3306_v46, %s3837_s18  ;;  %1368 = vrot.lane.b32.xlu0 %v3306_v46, %s3850_s17  ;;  %s3853_s17 = smov 10  }
 0x90f   : > { %1636 = vrot.lane.b32.xlu1 %v3306_v46, %s3838_s21  ;;  %1467 = vrot.lane.b32.xlu0 %v3306_v46, %s3851_s19 }
 0x913   : > { %1732 = vrot.lane.b32.xlu1 %v3306_v46, %s3839_s12  ;;  %1379 = vrot.lane.b32.xlu0 %v3306_v46, %s3852_s2 }
 0x917   : > { %1648 = vrot.lane.b32.xlu1 %v3306_v46, %s3840_s23  ;;  %1478 = vrot.lane.b32.xlu0 %v3306_v46, %s3853_s17 }
 0x91b   : > { %1744 = vrot.lane.b32.xlu1 %v3306_v46, %s3841_s4  ;;  %1390 = vrot.lane.b32.xlu0 %v3306_v46, %s3828_s20 }
 0x91f   : > { %1660 = vrot.lane.b32.xlu1 %v3306_v46, %s3842_s27  ;;  %1489 = vrot.lane.b32.xlu0 %v3306_v46, %s3829_s7 }
 0x923   : > { %1756 = vrot.lane.b32.xlu1 %v3306_v46, %s3843_s0  ;;  %1401 = vrot.lane.b32.xlu0 %v3306_v46, %s3830_s26 }
 0x927   : > { %1672 = vrot.lane.b32.xlu1 %v3306_v46, %s3844_s15  ;;  %1500 = vrot.lane.b32.xlu0 %v3306_v46, %s3820_s25  ;;  %s3857_s25 = smov 3  }
 0x92b   : > { %1768 = vrot.lane.b32.xlu1 %v3306_v46, %s3845_s3  ;;  %1412 = vrot.lane.b32.xlu0 %v3306_v46, %s3821_s11  ;;  %s3862_s11 = sld [smem:[#allocation17_spill]]  ;;  %s3878_s3 = sld [smem:[#allocation18_spill]] }
 0x92f   : > { %1684 = vrot.lane.b32.xlu1 %v3306_v46, %s3846_s22  ;;  %1511 = vrot.lane.b32.xlu0 %v3306_v46, %s3822_s10  ;;  %s3855_s22 = smov 110  }
 0x931   : > { %v1868_v56 = vld [vmem:[%s3862_s11 + $0x60] sm:$0xff] }
 0x933   : > { %1588 = vrot.lane.b32.xlu1 %v3306_v46, %s3826_s5  ;;  %1423 = vrot.lane.b32.xlu0 %v3306_v46, %s3831_s28 }
 0x937   : > { %1780 = vrot.lane.b32.xlu1 %v3306_v46, %s3847_s16  ;;  %1522 = vrot.lane.b32.xlu0 %v3306_v46, %s3832_s9  ;;  %s3854_s16 = smov 126  }
 0x93b   : > { %1696 = vrot.lane.b32.xlu1 %v3306_v46, %s3848_s13  ;;  %1434 = vrot.lane.b32.xlu0 %v3306_v46, %s3833_s8  ;;  %s3856_s13 = smov 117   ;;  %s3861_s8 = smov 1  }
 0x93f   : > { %1600 = vrot.lane.b32.xlu1 %v3306_v46, %s3854_s16  ;;  %1533 = vrot.lane.b32.xlu0 %v3306_v46, %s3834_s30  ;;  %s3859_s30 = smov 2  }
 0x943   : > { %1792 = vrot.lane.b32.xlu1 %v3306_v46, %s3855_s22  ;;  %1445 = vrot.lane.b32.xlu0 %v3306_v46, %s3835_s29  ;;  %s3858_s29 = smov 109  }
 0x947   : > { %1708 = vrot.lane.b32.xlu1 %v3306_v46, %s3856_s13  ;;  %1544 = vrot.lane.b32.xlu0 %v3306_v46, %s3823_s24  ;;  %s3860_s24 = smov 108  }
 0x94b   : > { %1612 = vrot.lane.b32.xlu1 %v3306_v46, %s3827_s6  ;;  %1555 = vrot.lane.b32.xlu0 %v3306_v46, %s3857_s25 }
 0x94f   : > { %1804 = vrot.lane.b32.xlu1 %v3306_v46, %s3858_s29  ;;  %1566 = vrot.lane.b32.xlu0 %v3306_v46, %s3859_s30 }
 0x953   : > { %1816 = vrot.lane.b32.xlu1 %v3306_v46, %s3860_s24  ;;  %1577 = vrot.lane.b32.xlu0 %v3306_v46, %s3861_s8 }
 0x957   : > { %1871 = vperm.xlu1 %2572, %v1868_v56   ;;  %1602 = vrot.lane.b32.xlu0 %v3151_v9, %s3854_s16 }
 0x95b   : > { %1794 = vrot.lane.b32.xlu0 %v3151_v9, %s3855_s22 }
 0x95f   : > { %1710 = vrot.lane.b32.xlu0 %v3151_v9, %s3856_s13  ;;  %s2719_s13 = smov [#allocation4]  }
 0x963   : > { %1614 = vrot.lane.b32.xlu0 %v3151_v9, %s3827_s6 }
 0x967   : > { %1806 = vrot.lane.b32.xlu0 %v3151_v9, %s3858_s29 }
 0x96b   : > { %1818 = vrot.lane.b32.xlu0 %v3151_v9, %s3860_s24 }
 0x96f   : > { %2026 = vrot.lane.b32.xlu0 %v3151_v9, %s3857_s25 }
 0x973   : > { %2037 = vrot.lane.b32.xlu0 %v3151_v9, %s3859_s30 }
 0x977   : > { %2048 = vrot.lane.b32.xlu0 %v3151_v9, %s3861_s8 }
 0x979   : > { %v1625_v23 = vpop.permute.xlu1 %1624  ;;  %v1457_v24 = vpop.permute.xlu0 %1456 }
 0x97a   : > { %v1629_v25 = vsel %vm1628_vm3, %v1625_v23, %v3353_v51  ;;  %v1458_v26 = vsel %vm681_vm14, %v3304_v45, %v1457_v24  ;;  %vm1736_vm14 = vcmask 941056   ;;  %vm1676_vm3 = vcmask 982016  }
 0x97b   : > { %1631 = vst [vmem:[#allocation3 + $0xc0] sm:$0xff] %v1629_v25  ;;  %1460 = vst [vmem:[#allocation3 + $0x40] sm:$0xff] %v1458_v26  ;;  %2342 = vmatprep.subr.bf16.mxu0 %v1458_v26  ;;  %2364 = vmatprep.subr.bf16.mxu1 %v1629_v25 }
 0x97d   : > { %v1721_v27 = vpop.permute.xlu1 %1720  ;;  %v1369_v28 = vpop.permute.xlu0 %1368 }
 0x97e   : > { %v3494_v29 = vsel %vm1724_vm4, %v1721_v27, %v3365_v62  ;;  %v1370_v30 = vsel %vm585_vm15, %v3313_v47, %v1369_v28  ;;  %vm1652_vm15 = vcmask 998400   ;;  %vm3865_vm4 = vcmask 916480  }
 0x97f   : > { %1727 = vst [vmem:[#allocation3 + $0x100] sm:$0xff] %v3494_v29  ;;  %2343 = vmatpush3.bf16.msra.mxu0 %v1370_v30 }
 0x981   : > { %v1637_v31 = vpop.permute.xlu1 %1636  ;;  %v1468_v32 = vpop.permute.xlu0 %1467 }
 0x982   : > { %v3500_v33 = vsel %vm1640_vm13, %v1637_v31, %v3373_v63  ;;  %v1469_v34 = vsel %vm693_vm0, %v3319_v48, %v1468_v32  ;;  %vm1748_vm0 = vcmask 932864   ;;  %vm1688_vm13 = vcmask 973824  }
 0x983   : > { %1643 = vst [vmem:[#allocation3 + $0xc8] sm:$0xff] %v3500_v33  ;;  %1471 = vst [vmem:[#allocation3 + $0x48] sm:$0xff] %v1469_v34  ;;  %2344 = vmatprep.subr.bf16.mxu0 %v1469_v34 }
 0x985   : > { %v1733_v35 = vpop.permute.xlu1 %1732  ;;  %v1380_v36 = vpop.permute.xlu0 %1379 }
 0x986   : > { %v3506_v37 = vsel %vm1736_vm14, %v1733_v35, %v3390_v2  ;;  %v1381_v38 = vsel %vm597_vm1, %v3329_v49, %v1380_v36  ;;  %vm1664_vm1 = vcmask 990208   ;;  %vm3866_vm14 = vcmask 56320  }
 0x987   : > { %1739 = vst [vmem:[#allocation3 + $0x108] sm:$0xff] %v3506_v37  ;;  %2345 = vmatpush3.bf16.msra.mxu0 %v1381_v38 }
 0x989   : > { %v1649_v39 = vpop.permute.xlu1 %1648  ;;  %v1479_v40 = vpop.permute.xlu0 %1478 }
 0x98a   : > { %v3512_v41 = vsel %vm1652_vm15, %v1649_v39, %v3400_v55  ;;  %v1480_v42 = vsel %vm705_vm6, %v3335_v50, %v1479_v40  ;;  %vm1760_vm6 = vcmask 924672   ;;  %vm1592_vm15 = vcmask 1039360  }
 0x98b   : > { %1655 = vst [vmem:[#allocation3 + $0xd0] sm:$0xff] %v3512_v41  ;;  %1482 = vst [vmem:[#allocation3 + $0x50] sm:$0xff] %v1480_v42  ;;  %2346 = vmatprep.subr.bf16.mxu0 %v1480_v42 }
 0x98d   : > { %v1745_v43 = vpop.permute.xlu1 %1744  ;;  %v1391_v44 = vpop.permute.xlu0 %1390 }
 0x98e   : > { %v3518_v45 = vsel %vm1748_vm0, %v1745_v43, %v3412_v5  ;;  %v1392_v47 = vsel %vm609_vm7, %v3345_v58, %v1391_v44  ;;  %vm3863_vm7 = vcmask 138240   ;;  %vm3867_vm0 = vcmask 121856  }
 0x98f   : > { %1751 = vst [vmem:[#allocation3 + $0x110] sm:$0xff] %v3518_v45  ;;  %2347 = vmatpush3.bf16.msra.mxu0 %v1392_v47 }
 0x991   : > { %v1661_v48 = vpop.permute.xlu1 %1660  ;;  %v1490_v49 = vpop.permute.xlu0 %1489 }
 0x992   : > { %v3524_v50 = vsel %vm1664_vm1, %v1661_v48, %v3420_v7  ;;  %v1491_v51 = vsel %vm717_vm8, %v3351_v60, %v1490_v49  ;;  %vm3864_vm8 = vcmask 64512   ;;  %vm1784_vm1 = vcmask 908288  }
 0x993   : > { %1667 = vst [vmem:[#allocation3 + $0xd8] sm:$0xff] %v3524_v50  ;;  %1493 = vst [vmem:[#allocation3 + $0x58] sm:$0xff] %v1491_v51  ;;  %2348 = vmatprep.subr.bf16.mxu0 %v1491_v51 }
 0x995   : > { %v1757_v62 = vpop.permute.xlu1 %1756  ;;  %v1402_v63 = vpop.permute.xlu0 %1401 }
 0x996   : > { %v3530_v58 = vsel %vm1760_vm6, %v1757_v62, %v3432_v0  ;;  %v1403_v2 = vsel %vm3863_vm7, %v3363_v61, %v1402_v63  ;;  %vm3868_vm6 = vcmask 48128   ;;  %vm1700_vm7 = vcmask 965632  }
 0x997   : > { %1763 = vst [vmem:[#allocation3 + $0x118] sm:$0xff] %v3530_v58  ;;  %2349 = vmatpush3.bf16.msra.mxu0 %v1403_v2 }
 0x999   : > { %v1673_v54 = vpop.permute.xlu1 %1672  ;;  %v1501_v55 = vpop.permute.xlu0 %1500 }
 0x99a   : > { %v3536_v60 = vsel %vm1676_vm3, %v1673_v54, %v3443_v12  ;;  %v1502_v5 = vsel %vm3864_vm8, %v3371_v52, %v1501_v55  ;;  %vm3869_vm3 = vcmask 113664   ;;  %vm1712_vm8 = vcmask 957440  }
 0x99b   : > { %1679 = vst [vmem:[#allocation3 + $0xe0] sm:$0xff] %v3536_v60  ;;  %1504 = vst [vmem:[#allocation3 + $0x60] sm:$0xff] %v1502_v5  ;;  %2350 = vmatprep.subr.bf16.mxu0 %v1502_v5 }
 0x99d   : > { %v1769_v7 = vpop.permute.xlu1 %1768  ;;  %v1413_v0 = vpop.permute.xlu0 %1412 }
 0x99e   : > { %v3543_v61 = vsel %vm3865_vm4, %v1769_v7, %v3458_v16  ;;  %v1414_v56 = vsel %vm633_vm12, %v3388_v53, %v1413_v0  ;;  %vm1616_vm4 = vcmask 1022976  }
 0x99f   : > { %1775 = vst [vmem:[#allocation3 + $0x120] sm:$0xff] %v3543_v61  ;;  %2351 = vmatpush3.bf16.msra.mxu0 %v1414_v56 }
 0x9a1   : > { %v1685_v12 = vpop.permute.xlu1 %1684  ;;  %v1512_v14 = vpop.permute.xlu0 %1511 }
 0x9a2   : > { %v3549_v52 = vsel %vm1688_vm13, %v1685_v12, %v3464_v57  ;;  %v1513_v23 = vsel %vm3866_vm14, %v3398_v3, %v1512_v14  ;;  %vm1808_vm13 = vcmask 891904   ;;  %vm1820_vm14 = vcmask 883712  }
 0x9a3   : > { %1691 = vst [vmem:[#allocation3 + $0xe8] sm:$0xff] %v3549_v52  ;;  %1515 = vst [vmem:[#allocation3 + $0x68] sm:$0xff] %v1513_v23  ;;  %2352 = vmatprep.subr.bf16.mxu0 %v1513_v23 }
 0x9a5   : > { %v1589_v16 = vpop.permute.xlu1 %1588  ;;  %v1424_v24 = vpop.permute.xlu0 %1423 }
 0x9a6   : > { %v3556_v53 = vsel %vm1592_vm15, %v1589_v16, %v3472_v19  ;;  %v1425_v25 = vsel %vm3867_vm0, %v3410_v4, %v1424_v24 }
 0x9a7   : > { %1595 = vst [vmem:[#allocation3 + $0xa8] sm:$0xff] %v3556_v53  ;;  %2353 = vmatpush3.bf16.msra.mxu0 %v1425_v25 }
 0x9a9   : > { %v1781_v57 = vpop.permute.xlu1 %1780  ;;  %v1523_v3 = vpop.permute.xlu0 %1522 }
 0x9aa   : > { %v3562_v26 = vsel %vm1784_vm1, %v1781_v57, %v3478_v21  ;;  %v1524_v27 = vsel %vm3868_vm6, %v3418_v6, %v1523_v3 }
 0x9ab   : > { %1787 = vst [vmem:[#allocation3 + $0x128] sm:$0xff] %v3562_v26  ;;  %1526 = vst [vmem:[#allocation3 + $0x70] sm:$0xff] %v1524_v27  ;;  %2354 = vmatprep.subr.bf16.mxu0 %v1524_v27  ;;  %v2609_v27 = vld [vmem:[#allocation2] sm:$0xff] }
 0x9ad   : > { %v1697_v19 = vpop.permute.xlu1 %1696  ;;  %v1435_v28 = vpop.permute.xlu0 %1434 }
 0x9ae   : > { %v3568_v4 = vsel %vm1700_vm7, %v1697_v19, %v3484_v59  ;;  %v1436_v30 = vsel %vm3869_vm3, %v3430_v8, %v1435_v28  ;;  %v2252_v59 = vcombine.low %v3382_v1, %v3382_v1  ;;  %v3582_v8 = vld [vmem:[%s3703_s1 + $0x1f0] sm:$0xff] }
 0x9af   : > { %1703 = vst [vmem:[#allocation3 + $0xf0] sm:$0xff] %v3568_v4  ;;  %2355 = vmatpush3.bf16.msra.mxu0 %v1436_v30  ;;  %v2256_v62 = vcombine.low %v3582_v8, %v3582_v8 }
 0x9b1   : > { %v1534_v21 = vpop.permute.xlu0 %1533  ;;  %v1601_v36 = vpop.permute.xlu1 %1600 }
 0x9b2   : > { %v1535_v6 = vsel %vm765_vm10, %v3441_v10, %v1534_v21  ;;  %v2257_v10 = vcombine.high %v3582_v8, %v3582_v8  ;;  %vm1604_vm10 = vcmask 1031168  }
 0x9b3   : > { %1537 = vst [vmem:[#allocation3 + $0x78] sm:$0xff] %v1535_v6  ;;  %2356 = vmatprep.subr.bf16.mxu0 %v1535_v6 }
 0x9b5   : > { %v1446_v31 = vpop.permute.xlu0 %1445 }
 0x9b6   : > { %v1447_v32 = vsel %vm669_vm9, %v3456_v15, %v1446_v31  ;;  %vm3870_vm9 = vcmask 23552  }
 0x9b7   : > { %1449 = vst [vmem:[#allocation3 + $0x38] sm:$0xff] %v1447_v32  ;;  %2357 = vmatpush3.bf16.msra.mxu0 %v1447_v32  ;;  %vm3872_vm0 = vmmov %vm3870_vm9 }
 0x9b8   : > { %1977 = vmatprep.subr.bf16.mxu0 %v3151_v9 }
 0x9b9   : > { %v1545_v34 = vpop.permute.xlu0 %1544 }
 0x9ba   : > { %v1546_v35 = vsel %vm777_vm2, %v3462_v17, %v1545_v34  ;;  %1930 = vmatmul.mubr.bf16.vlgmr.msra.gmra.mrb[12].mxu0 %v2252_v59  ;;  %vm3871_vm2 = vcmask 15360  }
 0x9bb   : > { %1548 = vst [vmem:[#allocation3 + $0x80] sm:$0xff] %v1546_v35  ;;  %2365 = vmatpush3.bf16.msra.mxu1 %v1546_v35  ;;  %1978 = vmatpush1.bf16.msra.mxu0 %v3494_v29  ;;  %vm3873_vm1 = vmmov %vm3871_vm2 }
 0x9bc   : > { %2366 = vmatprep.subr.bf16.mxu1 %v3500_v33  ;;  %1979 = vmatprep.subr.bf16.mxu0 %v3151_v9 }
 0x9bd   : > { %v1556_v1 = vpop.permute.xlu0 %1555  ;;  %2258 = vmatprep.mubr.msk.bf16.mxu0 %vm633_vm12, %v2257_v10  ;;  %vm1796_vm12 = vcmask 900096  }
 0x9be   : > { %v1557_v15 = vsel %vm3870_vm9, %v3470_v18, %v1556_v1  ;;  %v1793_v18 = vpop.permute.xlu1 %1792 }
 0x9bf   : > { %1559 = vst [vmem:[#allocation3 + $0x88] sm:$0xff] %v1557_v15  ;;  %2367 = vmatpush3.bf16.msra.mxu1 %v1557_v15  ;;  %1980 = vmatpush1.bf16.msra.mxu0 %v3506_v37 }
 0x9c0   : > { %2368 = vmatprep.subr.bf16.mxu1 %v3512_v41  ;;  %1981 = vmatprep.subr.bf16.mxu0 %v3151_v9 }
 0x9c1   : > { %v1567_v17 = vpop.permute.xlu0 %1566 }
 0x9c2   : > { %v1568_v29 = vsel %vm3871_vm2, %v3476_v20, %v1567_v17  ;;  %v1709_v39 = vpop.permute.xlu1 %1708 }
 0x9c3   : > { %1570 = vst [vmem:[#allocation3 + $0x90] sm:$0xff] %v1568_v29  ;;  %2369 = vmatpush3.bf16.msra.mxu1 %v1568_v29  ;;  %1982 = vmatpush1.bf16.msra.mxu0 %v3518_v45  ;;  %v2254_v45 = vcombine.low %v3448_v13, %v3448_v13 }
 0x9c4   : > { %2370 = vmatprep.subr.bf16.mxu1 %v3524_v50  ;;  %1983 = vmatprep.subr.bf16.mxu0 %v3151_v9 }
 0x9c5   : > { %v1578_v33 = vpop.permute.xlu0 %1577 }
 0x9c6   : > { %v1579_v37 = vsel %vm209_vm5, %v3482_v22, %v1578_v33  ;;  %v1613_v41 = vpop.permute.xlu1 %1612 }
 0x9c7   : > { %1581 = vst [vmem:[#allocation3 + $0x98] sm:$0xff] %v1579_v37  ;;  %2371 = vmatpush3.bf16.msra.mxu1 %v1579_v37  ;;  %1984 = vmatpush1.bf16.msra.mxu0 %v3530_v58 }
 0x9c8   : > { %2372 = vmatprep.subr.bf16.mxu1 %v3536_v60  ;;  %1985 = vmatprep.subr.bf16.mxu0 %v3151_v9 }
 0x9c9   : > { %v1603_v20 = vpop.permute.xlu0 %1602 }
 0x9ca   : > { %v1605_v38 = vsel %vm1604_vm10, %v1601_v36, %v1603_v20  ;;  %v1805_v47 = vpop.permute.xlu1 %1804 }
 0x9cb   : > { %1607 = vst [vmem:[#allocation3 + $0xb0] sm:$0xff] %v1605_v38  ;;  %2373 = vmatpush3.bf16.msra.mxu1 %v3306_v46  ;;  %1986 = vmatpush1.bf16.msra.mxu0 %v3543_v61 }
 0x9cc   : > { %2374 = vmatprep.subr.bf16.mxu1 %v3549_v52  ;;  %1987 = vmatprep.subr.bf16.mxu0 %v3151_v9 }
 0x9cd   : > { %v1795_v22 = vpop.permute.xlu0 %1794 }
 0x9ce   : > { %v1797_v40 = vsel %vm1796_vm12, %v1793_v18, %v1795_v22  ;;  %v1817_v50 = vpop.permute.xlu1 %1816  ;;  %v2090_v18 = vld [vmem:[%s3703_s1 + $0x390] sm:$0x1] }
 0x9cf   : > { %1799 = vst [vmem:[#allocation3 + $0x130] sm:$0xff] %v1797_v40  ;;  %2375 = vmatpush3.bf16.msra.mxu1 %v3556_v53  ;;  %1988 = vmatpush1.bf16.msra.mxu0 %v3562_v26  ;;  %v2098_v26 = vld [vmem:[%s3862_s11 + $0x68] sm:$0x1] }
 0x9d0   : > { %2376 = vmatprep.subr.bf16.mxu1 %v3568_v4  ;;  %1989 = vmatprep.subr.bf16.mxu0 %v3151_v9 }
 0x9d1   : > { %v1711_v46 = vpop.permute.xlu0 %1710 }
 0x9d2   : > { %v1713_v42 = vsel %vm1712_vm8, %v1709_v39, %v1711_v46 }
 0x9d3   : > { %1715 = vst [vmem:[#allocation3 + $0xf8] sm:$0xff] %v1713_v42  ;;  %2377 = vmatpush3.bf16.msra.mxu1 %v1605_v38  ;;  %1990 = vmatpush1.bf16.msra.mxu0 %v1797_v40 }
 0x9d4   : > { %2378 = vmatprep.subr.bf16.mxu1 %v1713_v42  ;;  %1991 = vmatprep.subr.bf16.mxu0 %v3151_v9 }
 0x9d5   : > { %v1615_v43 = vpop.permute.xlu0 %1614 }
 0x9d6   : > { %v1617_v44 = vsel %vm1616_vm4, %v1613_v41, %v1615_v43  ;;  %v1872_v5 = vpop.permute.xlu1 %1871 }
 0x9d7   : > { %1619 = vst [vmem:[#allocation3 + $0xb8] sm:$0xff] %v1617_v44  ;;  %2379 = vmatpush3.bf16.msra.mxu1 %v1617_v44 }
 0x9d8   : > { %2470 = vmatprep.subr.bf16.mxu1 %v2681_v11 }
 0x9d9   : > { %v1807_v48 = vpop.permute.xlu0 %1806 }
 0x9da   : > { %v1809_v49 = vsel %vm1808_vm13, %v1805_v47, %v1807_v48  ;;  %1970 = vmatmul.mubr.bf16.vlgmr.msra.gmra.mrb[20].mxu1 %v2254_v45 }
 0x9db   : > { %1811 = vst [vmem:[#allocation3 + $0x138] sm:$0xff] %v1809_v49  ;;  %1992 = vmatpush1.bf16.msra.mxu0 %v1809_v49  ;;  %2484 = vmatprep.mubr.msk.bf16.mxu1 %vm2682_vm11, %v2681_v11 }
 0x9dc   : > { %1993 = vmatprep.subr.bf16.mxu0 %v3151_v9 }
 0x9dd   : > { %v1819_v51 = vpop.permute.xlu0 %1818 }
 0x9de   : > { %v1821_v13 = vsel %vm1820_vm14, %v1817_v50, %v1819_v51 }
 0x9df   : > { %1823 = vst [vmem:[#allocation3 + $0x140] sm:$0xff] %v1821_v13  ;;  %1994 = vmatpush1.bf16.msra.mxu0 %v1821_v13 }
 0x9e1   : > { %v2027_v19 = vpop.permute.xlu0 %2026 }
 0x9e2   : > { %2010 = vmatmul.mubr.bf16.vlgmr.msra.gmra.mrb[16].mxu0 %v2256_v62 }
 0x9e5   : > { %v2038_v28 = vpop.permute.xlu0 %2037 }
 0x9e9   : > { %v2049_v21 = vpop.permute.xlu0 %2048 }
 0xa8d   : > { %v2358_v63 = vpop.f32.mrb[12].mxu0 }
 0xa8e   : > { %v2359_v58 = vpop.f32.mrb[13].mxu0 }
 0xa8f   : > { %v2360_v2 = vadd.f32 %v2359_v58, %v2358_v63  ;;  %v2361_v54 = vpop.f32.mrb[14].mxu0 }
 0xa90   : > { %v2362_v55 = vpop.f32.mrb[15].mxu0 }
 0xa91   : > { %v1932_v0 = vadd.f32 %v2360_v2, %v1872_v5 }
 0xaad   : > { %v2380_v60 = vpop.f32.mrb[20].mxu1 }
 0xaae   : > { %v2381_v7 = vpop.f32.mrb[21].mxu1 }
 0xaaf   : > { %v2382_v61 = vadd.f32 %v2381_v7, %v2380_v60  ;;  %v2383_v9 = vpop.f32.mrb[22].mxu1 }
 0xab0   : > { %v2384_v56 = vpop.f32.mrb[23].mxu1 }
 0xab1   : > { %v1972_v12 = vadd.f32 %v2382_v61, %v1932_v0 }
 0xab5   : > { %v2011_v14 = vpop.f32.mrb[16].mxu0 }
 0xab6   : > { %v2012_v52 = vadd.f32 %v2011_v14, %v1972_v12  ;;  %v2013_v23 = vpop.f32.mrb[17].mxu0 }
 0xab7   : > { %v2014_v16 = vpop.f32.mrb[18].mxu0 }
 0xab8   : > { %vm2017_vm11 = vcmp.gt.f32.partialorder %v2012_v52, 0.0  ;;  %v2018_v24 = vmul.f32 0.01, %v2012_v52  ;;  %v2015_v53 = vpop.f32.mrb[19].mxu0 }
 0xaba   : > { %v2019_v25 = vsel %vm2017_vm11, %v2012_v52, %v2018_v24 }
 0xabb   : > { %v2020_v57 = vpack.c.bf16 %v2019_v25, %v2019_v25 }
 0xabd   : > { %2021 = vst [vmem:[#allocation2 + $0x8] sm:$0xf] %v2020_v57 }
 0xac4   : > { %v2057_v3 = vld [vmem:[#allocation2 + $0x8] sm:$0xff] }
 0xac5   : > { %2061 = vrot.lane.b32.xlu0 %v2057_v3, %s3826_s5  ;;  %2028 = vrot.lane.b32.xlu1 %v2057_v3, %s3857_s25  ;;  %2056 = vst [vmem:[#allocation3 + $0x18] sm:$0xff] %v2057_v3  ;;  %s2614_s25 = sshll.u32 %s2719_s13, 4  ;;  %s2615_s25 = int_to_ptr.vmem [resolvable:$false] %s2614_s25 }
 0xac6   : > { %s2616_s29 = scalar_lea.vmem %s2615_s25, 32 }
 0xac9   : > { %2072 = vrot.lane.b32.xlu0 %v2057_v3, %s3854_s16  ;;  %2039 = vrot.lane.b32.xlu1 %v2057_v3, %s3859_s30 }
 0xacd   : > { %2083 = vrot.lane.b32.xlu0 %v2057_v3, %s3827_s6  ;;  %2050 = vrot.lane.b32.xlu1 %v2057_v3, %s3861_s8 }
 0xad1   : > { %2101 = vperm.xlu0 %2573, %v2098_v26   ;;  %2063 = vrot.lane.b32.xlu1 %v2609_v27, %s3826_s5  ;;  %s3874_s5 = sld [smem:[#allocation8_spill]] }
 0xad5   : > { %2074 = vrot.lane.b32.xlu1 %v2609_v27, %s3854_s16 }
 0xad7   : > { %s159_s23 = sand.u32 1, %s3874_s5  }
 0xad8   : > { %s160_s27 = scalar_lea.vmem [#allocation4], %s159_s23  ;;  %s2150_s16 = scalar_lea.sflag [#allocation5], %s159_s23 }
 0xad9   : > { %2085 = vrot.lane.b32.xlu1 %v2609_v27, %s3827_s6  ;;  %s3875_s6 = sld [smem:[#allocation11_spill]]  ;;  %s2162_s0 = sshll.u32 %s160_s27, 4  ;;  %s3662_s0 = int_to_ptr.vmem [resolvable:$true] %s2162_s0 }
 0xada   : > { %s2610_s22 = scalar_lea.vmem %s3662_s0, 16  ;;  %p2617_p0 = scmp.lt.s32.totalorder %s3662_s0, %s2615_s25 }
 0xadb   : > { %p2611_p11 = scmp.ne.s32.totalorder %s3662_s0, %s2610_s22  ;;  %p2618_p1 = scmp.lt.s32.totalorder %s2616_s29, %s2610_s22 }
 0xadd   : > { %p2612_p12 = pnand %p2611_p11, %p2778_p5  ;;  %p2619_p2 = por %p2618_p1, %p2617_p0 }
 0xadf   : > { %s2260_s4 = sshll.u32 %s3875_s6, 4  ;;  %p2613_p13 = pneg %p2612_p12 }
 0xae0   : > { %s3660_s15 = scalar_lea.hbm %s3878_s3, %s2260_s4 }
 0xae1   : > { %p2620_p3 = pnand %p2619_p2, %p2613_p13 }
 0xb37   : > { %v2029_v4 = vpop.permute.xlu1 %2028  ;;  %v2062_v32 = vpop.permute.xlu0 %2061 }
 0xb38   : > { %v2030_v30 = vsel %vm3872_vm0, %v2027_v19, %v2029_v4 }
 0xb39   : > { %2032 = vst [vmem:[#allocation3] sm:$0xff] %v2030_v30  ;;  %2471 = vmatpush3.bf16.msra.mxu1 %v2030_v30 }
 0xb3a   : > { %2472 = vmatprep.subr.bf16.mxu1 %v2681_v11 }
 0xb3b   : > { %v2040_v6 = vpop.permute.xlu1 %2039  ;;  %v2073_v35 = vpop.permute.xlu0 %2072 }
 0xb3c   : > { %v2041_v31 = vsel %vm3873_vm1, %v2038_v28, %v2040_v6 }
 0xb3d   : > { %2043 = vst [vmem:[#allocation3 + $0x8] sm:$0xff] %v2041_v31  ;;  %2473 = vmatpush3.bf16.msra.mxu1 %v2041_v31 }
 0xb3e   : > { %2474 = vmatprep.subr.bf16.mxu1 %v2681_v11 }
 0xb3f   : > { %v2051_v59 = vpop.permute.xlu1 %2050  ;;  %v2084_v36 = vpop.permute.xlu0 %2083 }
 0xb40   : > { %v2052_v8 = vsel %vm209_vm5, %v2049_v21, %v2051_v59  ;;  %vm3876_vm5 = vcmask 916480  }
 0xb41   : > { %2054 = vst [vmem:[#allocation3 + $0x10] sm:$0xff] %v2052_v8  ;;  %2475 = vmatpush3.bf16.msra.mxu1 %v2052_v8 }
 0xb42   : > { %2476 = vmatprep.subr.bf16.mxu1 %v2681_v11 }
 0xb43   : > { %v2064_v34 = vpop.permute.xlu1 %2063 }
 0xb44   : > { %v2065_v10 = vsel %vm1592_vm15, %v2062_v32, %v2064_v34 }
 0xb45   : > { %2067 = vst [vmem:[#allocation3 + $0x20] sm:$0xff] %v2065_v10  ;;  %2477 = vmatpush3.bf16.msra.mxu1 %v2057_v3 }
 0xb46   : > { %2478 = vmatprep.subr.bf16.mxu1 %v2681_v11 }
 0xb47   : > { %v2075_v1 = vpop.permute.xlu1 %2074 }
 0xb48   : > { %v2076_v15 = vsel %vm1604_vm10, %v2073_v35, %v2075_v1 }
 0xb49   : > { %2078 = vst [vmem:[#allocation3 + $0x28] sm:$0xff] %v2076_v15  ;;  %2479 = vmatpush3.bf16.msra.mxu1 %v2065_v10 }
 0xb4a   : > { %2480 = vmatprep.subr.bf16.mxu1 %v2681_v11 }
 0xb4b   : > { %v2086_v17 = vpop.permute.xlu1 %2085 }
 0xb4c   : > { %v2087_v29 = vsel %vm1616_vm4, %v2084_v36, %v2086_v17 }
 0xb4d   : > { %2089 = vst [vmem:[#allocation3 + $0x30] sm:$0xff] %v2087_v29  ;;  %2481 = vmatpush3.bf16.msra.mxu1 %v2076_v15 }
 0xb4e   : > { %2482 = vmatprep.subr.bf16.mxu1 %v2681_v11 }
 0xb50   : > { %v2102_v33 = vpop.permute.xlu0 %2101 }
 0xb51   : > { %2483 = vmatpush3.bf16.msra.mxu1 %v2087_v29 }
 0xb54   : > { %2485 = vmatmul.mubr.msk.bf16.vlgmr.msra.gmra.mrb[24].mxu1 %vm3876_vm5, %v2090_v18 }
 0xc27   : > { %v2141_v37 = vpop.f32.mrb[24].mxu1 }
 0xc28   : > { %v2142_v20 = vadd.f32 %v2141_v37, %v2102_v33  ;;  %v2486_v38 = vpop.f32.mrb[25].mxu1 }
 0xc29   : > { %v2144_v39 = vpop.f32.mrb[26].mxu1 }
 0xc2a   : > { %2606 = vtanh.f32 %v2142_v20  ;;  %v2487_v22 = vpop.f32.mrb[27].mxu1 }
 0xc34   : > { %v2607_v11 = vpop.eup %2606 }
 0xc35   : > { %2148 = vst [vmem:[%s160_s27] sm:$0x1] %v2607_v11 }
 0xc36   : > { %2623 = shalt.err (!%p2620_p3)
}
 0xc37   : > { %s2624_s30 = scalar_lea.hbm %s3660_s15, 16  ;;  %s2628_s9 = scalar_lea.hbm %s3878_s3, 32 }
 0xc38   : > { %p2625_p4 = scmp.ne.s32.totalorder %s3660_s15, %s2624_s30  ;;  %p2629_p9 = scmp.lt.u32.totalorder %s3660_s15, %s3878_s3 }
 0xc39   : > { %p2630_p10 = scmp.lt.u32.totalorder %s2628_s9, %s2624_s30  ;;  %p2632_p12 = scmp.lt.u32.totalorder %s2624_s30, %s3660_s15 }
 0xc3a   : > { %p2626_p7 = pnand %p2625_p4, %p2778_p5 }
 0xc3b   : > { %p2631_p11 = por %p2630_p10, %p2629_p9 }
 0xc3c   : > { %p2627_p8 = pneg %p2626_p7 }
 0xc3d   : > { %p2633_p13 = por %p2632_p12, %p2631_p11 }
 0xc3f   : > { %p2634_p0 = pnand %p2633_p13, %p2627_p8 }
 0xc41   : > { %2637 = shalt.err (!%p2634_p0)
}
 0xc42   : > { %2488 = dma.vmem_to_hbm [thread:$0]  (%p2778_p5), %s3662_s0, 16, %s3660_s15, %s2150_s16  }
 0xc43 PF: > { %s3879_s19 = sld [smem:[#allocation10_spill]]  ;;  %s3880_s20 = sld [smem:[#allocation7_spill]] }
 0xc49   : > { %p2494_p1 = scmp.ge.s32.totalorder %s3879_s19, 2  ;;  %s2174_s26 = sand.u32 1, %s3880_s20  }
 0xc4a   : > { %s2175_s28 = scalar_lea.sflag [#allocation5], %s2174_s26 }
 0xc4b   : > { %p2491_p2 = pnand %p2494_p1, %p2782_p6 }
 0xc4d   : > { %2655 = dma.done.wait (!%p2491_p2), %s2175_s28, 16  }
 0xc4e   : > { %2657 = vsyncadd (!%p2491_p2), %s2175_s28, 4294967280  ;;  %s3882_s15 = sld [smem:[#allocation12_spill]]  ;;  %s3883_s12 = sld [smem:[#allocation8_spill]] }
 0xc4f   : > { %s3884_s13 = sld [smem:[#allocation9_spill]]  ;;  %s3885_s14 = sld [smem:[#allocation13_spill]] }
 0xc54   : > { %p13_p3 = scmp.ge.s32.totalorder %s3882_s15, 4  }
 0xc56   :  { %15 = sbr.rel (!%p13_p3) target bundleno = 7 (0x7), region = 67 }
 0xc5d   :  { %2179 = vsyncpa [#allocation5], 1 }
 0xc5e   :  { %2181 = vsyncpa [#allocation5 + $0x1], 1 }

</bundles_post_ra>
